<compile_context>
chip_gen: v7x
topology: tpu7x:2x2x1
jax: 0.10.0
libtpu: 0.0.40
codegen_flags: <defaults>
</compile_context>

<pallas_src>
import functools

import jax
import jax.numpy as jnp
from jax.experimental import pallas as pl
from jax.experimental.pallas import tpu as pltpu


def _round_up(a, b):
    return ((a + b - 1) // b) * b


def _has_256_deep_mxu_and_bf16_valu():
    """True on v6e / v7x (256-deep MXU, bf16 VALU).  False on v5e and older, or
    when detection fails (conservative path is always correct)."""
    try:
        kind = jax.devices()[0].device_kind.lower()
    except Exception:
        return False
    return not any(tag in kind for tag in ("v2", "v3", "v4", "v5"))


# ----------------------------- Pallas kernel -------------------------------
def _mlp_edge_kernel(idx_ref, eT_ref, a_ref, b1_ref, w2_ref, b2_ref,
                     w3_ref, b3_ref, w4_ref, b4_ref, o_ref,
                     *, n_nodes, fold_edge, bf16_relu):
    tile_e = idx_ref.shape[1]
    two_n = 2 * n_nodes

    # Fused gather + layer-1 v/u terms: one stacked 0/1 selector
    # (2*n_nodes, tile_e) applied on the MXU against the precomputed
    # A_vu = [W1_v @ x.T | W1_u @ x.T].  The selector is exact, so the gather
    # adds no rounding error.
    # NOTE: this one-hot path scales to thousands of nodes (A_vu costs ~0.5 KB
    # of VMEM per node); only past that is a scalar-prefetch / DMA column
    # gather of A_vu worth it.
    node_iota = jax.lax.broadcasted_iota(jnp.int32, (two_n, tile_e), 0)
    idx_v = idx_ref[0:1, :]                      # matches selector rows [0, n)
    idx_u = idx_ref[1:2, :] + n_nodes            # matches selector rows [n, 2n)
    hit = (node_iota == idx_v) | (node_iota == idx_u)
    onehot = jnp.where(hit, 1.0, 0.0).astype(jnp.bfloat16)

    eT = eT_ref[...]                              # (edge_dim, tile_e) bf16
    a = a_ref[...]                                # (256, 2n [+ edge_dim]) bf16

    if fold_edge:
        # v6e/v7x: K = 2n + edge_dim still rounds to a single 256-deep MXU
        # pass, so the edge-feature term rides along for free.
        sel = jnp.concatenate([onehot, eT], axis=0)
        h = jnp.dot(a, sel, preferred_element_type=jnp.float32) + b1_ref[...]
    else:
        # v5e: keep the stacked K exactly 128; pay the small K=edge_dim dot.
        h = (jnp.dot(a[:, :two_n], onehot, preferred_element_type=jnp.float32)
             + jnp.dot(a[:, two_n:], eT, preferred_element_type=jnp.float32)
             + b1_ref[...])

    if bf16_relu:                                 # bf16 VALU: half the VPU work
        h = jnp.maximum(h.astype(jnp.bfloat16), 0)
    else:
        h = jnp.maximum(h, 0.0).astype(jnp.bfloat16)          # (256, tile_e)

    # Layer 2
    h = jnp.dot(w2_ref[...], h, preferred_element_type=jnp.float32) + b2_ref[...]
    if bf16_relu:
        h = jnp.maximum(h.astype(jnp.bfloat16), 0)
    else:
        h = jnp.maximum(h, 0.0).astype(jnp.bfloat16)          # (128, tile_e)

    # Layer 3
    h = jnp.dot(w3_ref[...], h, preferred_element_type=jnp.float32) + b3_ref[...]
    h = jnp.maximum(h, 0.0)                                   # (64, tile_e) f32

    # Layer 4 (64 -> 1): weighted sublane reduction instead of a degenerate
    # M=1 MXU matmul; yields a lane-dense (1, tile_e) row.
    out = jnp.sum(h * w4_ref[...], axis=0, keepdims=True) + b4_ref[...]
    o_ref[...] = out.astype(o_ref.dtype)


# ----------------------------- Wrapper ---------------------------------------
def only_mlp_forward(x, edge_index, edge_features, num_nodes, params, *, tile_e=2048):
    """Mirror of onlyMLP.forward: gather endpoint embeddings, concat with edge
    features, run the 4-layer MLP.  Gather/concat/layer-1 are fused."""
    del num_nodes  # unused by the torch forward as well
    E = edge_index.shape[1]
    n_nodes = x.shape[0]
    node_dim = x.shape[1]
    edge_dim = edge_features.shape[1]

    # Large lane-aligned edge tiles (multiple of 256), clamped for small E so
    # the padded tail stays small.  At tile_e=2048 the f32 intermediates are
    # ~6-7 MB -> fits every generation's scoped-VMEM default (16 MiB on v5e).
    tile_e = max(256, min(_round_up(tile_e, 256), _round_up(E, 256)))
    num_tiles = int(pl.cdiv(E, tile_e))
    e_pad = num_tiles * tile_e
    pad = e_pad - E
    # TODO(synk): on v7x pick tile_e so num_tiles is a multiple of 2 (two TCs)
    # and try pltpu.CORE_PARALLEL on the edge-tile axis.

    mxu256 = _has_256_deep_mxu_and_bf16_valu()
    fold_edge = mxu256      # fold eT into the stacked layer-1 matmul on v6e/v7x
    bf16_relu = mxu256      # bf16 ReLU epilogues only where there is bf16 VALU

    # Edge-major data lives on the LANE axis (last dim).  Padded tail entries
    # use node 0 / zero features; their outputs are sliced off below.
    # TODO(synk): for very large E, handle the ragged tail in-kernel instead of
    # materializing padded/transposed copies of the edge arrays in HBM.
    idx = jnp.pad(edge_index.astype(jnp.int32), ((0, 0), (0, pad)))      # (2, e_pad)
    eT = jnp.pad(edge_features.astype(jnp.bfloat16).T, ((0, 0), (0, pad)))

    (w1, b1), (w2, b2), (w3, b3), (w4, b4) = params  # torch layout: W (out,in)
    w1v = w1[:, :node_dim]
    w1u = w1[:, node_dim:2 * node_dim]
    w1e = w1[:, 2 * node_dim:]
    xT = x.astype(jnp.float32).T                                          # (node_dim, n_nodes)
    # A_vu = [W1_v @ x.T | W1_u @ x.T]: gather + layer-1 v/u terms become one
    # K = 2*n_nodes stacked matmul operand (computed in f32, stored as bf16).
    a_vu = jnp.concatenate([w1v @ xT, w1u @ xT], axis=1).astype(jnp.bfloat16)
    a_in = jnp.concatenate([a_vu, w1e.astype(jnp.bfloat16)], axis=1)      # (256, 2n+edge_dim)

    w2b = w2.astype(jnp.bfloat16)
    w3b = w3.astype(jnp.bfloat16)
    w4c = w4.T.astype(jnp.float32)                # (64, 1), f32 VPU path
    b1c = b1.reshape(-1, 1).astype(jnp.float32)
    b2c = b2.reshape(-1, 1).astype(jnp.float32)
    b3c = b3.reshape(-1, 1).astype(jnp.float32)
    b4c = b4.reshape(1, 1).astype(jnp.float32)

    def resident(arr):
        # Grid-invariant block: whole array, same block every grid step.
        return pl.BlockSpec(arr.shape, lambda i: (0,) * arr.ndim)

    def edge_block(rows):
        return pl.BlockSpec((rows, tile_e), lambda i: (0, i))

    kernel = functools.partial(_mlp_edge_kernel, n_nodes=n_nodes,
                               fold_edge=fold_edge, bf16_relu=bf16_relu)

    out = pl.pallas_call(
        kernel,
        out_shape=jax.ShapeDtypeStruct((1, e_pad), jnp.float32),
        grid_spec=pltpu.PrefetchScalarGridSpec(
            num_scalar_prefetch=0,
            grid=(num_tiles,),
            in_specs=[
                edge_block(2),              # edge endpoints (v; u), one DMA/step
                edge_block(edge_dim),       # edge features (transposed)
                resident(a_in),
                resident(b1c),
                resident(w2b), resident(b2c),
                resident(w3b), resident(b3c),
                resident(w4c), resident(b4c),
            ],
            out_specs=pl.BlockSpec((1, tile_e), lambda i: (0, i)),
        ),
        compiler_params=pltpu.CompilerParams(
            dimension_semantics=("parallel",)),   # edge-tile axis shards across TCs
    )(idx, eT, a_in, b1c, w2b, b2c, w3b, b3c, w4c, b4c)

    return out[0, :E].reshape(E, 1)


# ----------------------------- Init / reference ------------------------------
def init_mlp_params(key, node_dim, edge_dim):
    """nn.Linear-style init, torch layout: W (out,in), b (out,), U(+-1/sqrt(fan_in))."""
    dims = [2 * node_dim + edge_dim, 256, 128, 64, 1]
    params = []
    for i in range(4):
        key, kw, kb = jax.random.split(key, 3)
        bound = 1.0 / (dims[i] ** 0.5)
        w = jax.random.uniform(kw, (dims[i + 1], dims[i]),
                               minval=-bound, maxval=bound, dtype=jnp.float32)
        b = jax.random.uniform(kb, (dims[i + 1],),
                               minval=-bound, maxval=bound, dtype=jnp.float32)
        params.append((w, b))
    return params


def only_mlp_reference(x, edge_index, edge_features, params):
    v_emb = x[edge_index[0, :]]
    u_emb = x[edge_index[1, :]]
    h = jnp.concatenate([v_emb, u_emb, edge_features], axis=-1).astype(jnp.float32)
    (w1, b1), (w2, b2), (w3, b3), (w4, b4) = params
    h = jnp.maximum(h @ w1.T + b1, 0.0)
    h = jnp.maximum(h @ w2.T + b2, 0.0)
    h = jnp.maximum(h @ w3.T + b3, 0.0)
    return h @ w4.T + b4


# ----------------------------- Main -------------------------------------------
if __name__ == "__main__":
    node_dim = 16
    edge_dim = 8
    num_nodes = 64
    num_edges = 1000   # deliberately not a tile multiple: exercises ragged padding

    key = jax.random.PRNGKey(0)
    k_x, k_ei, k_ef, k_p = jax.random.split(key, 4)

    x = jax.random.normal(k_x, (num_nodes, node_dim), dtype=jnp.float32)
    edge_index = jax.random.randint(k_ei, (2, num_edges), 0, num_nodes, dtype=jnp.int32)
    edge_features = jax.random.normal(k_ef, (num_edges, edge_dim), dtype=jnp.float32)
    params = init_mlp_params(k_p, node_dim, edge_dim)

    pred = only_mlp_forward(x, edge_index, edge_features, num_nodes, params)
    pred = jax.block_until_ready(pred)

    ref = only_mlp_reference(x, edge_index, edge_features, params)
    assert pred.shape == (num_edges, 1)
    # bf16 matmul operands (f32 accumulation) vs pure-f32 reference -> loosened tol.
    assert jnp.allclose(pred, ref, atol=3e-2, rtol=3e-2), "mismatch vs reference"

    print("KERNEL_OK")
</pallas_src>

<mosaic_0001>
module attributes {stable_mosaic.version = 11 : i64} {
  func.func @_mlp_edge_kernel(%arg0: i32, %arg1: memref<2x1024xi32, #tpu.memory_space<vmem>>, %arg2: memref<8x1024xbf16, #tpu.memory_space<vmem>>, %arg3: memref<256x136xbf16, #tpu.memory_space<vmem>>, %arg4: memref<256x1xf32, #tpu.memory_space<vmem>>, %arg5: memref<128x256xbf16, #tpu.memory_space<vmem>>, %arg6: memref<128x1xf32, #tpu.memory_space<vmem>>, %arg7: memref<64x128xbf16, #tpu.memory_space<vmem>>, %arg8: memref<64x1xf32, #tpu.memory_space<vmem>>, %arg9: memref<64x1xf32, #tpu.memory_space<vmem>>, %arg10: memref<1x1xf32, #tpu.memory_space<vmem>>, %arg11: memref<1x1024xf32, #tpu.memory_space<vmem>>) attributes {dimension_semantics = [#tpu.dimension_semantics<parallel>], iteration_bounds = array<i64: 1>, scalar_prefetch = 0 : i64, scratch_operands = 0 : i64, tpu.core_type = #tpu.core_type<tc>, window_params = [{transform_indices = @transform_0, window_bounds = array<i64: 2, 1024>}, {transform_indices = @transform_1, window_bounds = array<i64: 8, 1024>}, {pipeline_mode = #tpu.pipeline_mode<synchronous>, transform_indices = @transform_2, window_bounds = array<i64: 256, 136>}, {pipeline_mode = #tpu.pipeline_mode<synchronous>, transform_indices = @transform_3, window_bounds = array<i64: 256, 1>}, {pipeline_mode = #tpu.pipeline_mode<synchronous>, transform_indices = @transform_4, window_bounds = array<i64: 128, 256>}, {pipeline_mode = #tpu.pipeline_mode<synchronous>, transform_indices = @transform_5, window_bounds = array<i64: 128, 1>}, {pipeline_mode = #tpu.pipeline_mode<synchronous>, transform_indices = @transform_6, window_bounds = array<i64: 64, 128>}, {pipeline_mode = #tpu.pipeline_mode<synchronous>, transform_indices = @transform_7, window_bounds = array<i64: 64, 1>}, {pipeline_mode = #tpu.pipeline_mode<synchronous>, transform_indices = @transform_8, window_bounds = array<i64: 64, 1>}, {pipeline_mode = #tpu.pipeline_mode<synchronous>, transform_indices = @transform_9, window_bounds = array<i64: 1, 1>}, {transform_indices = @transform_10, window_bounds = array<i64: 1, 1024>}]} {
    %0 = tpu.iota {dimensions = array<i32: 0>} : vector<128x1024xi32>
    %c0 = arith.constant 0 : index
    %c0_0 = arith.constant 0 : index
    %1 = vector.load %arg1[%c0, %c0_0] : memref<2x1024xi32, #tpu.memory_space<vmem>>, vector<1x1024xi32>
    %c1 = arith.constant 1 : index
    %c0_1 = arith.constant 0 : index
    %2 = vector.load %arg1[%c1, %c0_1] : memref<2x1024xi32, #tpu.memory_space<vmem>>, vector<1x1024xi32>
    %c64_i32 = arith.constant 64 : i32
    %3 = vector.broadcast %c64_i32 : i32 to vector<1x1024xi32>
    %4 = arith.addi %2, %3 : vector<1x1024xi32>
    %5 = vector.broadcast %1 : vector<1x1024xi32> to vector<128x1024xi32>
    %6 = arith.cmpi eq, %0, %5 : vector<128x1024xi32>
    %7 = vector.broadcast %4 : vector<1x1024xi32> to vector<128x1024xi32>
    %8 = arith.cmpi eq, %0, %7 : vector<128x1024xi32>
    %9 = arith.ori %6, %8 : vector<128x1024xi1>
    %cst = arith.constant 1.000000e+00 : f32
    %cst_2 = arith.constant 0.000000e+00 : f32
    %10 = vector.broadcast %cst : f32 to vector<128x1024xf32>
    %11 = vector.broadcast %cst_2 : f32 to vector<128x1024xf32>
    %12 = arith.select %9, %10, %11 : vector<128x1024xi1>, vector<128x1024xf32>
    %13 = arith.truncf %12 : vector<128x1024xf32> to vector<128x1024xbf16>
    %c0_3 = arith.constant 0 : index
    %c0_4 = arith.constant 0 : index
    %14 = vector.load %arg2[%c0_3, %c0_4] : memref<8x1024xbf16, #tpu.memory_space<vmem>>, vector<8x1024xbf16>
    %c0_5 = arith.constant 0 : index
    %c0_6 = arith.constant 0 : index
    %15 = vector.load %arg3[%c0_5, %c0_6] : memref<256x136xbf16, #tpu.memory_space<vmem>>, vector<256x136xbf16>
    %16 = tpu.concatenate %13, %14 in 0 : vector<128x1024xbf16>, vector<8x1024xbf16> -> vector<136x1024xbf16>
    %cst_7 = arith.constant dense<0.000000e+00> : vector<256x1024xf32>
    %17 = tpu.matmul %15, %16, %cst_7 {dimension_numbers = #tpu.dot_dimension_numbers<[1], [0], [0], [1], [0, 0, 1, 1], [], []>} : vector<256x136xbf16>, vector<136x1024xbf16>, vector<256x1024xf32> -> vector<256x1024xf32>
    %c0_8 = arith.constant 0 : index
    %c0_9 = arith.constant 0 : index
    %18 = vector.load %arg4[%c0_8, %c0_9] : memref<256x1xf32, #tpu.memory_space<vmem>>, vector<256x1xf32>
    %19 = vector.broadcast %18 : vector<256x1xf32> to vector<256x1024xf32>
    %20 = arith.addf %17, %19 : vector<256x1024xf32>
    %21 = arith.truncf %20 : vector<256x1024xf32> to vector<256x1024xbf16>
    %cst_10 = arith.constant 0.000000e+00 : bf16
    %22 = vector.broadcast %cst_10 : bf16 to vector<256x1024xbf16>
    %23 = arith.maximumf %21, %22 : vector<256x1024xbf16>
    %c0_11 = arith.constant 0 : index
    %c0_12 = arith.constant 0 : index
    %24 = vector.load %arg5[%c0_11, %c0_12] : memref<128x256xbf16, #tpu.memory_space<vmem>>, vector<128x256xbf16>
    %cst_13 = arith.constant dense<0.000000e+00> : vector<128x1024xf32>
    %25 = tpu.matmul %24, %23, %cst_13 {dimension_numbers = #tpu.dot_dimension_numbers<[1], [0], [0], [1], [0, 0, 1, 1], [], []>} : vector<128x256xbf16>, vector<256x1024xbf16>, vector<128x1024xf32> -> vector<128x1024xf32>
    %c0_14 = arith.constant 0 : index
    %c0_15 = arith.constant 0 : index
    %26 = vector.load %arg6[%c0_14, %c0_15] : memref<128x1xf32, #tpu.memory_space<vmem>>, vector<128x1xf32>
    %27 = vector.broadcast %26 : vector<128x1xf32> to vector<128x1024xf32>
    %28 = arith.addf %25, %27 : vector<128x1024xf32>
    %29 = arith.truncf %28 : vector<128x1024xf32> to vector<128x1024xbf16>
    %cst_16 = arith.constant 0.000000e+00 : bf16
    %30 = vector.broadcast %cst_16 : bf16 to vector<128x1024xbf16>
    %31 = arith.maximumf %29, %30 : vector<128x1024xbf16>
    %c0_17 = arith.constant 0 : index
    %c0_18 = arith.constant 0 : index
    %32 = vector.load %arg7[%c0_17, %c0_18] : memref<64x128xbf16, #tpu.memory_space<vmem>>, vector<64x128xbf16>
    %cst_19 = arith.constant dense<0.000000e+00> : vector<64x1024xf32>
    %33 = tpu.matmul %32, %31, %cst_19 {dimension_numbers = #tpu.dot_dimension_numbers<[1], [0], [0], [1], [0, 0, 1, 1], [], []>} : vector<64x128xbf16>, vector<128x1024xbf16>, vector<64x1024xf32> -> vector<64x1024xf32>
    %c0_20 = arith.constant 0 : index
    %c0_21 = arith.constant 0 : index
    %34 = vector.load %arg8[%c0_20, %c0_21] : memref<64x1xf32, #tpu.memory_space<vmem>>, vector<64x1xf32>
    %35 = vector.broadcast %34 : vector<64x1xf32> to vector<64x1024xf32>
    %36 = arith.addf %33, %35 : vector<64x1024xf32>
    %cst_22 = arith.constant 0.000000e+00 : f32
    %37 = vector.broadcast %cst_22 : f32 to vector<64x1024xf32>
    %38 = arith.maximumf %36, %37 : vector<64x1024xf32>
    %c0_23 = arith.constant 0 : index
    %c0_24 = arith.constant 0 : index
    %39 = vector.load %arg9[%c0_23, %c0_24] : memref<64x1xf32, #tpu.memory_space<vmem>>, vector<64x1xf32>
    %40 = vector.broadcast %39 : vector<64x1xf32> to vector<64x1024xf32>
    %41 = arith.mulf %38, %40 : vector<64x1024xf32>
    %cst_25 = arith.constant dense<0.000000e+00> : vector<1024xf32>
    %42 = vector.multi_reduction <add>, %41, %cst_25 [0] : vector<64x1024xf32> to vector<1024xf32>
    %43 = vector.shape_cast %42 : vector<1024xf32> to vector<1x1024xf32>
    %c0_26 = arith.constant 0 : index
    %c0_27 = arith.constant 0 : index
    %44 = vector.load %arg10[%c0_26, %c0_27] : memref<1x1xf32, #tpu.memory_space<vmem>>, vector<1x1xf32>
    %45 = vector.broadcast %44 : vector<1x1xf32> to vector<1x1024xf32>
    %46 = arith.addf %43, %45 : vector<1x1024xf32>
    %c0_28 = arith.constant 0 : index
    %c0_29 = arith.constant 0 : index
    %47 = vector.load %arg11[%c0_28, %c0_29] : memref<1x1024xf32, #tpu.memory_space<vmem>>, vector<1x1024xf32>
    tpu.vector_store %arg11[%c0_28, %c0_29], %46 {strides = array<i32>} : memref<1x1024xf32, #tpu.memory_space<vmem>>, vector<1x1024xf32>,
    return
  }
  func.func @transform_0(%arg0: i32) -> (i32, i32) {
    %c0_i32 = arith.constant 0 : i32
    %c0_i32_0 = arith.constant 0 : i32
    return %c0_i32, %arg0 : i32, i32
  }
  func.func @transform_1(%arg0: i32) -> (i32, i32) {
    %c0_i32 = arith.constant 0 : i32
    %c0_i32_0 = arith.constant 0 : i32
    return %c0_i32, %arg0 : i32, i32
  }
  func.func @transform_2(%arg0: i32) -> (i32, i32) {
    %c0_i32 = arith.constant 0 : i32
    %c0_i32_0 = arith.constant 0 : i32
    %c0_i32_1 = arith.constant 0 : i32
    return %c0_i32, %c0_i32_0 : i32, i32
  }
  func.func @transform_3(%arg0: i32) -> (i32, i32) {
    %c0_i32 = arith.constant 0 : i32
    %c0_i32_0 = arith.constant 0 : i32
    %c0_i32_1 = arith.constant 0 : i32
    return %c0_i32, %c0_i32_0 : i32, i32
  }
  func.func @transform_4(%arg0: i32) -> (i32, i32) {
    %c0_i32 = arith.constant 0 : i32
    %c0_i32_0 = arith.constant 0 : i32
    %c0_i32_1 = arith.constant 0 : i32
    return %c0_i32, %c0_i32_0 : i32, i32
  }
  func.func @transform_5(%arg0: i32) -> (i32, i32) {
    %c0_i32 = arith.constant 0 : i32
    %c0_i32_0 = arith.constant 0 : i32
    %c0_i32_1 = arith.constant 0 : i32
    return %c0_i32, %c0_i32_0 : i32, i32
  }
  func.func @transform_6(%arg0: i32) -> (i32, i32) {
    %c0_i32 = arith.constant 0 : i32
    %c0_i32_0 = arith.constant 0 : i32
    %c0_i32_1 = arith.constant 0 : i32
    return %c0_i32, %c0_i32_0 : i32, i32
  }
  func.func @transform_7(%arg0: i32) -> (i32, i32) {
    %c0_i32 = arith.constant 0 : i32
    %c0_i32_0 = arith.constant 0 : i32
    %c0_i32_1 = arith.constant 0 : i32
    return %c0_i32, %c0_i32_0 : i32, i32
  }
  func.func @transform_8(%arg0: i32) -> (i32, i32) {
    %c0_i32 = arith.constant 0 : i32
    %c0_i32_0 = arith.constant 0 : i32
    %c0_i32_1 = arith.constant 0 : i32
    return %c0_i32, %c0_i32_0 : i32, i32
  }
  func.func @transform_9(%arg0: i32) -> (i32, i32) {
    %c0_i32 = arith.constant 0 : i32
    %c0_i32_0 = arith.constant 0 : i32
    %c0_i32_1 = arith.constant 0 : i32
    return %c0_i32, %c0_i32_0 : i32, i32
  }
  func.func @transform_10(%arg0: i32) -> (i32, i32) {
    %c0_i32 = arith.constant 0 : i32
    %c0_i32_0 = arith.constant 0 : i32
    return %c0_i32, %arg0 : i32, i32
  }
}

</mosaic_0001>

<bundles_post_ra>
// kernel: tpu_custom_call.1
= control target key start
LH: loop header
LB: loop body
LE: loop exit
PB: predicated region body
PF: predicated region fallthrough
CT: control target
= control target key end

     0   :  { %s7132_s0 = inlined_call_operand.vmem [shape: s32[2,1024], index: 0, kind: input, shape index: {}]   ;;  %s7133_s1 = inlined_call_operand.vmem [shape: bf16[8,1024], index: 1, kind: input, shape index: {}]   ;;  %s7134_s2 = inlined_call_operand.vmem [shape: bf16[256,136], index: 2, kind: input, shape index: {}]   ;;  %s7135_s3 = inlined_call_operand.vmem [shape: f32[256,1], index: 3, kind: input, shape index: {}]   ;;  %s7136_s4 = inlined_call_operand.vmem [shape: bf16[128,256], index: 4, kind: input, shape index: {}]   ;;  %s7137_s5 = inlined_call_operand.vmem [shape: f32[128,1], index: 5, kind: input, shape index: {}]   ;;  %s7138_s6 = inlined_call_operand.vmem [shape: bf16[64,128], index: 6, kind: input, shape index: {}]   ;;  %s7139_s7 = inlined_call_operand.vmem [shape: f32[64,1], index: 7, kind: input, shape index: {}]   ;;  %s7140_s8 = inlined_call_operand.vmem [shape: f32[64,1], index: 8, kind: input, shape index: {}]   ;;  %s7141_s9 = inlined_call_operand.<no memory space> [shape: f32[1,1], index: 9, kind: input, shape index: {}]   ;;  %s7142_s10 = inlined_call_operand.hbm [shape: f32[1,1024], index: 10, kind: output, shape index: {}]  }
   0x1   :  { %v15_v0 = vstv %s7141_s9 }
   0x2   :  { %16 = vst [vmem:[#allocation2] sm:$0x1] %v15_v0 }
   0x3   :  { %v39_v1 = vlaneseq  ;;  %v3709_v2 = vld [vmem:[%s7132_s0 + $0x1] ss:$2 sm:$0xff]  ;;  %vm7143_vm0 = vcmask 64512   ;;  %v4157_v6 = vld [vmem:[%s7132_s0] ss:$2 sm:$0xff]  ;;  %v4082_v11 = vmov 0  }
   0x4   :  { %v4149_v4 = vadd.s32 64, %v3709_v2  ;;  %v3976_v5 = vld [vmem:[%s7134_s2 + $0x4] ss:$8 sps:$4 sm:$0xff]   ;;  %3970 = vset.pattern.permute.xlu0 %v4082_v11  ;;  %3971 = vset.pattern.permute.xlu1 %v4082_v11  ;;  %v758_v22 = vld [vmem:[%s7135_s3 + $0x10] sm:$0xff]  ;;  %v4083_v25 = vmov 1.0|1.0  }
   0x5   :  { %v4147_v3 = vshrl.u32 %v39_v1, 7  ;;  %3783 = vmatprep.mubr.msk.bf16.mxu0 %vm7143_vm0, %v3976_v5  ;;  %3832 = vmatprep.mubr.msk.bf16.mxu1 %vm7143_vm0, %v3976_v5  ;;  %v756_v12 = vld [vmem:[%s7135_s3] sm:$0xff]  ;;  %v757_v20 = vld [vmem:[%s7135_s3 + $0x8] sm:$0xff]  ;;  %v759_v26 = vld [vmem:[%s7135_s3 + $0x18] sm:$0xff] }
   0x6   :  { %790 = vperm.xlu0 %3970, %v756_v12   ;;  %v760_v21 = vld [vmem:[%s7135_s3 + $0x20] sm:$0xff]  ;;  %800 = vperm.xlu1 %3971, %v758_v22   ;;  %v762_v29 = vld [vmem:[%s7135_s3 + $0x30] sm:$0xff]  ;;  %v761_v30 = vld [vmem:[%s7135_s3 + $0x28] sm:$0xff] }
   0x7   :  { %v4160_v7 = vadd.s32 8, %v4147_v3  ;;  %v66_v8 = vsub.s32 1, %v4147_v3  ;;  %v74_v9 = vsub.s32 3, %v4147_v3  ;;  %v4165_v10 = vsub.s32 0, %v4147_v3  ;;  %v764_v31 = vld [vmem:[%s7135_s3 + $0x40] sm:$0xff]  ;;  %v763_v32 = vld [vmem:[%s7135_s3 + $0x38] sm:$0xff] }
   0x8   :  { %v70_v19 = vsub.s32 2, %v4147_v3  ;;  %v4239_v27 = vadd.s32 16, %v4147_v3  ;;  %v4247_v28 = vadd.s32 24, %v4147_v3  ;;  %v766_v33 = vld [vmem:[%s7135_s3 + $0x50] sm:$0xff]  ;;  %v4296_v34 = vadd.s32 32, %v4147_v3  ;;  %v765_v35 = vld [vmem:[%s7135_s3 + $0x48] sm:$0xff] }
   0x9   :  { %v4175_v13 = vrot.slane %v4157_v6, %v66_v8  ;;  %v4178_v14 = vrot.slane %v4149_v4, %v66_v8  ;;  %v4181_v15 = vrot.slane %v4157_v6, %v74_v9  ;;  %v4184_v16 = vrot.slane %v4149_v4, %v74_v9  ;;  %v768_v37 = vld [vmem:[%s7135_s3 + $0x60] sm:$0xff]  ;;  %v767_v38 = vld [vmem:[%s7135_s3 + $0x58] sm:$0xff]  ;;  %v770_v39 = vld [vmem:[%s7135_s3 + $0x70] sm:$0xff] }
   0xa   :  { %v4188_v17 = vrot.slane %v4157_v6, %v4165_v10  ;;  %v4192_v18 = vrot.slane %v4149_v4, %v4165_v10  ;;  %795 = vperm.xlu0 %3970, %v757_v20   ;;  %v4221_v23 = vrot.slane %v4157_v6, %v70_v19  ;;  %v4224_v24 = vrot.slane %v4149_v4, %v70_v19  ;;  %v769_v40 = vld [vmem:[%s7135_s3 + $0x68] sm:$0xff]  ;;  %v772_v44 = vld [vmem:[%s7135_s3 + $0x80] sm:$0xff]  ;;  %v771_v53 = vld [vmem:[%s7135_s3 + $0x78] sm:$0xff] }
   0xb   :  { %vm93_vm1 = vcmp.eq.s32.totalorder %v4147_v3, %v4175_v13  ;;  %vm101_vm2 = vcmp.eq.s32.totalorder %v4160_v7, %v4175_v13  ;;  %vm253_vm3 = vcmp.eq.s32.totalorder %v4147_v3, %v4178_v14  ;;  %vm261_vm4 = vcmp.eq.s32.totalorder %v4160_v7, %v4178_v14  ;;  %805 = vperm.xlu1 %3971, %v759_v26   ;;  %v774_v56 = vld [vmem:[%s7135_s3 + $0x90] sm:$0xff]  ;;  %v773_v57 = vld [vmem:[%s7135_s3 + $0x88] sm:$0xff]  ;;  %v776_v62 = vld [vmem:[%s7135_s3 + $0xa0] sm:$0xff] }
   0xc   :  { %vm381_vm5 = vmor %vm93_vm1, %vm253_vm3  ;;  %vm95_vm6 = vcmp.eq.s32.totalorder %v4147_v3, %v4181_v15  ;;  %vm255_vm7 = vcmp.eq.s32.totalorder %v4147_v3, %v4184_v16  ;;  %vm103_vm9 = vcmp.eq.s32.totalorder %v4160_v7, %v4181_v15  ;;  %vm263_vm10 = vcmp.eq.s32.totalorder %v4160_v7, %v4184_v16  ;;  %v775_v19 = vld [vmem:[%s7135_s3 + $0x98] sm:$0xff]  ;;  %v785_v55 = vld [vmem:[%s7135_s3 + $0xe8] sm:$0xff] }
   0xd   :  { %vm389_vm8 = vmor %vm101_vm2, %vm261_vm4  ;;  %vm92_vm13 = vcmp.eq.s32.totalorder %v4147_v3, %v4188_v17  ;;  %vm252_vm14 = vcmp.eq.s32.totalorder %v4147_v3, %v4192_v18  ;;  %vm100_vm1 = vcmp.eq.s32.totalorder %v4160_v7, %v4188_v17  ;;  %vm260_vm2 = vcmp.eq.s32.totalorder %v4160_v7, %v4192_v18  ;;  %v2214_v8 = vld [vmem:[%s7137_s5 + $0x20] sm:$0xff]  ;;  %v2213_v20 = vld [vmem:[%s7137_s5 + $0x18] sm:$0xff] }
   0xe   :  { %vm3750_vm11 = vmpackc.low %vm389_vm8, %vm381_vm5  ;;  %810 = vperm.xlu0 %3970, %v760_v21   ;;  %vm94_vm5 = vcmp.eq.s32.totalorder %v4147_v3, %v4221_v23  ;;  %vm102_vm8 = vcmp.eq.s32.totalorder %v4160_v7, %v4221_v23  ;;  %v4307_v36 = vadd.s32 40, %v4147_v3  ;;  %v4353_v42 = vadd.s32 48, %v4147_v3  ;;  %v777_v21 = vld [vmem:[%s7135_s3 + $0xa8] sm:$0xff]  ;;  %v2220_v26 = vld [vmem:[%s7137_s5 + $0x50] sm:$0xff] }
   0xf   :  { %3751 = vmatprep.subr.msk.bf16.mxu0 %vm3750_vm11, %v4083_v25  ;;  %vm383_vm12 = vmor %vm95_vm6, %vm255_vm7  ;;  %vm254_vm6 = vcmp.eq.s32.totalorder %v4147_v3, %v4224_v24  ;;  %815 = vperm.xlu1 %3971, %v761_v30   ;;  %v4356_v43 = vadd.s32 56, %v4147_v3  ;;  %v4376_v45 = vadd.s32 64, %v4147_v3  ;;  %v4390_v47 = vadd.s32 72, %v4147_v3  ;;  %v2215_v22 = vld [vmem:[%s7137_s5 + $0x28] sm:$0xff]  ;;  %v2225_v41 = vld [vmem:[%s7137_s5 + $0x78] sm:$0xff] }
  0x10   :  { %vm391_vm15 = vmor %vm103_vm9, %vm263_vm10  ;;  %vm262_vm9 = vcmp.eq.s32.totalorder %v4160_v7, %v4224_v24  ;;  %v4393_v48 = vadd.s32 80, %v4147_v3  ;;  %v4396_v49 = vadd.s32 88, %v4147_v3  ;;  %v4399_v50 = vadd.s32 96, %v4147_v3  ;;  %v701_v30 = vld [vmem:[%s7133_s1 + $0x8] sm:$0xff]  ;;  %v2980_v63 = vld [vmem:[%s7139_s7 + $0x30] sm:$0xff] }
  0x11   :  { %vm3799_vm3 = vmpackc.low %vm391_vm15, %vm383_vm12  ;;  %vm109_vm12 = vcmp.eq.s32.totalorder %v4239_v27, %v4175_v13  ;;  %vm117_vm15 = vcmp.eq.s32.totalorder %v4247_v28, %v4175_v13  ;;  %v82_v51 = vsub.s32 5, %v4147_v3  ;;  %v90_v52 = vsub.s32 7, %v4147_v3 }
  0x12   :  { %3800 = vmatprep.subr.msk.bf16.mxu1 %vm3799_vm3, %v4083_v25  ;;  %vm380_vm4 = vmor %vm92_vm13, %vm252_vm14  ;;  %vm269_vm13 = vcmp.eq.s32.totalorder %v4239_v27, %v4178_v14  ;;  %820 = vperm.xlu0 %3970, %v762_v29   ;;  %v78_v54 = vsub.s32 4, %v4147_v3  ;;  %vm308_vm0 = vcmp.eq.s32.totalorder %v4356_v43, %v4192_v18  ;;  %v86_v2 = vsub.s32 6, %v4147_v3  ;;  %v780_v29 = vld [vmem:[%s7135_s3 + $0xc0] sm:$0xff] }
  0x13   :  { %vm388_vm7 = vmor %vm100_vm1, %vm260_vm2  ;;  %vm277_vm1 = vcmp.eq.s32.totalorder %v4247_v28, %v4178_v14  ;;  %825 = vperm.xlu1 %3971, %v763_v32   ;;  %v4467_v58 = vrot.slane %v4157_v6, %v82_v51  ;;  %v4470_v59 = vrot.slane %v4149_v4, %v82_v51  ;;  %v4473_v60 = vrot.slane %v4157_v6, %v90_v52  ;;  %v779_v32 = vld [vmem:[%s7135_s3 + $0xb8] sm:$0xff]  ;;  %v786_v51 = vld [vmem:[%s7135_s3 + $0xf0] sm:$0xff] }
  0x14   :  { %vm3752_vm10 = vmpackc.low %vm388_vm7, %vm380_vm4  ;;  %vm111_vm4 = vcmp.eq.s32.totalorder %v4239_v27, %v4181_v15  ;;  %vm119_vm7 = vcmp.eq.s32.totalorder %v4247_v28, %v4181_v15  ;;  %v4476_v61 = vrot.slane %v4149_v4, %v90_v52  ;;  %v4495_v0 = vrot.slane %v4157_v6, %v78_v54  ;;  %v783_v52 = vld [vmem:[%s7135_s3 + $0xd8] sm:$0xff] }
  0x15   :  { %3753 = vmatpush1.bf16.msk.msra.mxu0 %vm3752_vm10, %v4083_v25  ;;  %vm382_vm11 = vmor %vm94_vm5, %vm254_vm6  ;;  %vm271_vm5 = vcmp.eq.s32.totalorder %v4239_v27, %v4184_v16  ;;  %v4498_v1 = vrot.slane %v4149_v4, %v78_v54  ;;  %v4557_v9 = vrot.slane %v4157_v6, %v86_v2  ;;  %v4560_v12 = vrot.slane %v4149_v4, %v86_v2  ;;  %v778_v4 = vld [vmem:[%s7135_s3 + $0xb0] sm:$0xff]  ;;  %v2210_v54 = vld [vmem:[%s7137_s5] sm:$0xff] }
  0x16   :  { %vm390_vm14 = vmor %vm102_vm8, %vm262_vm9  ;;  %vm279_vm8 = vcmp.eq.s32.totalorder %v4247_v28, %v4184_v16  ;;  %830 = vperm.xlu0 %3970, %v764_v31   ;;  %v4901_v46 = vadd.s32 104, %v4147_v3  ;;  %v5070_v2 = vadd.s32 112, %v4147_v3  ;;  %v5073_v5 = vadd.s32 120, %v4147_v3  ;;  %v2216_v6 = vld [vmem:[%s7137_s5 + $0x30] sm:$0xff]  ;;  %v2221_v31 = vld [vmem:[%s7137_s5 + $0x58] sm:$0xff] }
  0x17   :  { %vm3801_vm2 = vmpackc.low %vm390_vm14, %vm382_vm11  ;;  %vm108_vm11 = vcmp.eq.s32.totalorder %v4239_v27, %v4188_v17  ;;  %vm116_vm14 = vcmp.eq.s32.totalorder %v4247_v28, %v4188_v17  ;;  %835 = vperm.xlu1 %3971, %v765_v35   ;;  %v2223_v35 = vld [vmem:[%s7137_s5 + $0x68] sm:$0xff] }
  0x18   :  { %3802 = vmatpush1.bf16.msk.msra.mxu1 %vm3801_vm2, %v4083_v25  ;;  %vm397_vm3 = vmor %vm109_vm12, %vm269_vm13  ;;  %vm268_vm12 = vcmp.eq.s32.totalorder %v4239_v27, %v4192_v18 }
  0x19   :  { %vm405_vm6 = vmor %vm117_vm15, %vm277_vm1  ;;  %vm276_vm15 = vcmp.eq.s32.totalorder %v4247_v28, %v4192_v18 }
  0x1a   :  { %vm3754_vm9 = vmpackc.low %vm405_vm6, %vm397_vm3  ;;  %vm110_vm3 = vcmp.eq.s32.totalorder %v4239_v27, %v4221_v23  ;;  %vm118_vm6 = vcmp.eq.s32.totalorder %v4247_v28, %v4221_v23  ;;  %840 = vperm.xlu0 %3970, %v766_v33   ;;  %v782_v33 = vld [vmem:[%s7135_s3 + $0xd0] sm:$0xff] }
  0x1b   :  { %3755 = vmatprep.subr.msk.bf16.mxu0 %vm3754_vm9, %v4083_v25  ;;  %vm399_vm10 = vmor %vm111_vm4, %vm271_vm5  ;;  %vm270_vm4 = vcmp.eq.s32.totalorder %v4239_v27, %v4224_v24  ;;  %845 = vperm.xlu1 %3971, %v767_v38   ;;  %v781_v38 = vld [vmem:[%s7135_s3 + $0xc8] sm:$0xff] }
  0x1c   :  { %vm407_vm13 = vmor %vm119_vm7, %vm279_vm8  ;;  %vm278_vm7 = vcmp.eq.s32.totalorder %v4247_v28, %v4224_v24 }
  0x1d   :  { %vm3803_vm1 = vmpackc.low %vm407_vm13, %vm399_vm10  ;;  %vm125_vm10 = vcmp.eq.s32.totalorder %v4296_v34, %v4175_v13  ;;  %vm133_vm13 = vcmp.eq.s32.totalorder %v4307_v36, %v4175_v13 }
  0x1e   :  { %3804 = vmatprep.subr.msk.bf16.mxu1 %vm3803_vm1, %v4083_v25  ;;  %vm396_vm2 = vmor %vm108_vm11, %vm268_vm12  ;;  %vm285_vm11 = vcmp.eq.s32.totalorder %v4296_v34, %v4178_v14  ;;  %850 = vperm.xlu0 %3970, %v768_v37   ;;  %v5261_v37 = vld [vmem:[%s7134_s2] ss:$8 sps:$4 sm:$0xff]  }
  0x1f   :  { %vm404_vm5 = vmor %vm116_vm14, %vm276_vm15  ;;  %vm293_vm14 = vcmp.eq.s32.totalorder %v4307_v36, %v4178_v14  ;;  %855 = vperm.xlu1 %3971, %v769_v40   ;;  %v784_v40 = vld [vmem:[%s7135_s3 + $0xe0] sm:$0xff] }
  0x20   :  { %vm3756_vm8 = vmpackc.low %vm404_vm5, %vm396_vm2  ;;  %vm127_vm2 = vcmp.eq.s32.totalorder %v4296_v34, %v4181_v15  ;;  %vm135_vm5 = vcmp.eq.s32.totalorder %v4307_v36, %v4181_v15 }
  0x21   :  { %3757 = vmatpush1.bf16.msk.msra.mxu0 %vm3756_vm8, %v4083_v25  ;;  %vm398_vm9 = vmor %vm110_vm3, %vm270_vm4  ;;  %vm287_vm3 = vcmp.eq.s32.totalorder %v4296_v34, %v4184_v16 }
  0x22   :  { %vm406_vm12 = vmor %vm118_vm6, %vm278_vm7  ;;  %vm295_vm6 = vcmp.eq.s32.totalorder %v4307_v36, %v4184_v16  ;;  %860 = vperm.xlu0 %3970, %v770_v39   ;;  %v5278_v39 = vld [vmem:[%s7134_s2 + $0x14] ss:$8 sps:$4 sm:$0xff]  }
  0x23   :  { %vm3805_vm15 = vmpackc.low %vm406_vm12, %vm398_vm9  ;;  %vm124_vm9 = vcmp.eq.s32.totalorder %v4296_v34, %v4188_v17  ;;  %vm132_vm12 = vcmp.eq.s32.totalorder %v4307_v36, %v4188_v17  ;;  %865 = vperm.xlu1 %3971, %v771_v53   ;;  %v5329_v53 = vld [vmem:[%s7134_s2 + $0x24] ss:$8 sps:$4 sm:$0xff]  }
  0x24   :  { %3806 = vmatpush1.bf16.msk.msra.mxu1 %vm3805_vm15, %v4083_v25  ;;  %vm413_vm1 = vmor %vm125_vm10, %vm285_vm11  ;;  %vm284_vm10 = vcmp.eq.s32.totalorder %v4296_v34, %v4192_v18 }
  0x25   :  { %vm421_vm4 = vmor %vm133_vm13, %vm293_vm14  ;;  %vm292_vm13 = vcmp.eq.s32.totalorder %v4307_v36, %v4192_v18  ;;  %vm126_vm14 = vcmp.eq.s32.totalorder %v4296_v34, %v4221_v23 }
  0x26   :  { %vm3758_vm7 = vmpackc.low %vm421_vm4, %vm413_vm1  ;;  %vm134_vm1 = vcmp.eq.s32.totalorder %v4307_v36, %v4221_v23  ;;  %870 = vperm.xlu0 %3970, %v772_v44   ;;  %v3402_v44 = vld [vmem:[%s7140_s8] sm:$0xff] }
  0x27   :  { %3759 = vmatprep.subr.msk.bf16.mxu0 %vm3758_vm7, %v4083_v25  ;;  %vm4344_vm8 = vmor %vm127_vm2, %vm287_vm3  ;;  %vm286_vm2 = vcmp.eq.s32.totalorder %v4296_v34, %v4224_v24  ;;  %vm294_vm3 = vcmp.eq.s32.totalorder %v4307_v36, %v4224_v24  ;;  %vm149_vm7 = vcmp.eq.s32.totalorder %v4356_v43, %v4175_v13  ;;  %875 = vperm.xlu1 %3971, %v773_v57   ;;  %v2212_v57 = vld [vmem:[%s7137_s5 + $0x10] sm:$0xff] }
  0x28   :  { %vm423_vm11 = vmor %vm135_vm5, %vm295_vm6  ;;  %vm141_vm6 = vcmp.eq.s32.totalorder %v4353_v42, %v4175_v13 }
  0x29   :  { %vm3807_vm15 = vmpackc.low %vm423_vm11, %vm4344_vm8  ;;  %vm143_vm11 = vcmp.eq.s32.totalorder %v4353_v42, %v4181_v15 }
  0x2a   :  { %3808 = vmatprep.subr.msk.bf16.mxu1 %vm3807_vm15, %v4083_v25  ;;  %vm4385_vm4 = vmor %vm124_vm9, %vm284_vm10  ;;  %vm301_vm9 = vcmp.eq.s32.totalorder %v4353_v42, %v4178_v14  ;;  %vm309_vm10 = vcmp.eq.s32.totalorder %v4356_v43, %v4178_v14  ;;  %vm303_vm15 = vcmp.eq.s32.totalorder %v4353_v42, %v4184_v16  ;;  %880 = vperm.xlu0 %3970, %v774_v56   ;;  %v5381_v56 = vld [vmem:[%s7134_s2 + $0x20] ss:$8 sps:$4 sm:$0xff]  }
  0x2b   :  { %vm420_vm5 = vmor %vm132_vm12, %vm292_vm13  ;;  %885 = vperm.xlu1 %3971, %v775_v19   ;;  %v2211_v19 = vld [vmem:[%s7137_s5 + $0x8] sm:$0xff] }
  0x2c   :  { %vm3760_vm8 = vmpackc.low %vm420_vm5, %vm4385_vm4  ;;  %vm311_vm4 = vcmp.eq.s32.totalorder %v4356_v43, %v4184_v16  ;;  %vm157_vm5 = vcmp.eq.s32.totalorder %v4376_v45, %v4175_v13 }
  0x2d   :  { %3761 = vmatpush1.bf16.msk.msra.mxu0 %vm3760_vm8, %v4083_v25  ;;  %vm4432_vm12 = vmor %vm126_vm14, %vm286_vm2  ;;  %vm148_vm2 = vcmp.eq.s32.totalorder %v4356_v43, %v4188_v17  ;;  %vm300_vm8 = vcmp.eq.s32.totalorder %v4353_v42, %v4192_v18 }
  0x2e   :  { %vm422_vm14 = vmor %vm134_vm1, %vm294_vm3  ;;  %890 = vperm.xlu0 %3970, %v776_v62   ;;  %v787_v62 = vld [vmem:[%s7135_s3 + $0xf8] sm:$0xff] }
  0x2f   :  { %vm3809_vm13 = vmpackc.low %vm422_vm14, %vm4432_vm12  ;;  %vm324_vm12 = vcmp.eq.s32.totalorder %v4390_v47, %v4192_v18  ;;  %895 = vperm.xlu1 %3971, %v777_v21   ;;  %vm333_vm14 = vcmp.eq.s32.totalorder %v4393_v48, %v4178_v14  ;;  %v2218_v21 = vld [vmem:[%s7137_s5 + $0x40] sm:$0xff] }
  0x30   :  { %3810 = vmatpush1.bf16.msk.msra.mxu1 %vm3809_vm13, %v4083_v25  ;;  %vm4488_vm1 = vmor %vm141_vm6, %vm301_vm9  ;;  %vm302_vm9 = vcmp.eq.s32.totalorder %v4353_v42, %v4224_v24  ;;  %vm327_vm13 = vcmp.eq.s32.totalorder %v4390_v47, %v4184_v16 }
  0x31   :  { %vm437_vm6 = vmor %vm149_vm7, %vm309_vm10  ;;  %vm165_vm7 = vcmp.eq.s32.totalorder %v4390_v47, %v4175_v13  ;;  %vm325_vm10 = vcmp.eq.s32.totalorder %v4390_v47, %v4178_v14 }
  0x32   :  { %vm3762_vm3 = vmpackc.low %vm437_vm6, %vm4488_vm1  ;;  %vm317_vm6 = vcmp.eq.s32.totalorder %v4376_v45, %v4178_v14  ;;  %900 = vperm.xlu0 %3970, %v778_v4   ;;  %v3405_v4 = vld [vmem:[%s7140_s8 + $0x18] sm:$0xff] }
  0x33   :  { %3763 = vmatprep.subr.msk.bf16.mxu0 %vm3762_vm3, %v4083_v25  ;;  %vm4532_vm1 = vmor %vm143_vm11, %vm303_vm15  ;;  %vm7154_vm11 = vcmp.eq.s32.totalorder %v4356_v43, %v4181_v15  ;;  %vm319_vm3 = vcmp.eq.s32.totalorder %v4376_v45, %v4184_v16  ;;  %905 = vperm.xlu1 %3971, %v779_v32   ;;  %v3713_v32 = vcombine.high %v701_v30, %v701_v30 }
  0x34   :  { %vm4550_vm15 = vmor %vm7154_vm11, %vm311_vm4  ;;  %vm166_vm11 = vcmp.eq.s32.totalorder %v4390_v47, %v4221_v23 }
  0x35   :  { %vm3811_vm4 = vmpackc.low %vm4550_vm15, %vm4532_vm1  ;;  %vm7157_vm1 = vcmp.eq.s32.totalorder %v4353_v42, %v4188_v17 }
  0x36   :  { %3812 = vmatprep.subr.msk.bf16.mxu1 %vm3811_vm4, %v4083_v25  ;;  %vm4593_vm15 = vmor %vm7157_vm1, %vm300_vm8  ;;  %vm7165_vm4 = vcmp.eq.s32.totalorder %v4356_v43, %v4224_v24  ;;  %910 = vperm.xlu0 %3970, %v780_v29   ;;  %vm320_vm1 = vcmp.eq.s32.totalorder %v4376_v45, %v4498_v1  ;;  %v2217_v29 = vld [vmem:[%s7137_s5 + $0x38] sm:$0xff] }
  0x37   :  { %vm4611_vm8 = vmor %vm148_vm2, %vm308_vm0  ;;  %vm181_vm0 = vcmp.eq.s32.totalorder %v4396_v49, %v4175_v13  ;;  %915 = vperm.xlu1 %3971, %v781_v38  }
  0x38   :  { %vm3764_vm2 = vmpackc.low %vm4611_vm8, %vm4593_vm15  ;;  %vm7162_vm15 = vcmp.eq.s32.totalorder %v4353_v42, %v4221_v23 }
  0x39   :  { %3765 = vmatpush1.bf16.msk.msra.mxu0 %vm3764_vm2, %v4083_v25  ;;  %vm4653_vm8 = vmor %vm7162_vm15, %vm302_vm9  ;;  %vm7166_vm9 = vcmp.eq.s32.totalorder %v4356_v43, %v4221_v23  ;;  %vm326_vm2 = vcmp.eq.s32.totalorder %v4390_v47, %v4224_v24 }
  0x3a   :  { %vm4671_vm15 = vmor %vm7166_vm9, %vm7165_vm4  ;;  %920 = vperm.xlu0 %3970, %v782_v33   ;;  %vm351_vm4 = vcmp.eq.s32.totalorder %v4399_v50, %v4184_v16  ;;  %v3712_v33 = vcombine.low %v701_v30, %v701_v30  ;;  %v5814_v30 = vld [vmem:[%s7134_s2 + $0xb4] ss:$8 sps:$4 sm:$0xff]  }
  0x3b   :  { %vm3813_vm9 = vmpackc.low %vm4671_vm15, %vm4653_vm8  ;;  %925 = vperm.xlu1 %3971, %v783_v52   ;;  %v2975_v52 = vld [vmem:[%s7139_s7 + $0x8] sm:$0xff] }
  0x3c   :  { %3814 = vmatpush1.bf16.msk.msra.mxu1 %vm3813_vm9, %v4083_v25  ;;  %vm4713_vm8 = vmor %vm157_vm5, %vm317_vm6  ;;  %vm173_vm6 = vcmp.eq.s32.totalorder %v4393_v48, %v4175_v13  ;;  %vm341_vm9 = vcmp.eq.s32.totalorder %v4396_v49, %v4178_v14 }
  0x3d   :  { %vm4731_vm5 = vmor %vm165_vm7, %vm325_vm10  ;;  %vm343_vm7 = vcmp.eq.s32.totalorder %v4396_v49, %v4184_v16 }
  0x3e   :  { %vm3766_vm10 = vmpackc.low %vm4731_vm5, %vm4713_vm8  ;;  %vm7173_vm8 = vcmp.eq.s32.totalorder %v4376_v45, %v4181_v15  ;;  %930 = vperm.xlu0 %3970, %v784_v40   ;;  %v2976_v40 = vld [vmem:[%s7139_s7 + $0x10] sm:$0xff] }
  0x3f   :  { %3767 = vmatprep.subr.msk.bf16.mxu0 %vm3766_vm10, %v4083_v25  ;;  %vm4776_vm5 = vmor %vm7173_vm8, %vm319_vm3  ;;  %vm7176_vm3 = vcmp.eq.s32.totalorder %v4390_v47, %v4181_v15  ;;  %935 = vperm.xlu1 %3971, %v785_v55   ;;  %v2979_v55 = vld [vmem:[%s7139_s7 + $0x28] sm:$0xff] }
  0x40   :  { %vm4794_vm8 = vmor %vm7176_vm3, %vm327_vm13  ;;  %vm340_vm13 = vcmp.eq.s32.totalorder %v4396_v49, %v4192_v18 }
  0x41   :  { %vm3815_vm3 = vmpackc.low %vm4794_vm8, %vm4776_vm5  ;;  %vm7179_vm5 = vcmp.eq.s32.totalorder %v4376_v45, %v4192_v18  ;;  %vm7180_vm8 = vcmp.eq.s32.totalorder %v4376_v45, %v4188_v17 }
  0x42   :  { %3816 = vmatprep.subr.msk.bf16.mxu1 %vm3815_vm3, %v4083_v25  ;;  %vm4836_vm15 = vmor %vm7180_vm8, %vm7179_vm5  ;;  %vm7183_vm5 = vcmp.eq.s32.totalorder %v4390_v47, %v4188_v17  ;;  %940 = vperm.xlu0 %3970, %v786_v51   ;;  %vm349_vm3 = vcmp.eq.s32.totalorder %v4399_v50, %v4178_v14  ;;  %v5320_v51 = vld [vmem:[%s7134_s2 + $0x10] ss:$8 sps:$4 sm:$0xff]  }
  0x43   :  { %vm4857_vm8 = vmor %vm7183_vm5, %vm324_vm12  ;;  %945 = vperm.xlu1 %3971, %v787_v62   ;;  %v3403_v62 = vld [vmem:[%s7140_s8 + $0x8] sm:$0xff] }
  0x44   :  { %vm3768_vm5 = vmpackc.low %vm4857_vm8, %vm4836_vm15  ;;  %vm7186_vm15 = vcmp.eq.s32.totalorder %v4376_v45, %v4224_v24  ;;  %vm7187_vm8 = vcmp.eq.s32.totalorder %v4376_v45, %v4221_v23 }
  0x45   :  { %3769 = vmatpush1.bf16.msk.msra.mxu0 %vm3768_vm5, %v4083_v25  ;;  %vm4896_vm10 = vmor %vm7187_vm8, %vm7186_vm15  ;;  %vm369_vm5 = vcmp.eq.s32.totalorder %v5070_v2, %v4470_v59  ;;  %vm190_vm8 = vcmp.eq.s32.totalorder %v4399_v50, %v4221_v23 }
  0x46   :  { %vm454_vm15 = vmor %vm166_vm11, %vm326_vm2  ;;  %vm7193_vm2 = vcmp.eq.s32.totalorder %v4393_v48, %v4181_v15  ;;  %2228 = vperm.xlu0 %3970, %v2210_v54   ;;  %v2978_v54 = vld [vmem:[%s7139_s7 + $0x20] sm:$0xff] }
  0x47   :  { %vm3817_vm11 = vmpackc.low %vm454_vm15, %vm4896_vm10  ;;  %2233 = vperm.xlu1 %3971, %v2211_v19   ;;  %v5453_v19 = vld [vmem:[%s7134_s2 + $0x44] ss:$8 sps:$4 sm:$0xff]  }
  0x48   :  { %3818 = vmatpush1.bf16.msk.msra.mxu1 %vm3817_vm11, %v4083_v25  ;;  %vm4946_vm10 = vmor %vm173_vm6, %vm333_vm14  ;;  %vm7197_vm6 = vcmp.eq.s32.totalorder %v4393_v48, %v4192_v18 }
  0x49   :  { %vm469_vm14 = vmor %vm181_vm0, %vm341_vm9  ;;  %vm342_vm9 = vcmp.eq.s32.totalorder %v4396_v49, %v4224_v24 }
  0x4a   :  { %vm3770_vm11 = vmpackc.low %vm469_vm14, %vm4946_vm10  ;;  %vm7192_vm14 = vcmp.eq.s32.totalorder %v4393_v48, %v4184_v16  ;;  %vm7198_vm10 = vcmp.eq.s32.totalorder %v4393_v48, %v4188_v17  ;;  %2238 = vperm.xlu0 %3970, %v2212_v57   ;;  %v5386_v57 = vld [vmem:[%s7134_s2 + $0x34] ss:$8 sps:$4 sm:$0xff]  }
  0x4b   :  { %3771 = vmatprep.subr.msk.bf16.mxu0 %vm3770_vm11, %v4083_v25  ;;  %vm4993_vm15 = vmor %vm7193_vm2, %vm7192_vm14  ;;  %vm7196_vm2 = vcmp.eq.s32.totalorder %v4396_v49, %v4181_v15  ;;  %2243 = vperm.xlu1 %3971, %v2213_v20   ;;  %v3406_v20 = vld [vmem:[%s7140_s8 + $0x20] sm:$0xff] }
  0x4c   :  { %vm471_vm14 = vmor %vm7196_vm2, %vm343_vm7  ;;  %vm334_vm7 = vcmp.eq.s32.totalorder %v4393_v48, %v4224_v24  ;;  %vm7199_vm2 = vcmp.eq.s32.totalorder %v4396_v49, %v4188_v17 }
  0x4d   :  { %vm3819_vm11 = vmpackc.low %vm471_vm14, %vm4993_vm15  ;;  %vm174_vm14 = vcmp.eq.s32.totalorder %v4393_v48, %v4221_v23 }
  0x4e   :  { %3820 = vmatprep.subr.msk.bf16.mxu1 %vm3819_vm11, %v4083_v25  ;;  %vm460_vm15 = vmor %vm7198_vm10, %vm7197_vm6  ;;  %vm182_vm10 = vcmp.eq.s32.totalorder %v4396_v49, %v4221_v23  ;;  %vm189_vm11 = vcmp.eq.s32.totalorder %v4399_v50, %v4175_v13  ;;  %2248 = vperm.xlu0 %3970, %v2214_v8   ;;  %v3404_v8 = vld [vmem:[%s7140_s8 + $0x10] sm:$0xff] }
  0x4f   :  { %vm468_vm6 = vmor %vm7199_vm2, %vm340_vm13  ;;  %vm191_vm2 = vcmp.eq.s32.totalorder %v4399_v50, %v4181_v15  ;;  %2253 = vperm.xlu1 %3971, %v2215_v22   ;;  %v5499_v22 = vld [vmem:[%s7134_s2 + $0x40] ss:$8 sps:$4 sm:$0xff]  }
  0x50   :  { %vm3772_vm0 = vmpackc.low %vm468_vm6, %vm460_vm15  ;;  %vm359_vm6 = vcmp.eq.s32.totalorder %v4901_v46, %v4184_v16 }
  0x51   :  { %3773 = vmatpush1.bf16.msk.msra.mxu0 %vm3772_vm0, %v4083_v25  ;;  %vm5061_vm13 = vmor %vm174_vm14, %vm334_vm7  ;;  %vm197_vm0 = vcmp.eq.s32.totalorder %v4901_v46, %v4175_v13  ;;  %vm357_vm7 = vcmp.eq.s32.totalorder %v4901_v46, %v4178_v14  ;;  %vm199_vm14 = vcmp.eq.s32.totalorder %v4901_v46, %v4181_v15 }
  0x52   :  { %vm470_vm15 = vmor %vm182_vm10, %vm342_vm9  ;;  %vm209_vm10 = vcmp.eq.s32.totalorder %v5070_v2, %v4467_v58  ;;  %2258 = vperm.xlu0 %3970, %v2216_v6   ;;  %v3408_v6 = vld [vmem:[%s7140_s8 + $0x30] sm:$0xff] }
  0x53   :  { %vm3821_vm9 = vmpackc.low %vm470_vm15, %vm5061_vm13  ;;  %vm373_vm15 = vcmp.eq.s32.totalorder %v5073_v5, %v4178_v14  ;;  %2263 = vperm.xlu1 %3971, %v2217_v29   ;;  %v3407_v29 = vld [vmem:[%s7140_s8 + $0x28] sm:$0xff] }
  0x54   :  { %3822 = vmatpush1.bf16.msk.msra.mxu1 %vm3821_vm9, %v4083_v25  ;;  %vm5106_vm13 = vmor %vm189_vm11, %vm349_vm3  ;;  %vm350_vm11 = vcmp.eq.s32.totalorder %v4399_v50, %v4224_v24 }
  0x55   :  { %vm485_vm3 = vmor %vm197_vm0, %vm357_vm7  ;;  %vm348_vm7 = vcmp.eq.s32.totalorder %v4399_v50, %v4192_v18 }
  0x56   :  { %vm3774_vm12 = vmpackc.low %vm485_vm3, %vm5106_vm13  ;;  %vm188_vm3 = vcmp.eq.s32.totalorder %v4399_v50, %v4188_v17  ;;  %2268 = vperm.xlu0 %3970, %v2218_v21   ;;  %v3618_v21 = vld [vmem:[#allocation2] sm:$0x1] }
  0x57   :  { %3775 = vmatprep.subr.msk.bf16.mxu0 %vm3774_vm12, %v4083_v25  ;;  %vm479_vm13 = vmor %vm191_vm2, %vm351_vm4  ;;  %vm196_vm4 = vcmp.eq.s32.totalorder %v4901_v46, %v4188_v17  ;;  %vm356_vm2 = vcmp.eq.s32.totalorder %v4901_v46, %v4192_v18 }
  0x58   :  { %vm487_vm12 = vmor %vm199_vm14, %vm359_vm6  ;;  %vm198_vm6 = vcmp.eq.s32.totalorder %v4901_v46, %v4221_v23 }
  0x59   :  { %vm3823_vm9 = vmpackc.low %vm487_vm12, %vm479_vm13  ;;  %vm358_vm13 = vcmp.eq.s32.totalorder %v4901_v46, %v4224_v24  ;;  %vm365_vm12 = vcmp.eq.s32.totalorder %v5070_v2, %v4178_v14  ;;  %v2222_v14 = vld [vmem:[%s7137_s5 + $0x60] sm:$0xff] }
  0x5a   :  { %3824 = vmatprep.subr.msk.bf16.mxu1 %vm3823_vm9, %v4083_v25  ;;  %vm476_vm0 = vmor %vm188_vm3, %vm348_vm7  ;;  %vm205_vm3 = vcmp.eq.s32.totalorder %v5070_v2, %v4175_v13  ;;  %2278 = vperm.xlu0 %3970, %v2220_v26   ;;  %v5511_v26 = vld [vmem:[%s7134_s2 + $0x54] ss:$8 sps:$4 sm:$0xff]  }
  0x5b   :  { %vm484_vm14 = vmor %vm196_vm4, %vm356_vm2  ;;  %vm213_vm2 = vcmp.eq.s32.totalorder %v5073_v5, %v4175_v13  ;;  %v700_v13 = vld [vmem:[%s7133_s1] sm:$0xff] }
  0x5c   :  { %vm3776_vm9 = vmpackc.low %vm484_vm14, %vm476_vm0  ;;  %vm207_vm0 = vcmp.eq.s32.totalorder %v5070_v2, %v4181_v15  ;;  %vm367_vm14 = vcmp.eq.s32.totalorder %v5070_v2, %v4184_v16 }
  0x5d   :  { %3777 = vmatpush1.bf16.msk.msra.mxu0 %vm3776_vm9, %v4083_v25  ;;  %vm478_vm7 = vmor %vm190_vm8, %vm350_vm11  ;;  %vm375_vm9 = vcmp.eq.s32.totalorder %v5073_v5, %v4184_v16  ;;  %v3711_v16 = vcombine.high %v700_v13, %v700_v13 }
  0x5e   :  { %vm486_vm4 = vmor %vm198_vm6, %vm358_vm13  ;;  %vm215_vm13 = vcmp.eq.s32.totalorder %v5073_v5, %v4181_v15  ;;  %v2219_v15 = vld [vmem:[%s7137_s5 + $0x48] sm:$0xff]  ;;  %2288 = vperm.xlu0 %3970, %v2222_v14   ;;  %v5657_v14 = vld [vmem:[%s7134_s2 + $0x70] ss:$8 sps:$4 sm:$0xff]  }
  0x5f   :  { %vm3825_vm8 = vmpackc.low %vm486_vm4, %vm478_vm7  ;;  %2273 = vperm.xlu1 %3971, %v2219_v15   ;;  %v5669_v15 = vld [vmem:[%s7134_s2 + $0x84] ss:$8 sps:$4 sm:$0xff]  }
  0x60   :  { %3826 = vmatpush1.bf16.msk.msra.mxu1 %vm3825_vm8, %v4083_v25  ;;  %vm493_vm11 = vmor %vm205_vm3, %vm365_vm12  ;;  %vm204_vm3 = vcmp.eq.s32.totalorder %v5070_v2, %v4188_v17  ;;  %vm364_vm12 = vcmp.eq.s32.totalorder %v5070_v2, %v4192_v18  ;;  %vm372_vm8 = vcmp.eq.s32.totalorder %v5073_v5, %v4192_v18  ;;  %v2224_v18 = vld [vmem:[%s7137_s5 + $0x70] sm:$0xff] }
  0x61   :  { %vm501_vm6 = vmor %vm213_vm2, %vm373_vm15  ;;  %vm212_vm2 = vcmp.eq.s32.totalorder %v5073_v5, %v4188_v17  ;;  %v3710_v17 = vcombine.low %v700_v13, %v700_v13  ;;  %v5565_v13 = vld [vmem:[%s7134_s2 + $0x64] ss:$8 sps:$4 sm:$0xff]  }
  0x62   :  { %vm3778_vm7 = vmpackc.low %vm501_vm6, %vm493_vm11  ;;  %vm366_vm6 = vcmp.eq.s32.totalorder %v5070_v2, %v4224_v24  ;;  %2298 = vperm.xlu0 %3970, %v2224_v18  }
  0x63   :  { %3779 = vmatprep.subr.msk.bf16.mxu0 %vm3778_vm7, %v4083_v25  ;;  %vm495_vm15 = vmor %vm207_vm0, %vm367_vm14  ;;  %vm206_vm14 = vcmp.eq.s32.totalorder %v5070_v2, %v4221_v23  ;;  %vm374_vm7 = vcmp.eq.s32.totalorder %v5073_v5, %v4224_v24  ;;  %2283 = vperm.xlu1 %3971, %v2221_v31   ;;  %v2974_v24 = vld [vmem:[%s7139_s7] sm:$0xff] }
  0x64   :  { %vm503_vm4 = vmor %vm215_vm13, %vm375_vm9  ;;  %vm214_vm9 = vcmp.eq.s32.totalorder %v5073_v5, %v4221_v23 }
  0x65   :  { %vm3827_vm11 = vmpackc.low %vm503_vm4, %vm495_vm15  ;;  %vm1141_vm15 = vcmask 1043456   ;;  %vm97_vm4 = vcmp.eq.s32.totalorder %v4147_v3, %v4467_v58 }
  0x66   :  { %3828 = vmatprep.subr.msk.bf16.mxu1 %vm3827_vm11, %v4083_v25  ;;  %vm492_vm0 = vmor %vm204_vm3, %vm364_vm12  ;;  %v1143_v23 = vsel %vm1141_vm15, %v3710_v17, 0  ;;  %v1149_v38 = vsel %vm1141_vm15, %v3712_v33, 0  ;;  %2984 = vperm.xlu0 %3970, %v2974_v24  }
  0x67   :  { %vm500_vm13 = vmor %vm212_vm2, %vm372_vm8  ;;  %vm257_vm2 = vcmp.eq.s32.totalorder %v4147_v3, %v4470_v59  ;;  %2293 = vperm.xlu1 %3971, %v2223_v35  }
  0x68   :  { %vm3780_vm3 = vmpackc.low %vm500_vm13, %vm492_vm0  ;;  %vm7204_vm13 = vcmp.eq.s32.totalorder %v4160_v7, %v4470_v59 }
  0x69   :  { %3781 = vmatpush1.bf16.msk.msra.mxu0 %vm3780_vm3, %v4083_v25  ;;  %vm494_vm12 = vmor %vm206_vm14, %vm366_vm6  ;;  %vm99_vm14 = vcmp.eq.s32.totalorder %v4147_v3, %v4473_v60  ;;  %vm259_vm6 = vcmp.eq.s32.totalorder %v4147_v3, %v4476_v61 }
  0x6a   :  { %vm502_vm8 = vmor %vm214_vm9, %vm374_vm7  ;;  %3782 = vmatprep.subr.msk.bf16.mxu0 %vm1141_vm15, %v3711_v16  ;;  %vm7205_vm9 = vcmp.eq.s32.totalorder %v4160_v7, %v4467_v58  ;;  %2994 = vperm.xlu0 %3970, %v2976_v40   ;;  %v5754_v16 = vld [vmem:[%s7134_s2 + $0x90] ss:$8 sps:$4 sm:$0xff]  }
  0x6b   :  { %vm3829_vm11 = vmpackc.low %vm502_vm8, %vm494_vm12  ;;  %vm7206_vm8 = vcmp.eq.s32.totalorder %v4160_v7, %v4476_v61  ;;  %2303 = vperm.xlu1 %3971, %v2225_v41  }
  0x6c   :  { %3830 = vmatpush1.bf16.msk.msra.mxu1 %vm3829_vm11, %v4083_v25  ;;  %vm385_vm0 = vmor %vm97_vm4, %vm257_vm2  ;;  %vm96_vm4 = vcmp.eq.s32.totalorder %v4147_v3, %v4495_v0  ;;  %vm256_vm2 = vcmp.eq.s32.totalorder %v4147_v3, %v4498_v1  ;;  %vm7207_vm11 = vcmp.eq.s32.totalorder %v4160_v7, %v4473_v60 }
  0x6d   :  { %3831 = vmatprep.subr.msk.bf16.mxu1 %vm1141_vm15, %v3713_v32  ;;  %1183 = vmatpush1.bf16.msra.mxu0 %v1143_v23  ;;  %vm393_vm7 = vmor %vm7205_vm9, %vm7204_vm13  ;;  %vm98_vm9 = vcmp.eq.s32.totalorder %v4147_v3, %v4557_v9 }
  0x6e   :  { %vm3848_vm3 = vmpackc.low %vm393_vm7, %vm385_vm0  ;;  %vm258_vm7 = vcmp.eq.s32.totalorder %v4147_v3, %v4560_v12  ;;  %3412 = vperm.xlu0 %3970, %v3402_v44  }
  0x6f   :  { %3849 = vmatprep.subr.msk.bf16.mxu0 %vm3848_vm3, %v4083_v25  ;;  %vm387_vm12 = vmor %vm99_vm14, %vm259_vm6  ;;  %vm7208_vm6 = vcmask 64512   ;;  %vm7209_vm3 = vcmp.eq.s32.totalorder %v4160_v7, %v4498_v1  ;;  %2989 = vperm.xlu1 %3971, %v2975_v52  }
  0x70   :  { %1376 = vmatpush1.bf16.msra.mxu1 %v1149_v38  ;;  %1199 = vmatmul.mubr.bf16.vlgmr.msra.gmra.mrb[0].mxu0 %v5261_v37  ;;  %vm395_vm0 = vmor %vm7207_vm11, %vm7206_vm8 }
  0x71   :  { %vm3897_vm14 = vmpackc.low %vm395_vm0, %vm387_vm12  ;;  %3784 = vmatprep.mubr.msk.bf16.mxu0 %vm7208_vm6, %v5278_v39  ;;  %vm7210_vm12 = vcmp.eq.s32.totalorder %v4160_v7, %v4495_v0  ;;  %vm7212_vm0 = vcmp.eq.s32.totalorder %v4160_v7, %v4560_v12 }
  0x72   :  { %3898 = vmatprep.subr.msk.bf16.mxu1 %vm3897_vm14, %v4083_v25  ;;  %vm384_vm13 = vmor %vm96_vm4, %vm256_vm2  ;;  %vm7213_vm14 = vcmp.eq.s32.totalorder %v4160_v7, %v4557_v9  ;;  %v2977_v7 = vld [vmem:[%s7139_s7 + $0x18] sm:$0xff]  ;;  %3004 = vperm.xlu0 %3970, %v2978_v54  }
  0x73   :  { %1392 = vmatmul.mubr.bf16.vlgmr.msra.gmra.mrb[0].mxu1 %v5261_v37  ;;  %vm392_vm8 = vmor %vm7210_vm12, %vm7209_vm3  ;;  %2999 = vperm.xlu1 %3971, %v2977_v7  }
  0x74   :  { %vm3850_vm4 = vmpackc.low %vm392_vm8, %vm384_vm13  ;;  %vm7217_vm8 = vcmp.eq.s32.totalorder %v4247_v28, %v4470_v59 }
  0x75   :  { %vm7211_vm2 = vmmov %vm7208_vm6  ;;  %3851 = vmatpush1.bf16.msk.msra.mxu0 %vm3850_vm4, %v4083_v25  ;;  %vm7218_vm4 = vcmp.eq.s32.totalorder %v4247_v28, %v4467_v58 }
  0x76   :  { %3833 = vmatprep.mubr.msk.bf16.mxu1 %vm7211_vm2, %v5278_v39  ;;  %vm386_vm11 = vmor %vm98_vm9, %vm258_vm7  ;;  %vm7214_vm9 = vcmp.eq.s32.totalorder %v4239_v27, %v4470_v59  ;;  %vm7215_vm7 = vcmp.eq.s32.totalorder %v4239_v27, %v4467_v58  ;;  %3009 = vperm.xlu0 %3970, %v2979_v55  }
  0x77   :  { %vm394_vm6 = vmor %vm7213_vm14, %vm7212_vm0  ;;  %vm7219_vm0 = vcmp.eq.s32.totalorder %v4239_v27, %v4476_v61  ;;  %vm7220_vm14 = vcmp.eq.s32.totalorder %v4239_v27, %v4473_v60  ;;  %3417 = vperm.xlu1 %3971, %v3403_v62  }
  0x78   :  { %vm3899_vm13 = vmpackc.low %vm394_vm6, %vm386_vm11  ;;  %1209 = vmatmul.mubr.bf16.gmra.mrb[4].mxu0 %v5320_v51 }
  0x79   :  { %3900 = vmatpush1.bf16.msk.msra.mxu1 %vm3899_vm13, %v4083_v25  ;;  %vm401_vm3 = vmor %vm7215_vm7, %vm7214_vm9  ;;  %vm7222_vm9 = vcmp.eq.s32.totalorder %v4247_v28, %v4476_v61  ;;  %vm7223_vm7 = vcmp.eq.s32.totalorder %v4247_v28, %v4473_v60 }
  0x7a   :  { %vm7216_vm12 = vmmov %vm7211_vm2  ;;  %3014 = vperm.xlu0 %3970, %v2980_v63  }
  0x7b   :  { %3785 = vmatprep.mubr.msk.bf16.mxu0 %vm7216_vm12, %v5329_v53  ;;  %vm409_vm2 = vmor %vm7218_vm4, %vm7217_vm8  ;;  %1402 = vmatmul.mubr.bf16.gmra.mrb[4].mxu1 %v5320_v51  ;;  %vm7224_vm8 = vcmp.eq.s32.totalorder %v4239_v27, %v4498_v1  ;;  %vm7225_vm4 = vcmp.eq.s32.totalorder %v4239_v27, %v4495_v0 }
  0x7c   :  { %vm3852_vm11 = vmpackc.low %vm409_vm2, %vm401_vm3  ;;  %3422 = vperm.xlu1 %3971, %v3404_v8  }
  0x7d   :  { %3853 = vmatprep.subr.msk.bf16.mxu0 %vm3852_vm11, %v4083_v25  ;;  %vm403_vm6 = vmor %vm7220_vm14, %vm7219_vm0  ;;  %vm7226_vm11 = vcmp.eq.s32.totalorder %v4247_v28, %v4498_v1  ;;  %vm7227_vm0 = vcmp.eq.s32.totalorder %v4247_v28, %v4495_v0 }
  0x7e   :  { %vm7221_vm13 = vmmov %vm7216_vm12 }
  0x7f   :  { %3834 = vmatprep.mubr.msk.bf16.mxu1 %vm7221_vm13, %v5329_v53  ;;  %vm411_vm3 = vmor %vm7223_vm7, %vm7222_vm9  ;;  %vm7228_vm13 = vcmp.eq.s32.totalorder %v4239_v27, %v4560_v12  ;;  %vm7229_vm9 = vcmp.eq.s32.totalorder %v4239_v27, %v4557_v9  ;;  %v2981_v27 = vld [vmem:[%s7139_s7 + $0x38] sm:$0xff] }
  0x80   :  { %vm3901_vm12 = vmpackc.low %vm411_vm3, %vm403_vm6  ;;  %1219 = vmatmul.mubr.bf16.gmra.mrb[8].mxu0 %v5381_v56  ;;  %vm7230_vm3 = vcmask 64512   ;;  %3019 = vperm.xlu0 %3970, %v2981_v27  }
  0x81   :  { %3902 = vmatprep.subr.msk.bf16.mxu1 %vm3901_vm12, %v4083_v25  ;;  %vm400_vm2 = vmor %vm7225_vm4, %vm7224_vm8  ;;  %3786 = vmatprep.mubr.msk.bf16.mxu0 %vm7230_vm3, %v5386_v57  ;;  %vm7231_vm12 = vcmp.eq.s32.totalorder %v4247_v28, %v4560_v12  ;;  %vm7232_vm8 = vcmp.eq.s32.totalorder %v4247_v28, %v4557_v9  ;;  %v5436_v28 = vld [vmem:[%s7134_s2 + $0x30] ss:$8 sps:$4 sm:$0xff]  }
  0x82   :  { %vm408_vm14 = vmor %vm7227_vm0, %vm7226_vm11  ;;  %vm7234_vm0 = vcmp.eq.s32.totalorder %v4296_v34, %v4470_v59  ;;  %3427 = vperm.xlu1 %3971, %v3405_v4  }
  0x83   :  { %vm3854_vm6 = vmpackc.low %vm408_vm14, %vm400_vm2  ;;  %1412 = vmatmul.mubr.bf16.gmra.mrb[8].mxu1 %v5381_v56  ;;  %vm7235_vm14 = vcmp.eq.s32.totalorder %v4296_v34, %v4467_v58 }
  0x84   :  { %3855 = vmatpush1.bf16.msk.msra.mxu0 %vm3854_vm6, %v4083_v25  ;;  %vm402_vm7 = vmor %vm7229_vm9, %vm7228_vm13  ;;  %vm7236_vm13 = vcmp.eq.s32.totalorder %v4307_v36, %v4470_v59  ;;  %vm7237_vm9 = vcmp.eq.s32.totalorder %v4307_v36, %v4467_v58  ;;  %3442 = vperm.xlu0 %3970, %v3408_v6  }
  0x85   :  { %vm410_vm4 = vmor %vm7232_vm8, %vm7231_vm12  ;;  %vm7238_vm12 = vcmp.eq.s32.totalorder %v4296_v34, %v4476_v61  ;;  %vm7239_vm8 = vcmp.eq.s32.totalorder %v4296_v34, %v4473_v60 }
  0x86   :  { %vm3903_vm2 = vmpackc.low %vm410_vm4, %vm402_vm7  ;;  %3432 = vperm.xlu1 %3971, %v3406_v20  }
  0x87   :  { %3904 = vmatpush1.bf16.msk.msra.mxu1 %vm3903_vm2, %v4083_v25  ;;  %vm7233_vm11 = vmmov %vm7230_vm3  ;;  %vm7240_vm2 = vcmp.eq.s32.totalorder %v4307_v36, %v4476_v61 }
  0x88   :  { %3835 = vmatprep.mubr.msk.bf16.mxu1 %vm7233_vm11, %v5386_v57  ;;  %vm417_vm6 = vmor %vm7235_vm14, %vm7234_vm0  ;;  %1229 = vmatmul.mubr.bf16.gmra.mrb[12].mxu0 %v5436_v28  ;;  %vm7241_vm11 = vcmp.eq.s32.totalorder %v4307_v36, %v4473_v60 }
  0x89   :  { %vm425_vm7 = vmor %vm7237_vm9, %vm7236_vm13  ;;  %vm7243_vm13 = vcmp.eq.s32.totalorder %v4296_v34, %v4498_v1  ;;  %vm7244_vm9 = vcmp.eq.s32.totalorder %v4296_v34, %v4495_v0  ;;  %3621 = vperm.xlu0 %3970, %v3618_v21  }
  0x8a   :  { %vm3856_vm3 = vmpackc.low %vm425_vm7, %vm417_vm6  ;;  %vm7242_vm6 = vcmask 64512   ;;  %3437 = vperm.xlu1 %3971, %v3407_v29  }
  0x8b   :  { %3857 = vmatprep.subr.msk.bf16.mxu0 %vm3856_vm3, %v4083_v25  ;;  %vm419_vm4 = vmor %vm7239_vm8, %vm7238_vm12  ;;  %3787 = vmatprep.mubr.msk.bf16.mxu0 %vm7242_vm6, %v5453_v19  ;;  %vm7245_vm3 = vcmp.eq.s32.totalorder %v4307_v36, %v4498_v1  ;;  %vm7246_vm12 = vcmp.eq.s32.totalorder %v4307_v36, %v4495_v0 }
  0x8c   :  { %vm427_vm0 = vmor %vm7241_vm11, %vm7240_vm2  ;;  %1422 = vmatmul.mubr.bf16.gmra.mrb[12].mxu1 %v5436_v28  ;;  %vm7248_vm11 = vcmp.eq.s32.totalorder %v4296_v34, %v4560_v12 }
  0x8d   :  { %vm3905_vm14 = vmpackc.low %vm427_vm0, %vm419_vm4  ;;  %vm7249_vm0 = vcmp.eq.s32.totalorder %v4296_v34, %v4557_v9  ;;  %v3409_v34 = vld [vmem:[%s7140_s8 + $0x38] sm:$0xff] }
  0x8e   :  { %3906 = vmatprep.subr.msk.bf16.mxu1 %vm3905_vm14, %v4083_v25  ;;  %vm416_vm7 = vmor %vm7244_vm9, %vm7243_vm13  ;;  %vm7251_vm13 = vcmp.eq.s32.totalorder %v4307_v36, %v4557_v9  ;;  %3447 = vperm.xlu1 %3971, %v3409_v34  }
  0x8f   :  { %vm424_vm8 = vmor %vm7246_vm12, %vm7245_vm3  ;;  %vm7252_vm3 = vcmp.eq.s32.totalorder %v4353_v42, %v4470_v59  ;;  %vm7253_vm12 = vcmp.eq.s32.totalorder %v4353_v42, %v4467_v58 }
  0x90   :  { %vm3858_vm4 = vmpackc.low %vm424_vm8, %vm416_vm7  ;;  %1239 = vmatmul.mubr.bf16.gmra.mrb[16].mxu0 %v5499_v22 }
  0x91   :  { %vm7247_vm2 = vmmov %vm7242_vm6  ;;  %3859 = vmatpush1.bf16.msk.msra.mxu0 %vm3858_vm4, %v4083_v25  ;;  %vm7250_vm6 = vcmp.eq.s32.totalorder %v4307_v36, %v4560_v12  ;;  %v5554_v36 = vld [vmem:[%s7134_s2 + $0x50] ss:$8 sps:$4 sm:$0xff]  }
  0x92   :  { %3836 = vmatprep.mubr.msk.bf16.mxu1 %vm7247_vm2, %v5453_v19  ;;  %vm418_vm14 = vmor %vm7249_vm0, %vm7248_vm11  ;;  %vm7256_vm11 = vcmp.eq.s32.totalorder %v4356_v43, %v4467_v58 }
  0x93   :  { %vm426_vm9 = vmor %vm7251_vm13, %vm7250_vm6  ;;  %vm7257_vm6 = vcmp.eq.s32.totalorder %v4353_v42, %v4476_v61  ;;  %vm7258_vm13 = vcmp.eq.s32.totalorder %v4353_v42, %v4473_v60 }
  0x94   :  { %vm3907_vm7 = vmpackc.low %vm426_vm9, %vm418_vm14  ;;  %1432 = vmatmul.mubr.bf16.gmra.mrb[16].mxu1 %v5499_v22 }
  0x95   :  { %3908 = vmatpush1.bf16.msk.msra.mxu1 %vm3907_vm7, %v4083_v25  ;;  %vm433_vm8 = vmor %vm7253_vm12, %vm7252_vm3  ;;  %vm7260_vm3 = vcmp.eq.s32.totalorder %v4356_v43, %v4476_v61  ;;  %vm7261_vm12 = vcmp.eq.s32.totalorder %v4356_v43, %v4473_v60 }
  0x96   :  { %vm7254_vm4 = vmmov %vm7247_vm2  ;;  %vm7255_vm2 = vcmp.eq.s32.totalorder %v4356_v43, %v4470_v59 }
  0x97   :  { %3788 = vmatprep.mubr.msk.bf16.mxu0 %vm7254_vm4, %v5511_v26  ;;  %vm441_vm0 = vmor %vm7256_vm11, %vm7255_vm2  ;;  %vm7262_vm2 = vcmp.eq.s32.totalorder %v4353_v42, %v4498_v1  ;;  %vm7263_vm11 = vcmp.eq.s32.totalorder %v4353_v42, %v4495_v0 }
  0x98   :  { %vm3860_vm14 = vmpackc.low %vm441_vm0, %vm433_vm8  ;;  %1249 = vmatmul.mubr.bf16.gmra.mrb[20].mxu0 %v5554_v36 }
  0x99   :  { %3861 = vmatprep.subr.msk.bf16.mxu0 %vm3860_vm14, %v4083_v25  ;;  %vm435_vm9 = vmor %vm7258_vm13, %vm7257_vm6  ;;  %vm7264_vm14 = vcmp.eq.s32.totalorder %v4356_v43, %v4498_v1  ;;  %vm7265_vm6 = vcmp.eq.s32.totalorder %v4356_v43, %v4495_v0 }
  0x9a   :  { %vm7259_vm7 = vmmov %vm7254_vm4 }
  0x9b   :  { %3837 = vmatprep.mubr.msk.bf16.mxu1 %vm7259_vm7, %v5511_v26  ;;  %vm443_vm8 = vmor %vm7261_vm12, %vm7260_vm3  ;;  %vm7266_vm7 = vcmp.eq.s32.totalorder %v4353_v42, %v4560_v12  ;;  %vm7267_vm3 = vcmp.eq.s32.totalorder %v4353_v42, %v4557_v9  ;;  %v5603_v42 = vld [vmem:[%s7134_s2 + $0x60] ss:$8 sps:$4 sm:$0xff]  }
  0x9c   :  { %vm3909_vm4 = vmpackc.low %vm443_vm8, %vm435_vm9  ;;  %vm7268_vm8 = vcmask 64512   ;;  %1442 = vmatmul.mubr.bf16.gmra.mrb[20].mxu1 %v5554_v36 }
  0x9d   :  { %3910 = vmatprep.subr.msk.bf16.mxu1 %vm3909_vm4, %v4083_v25  ;;  %vm432_vm0 = vmor %vm7263_vm11, %vm7262_vm2  ;;  %3789 = vmatprep.mubr.msk.bf16.mxu0 %vm7268_vm8, %v5565_v13  ;;  %vm7269_vm4 = vcmp.eq.s32.totalorder %v4356_v43, %v4560_v12  ;;  %vm7270_vm2 = vcmp.eq.s32.totalorder %v4356_v43, %v4557_v9  ;;  %v5614_v43 = vld [vmem:[%s7134_s2 + $0x74] ss:$8 sps:$4 sm:$0xff]  }
  0x9e   :  { %vm440_vm13 = vmor %vm7265_vm6, %vm7264_vm14  ;;  %vm7272_vm6 = vcmp.eq.s32.totalorder %v4376_v45, %v4470_v59 }
  0x9f   :  { %vm3862_vm9 = vmpackc.low %vm440_vm13, %vm432_vm0  ;;  %vm7273_vm13 = vcmp.eq.s32.totalorder %v4376_v45, %v4467_v58 }
  0xa0   :  { %3863 = vmatpush1.bf16.msk.msra.mxu0 %vm3862_vm9, %v4083_v25  ;;  %vm434_vm12 = vmor %vm7267_vm3, %vm7266_vm7  ;;  %vm7274_vm7 = vcmp.eq.s32.totalorder %v4390_v47, %v4470_v59  ;;  %vm7275_vm3 = vcmp.eq.s32.totalorder %v4390_v47, %v4467_v58 }
  0xa1   :  { %vm442_vm11 = vmor %vm7270_vm2, %vm7269_vm4  ;;  %vm7276_vm4 = vcmp.eq.s32.totalorder %v4376_v45, %v4476_v61  ;;  %vm7277_vm2 = vcmp.eq.s32.totalorder %v4376_v45, %v4473_v60  ;;  %1259 = vmatmul.mubr.bf16.gmra.mrb[24].mxu0 %v5603_v42 }
  0xa2   :  { %vm3911_vm0 = vmpackc.low %vm442_vm11, %vm434_vm12 }
  0xa3   :  { %3912 = vmatpush1.bf16.msk.msra.mxu1 %vm3911_vm0, %v4083_v25  ;;  %vm7271_vm14 = vmmov %vm7268_vm8  ;;  %vm7278_vm0 = vcmp.eq.s32.totalorder %v4390_v47, %v4476_v61 }
  0xa4   :  { %3838 = vmatprep.mubr.msk.bf16.mxu1 %vm7271_vm14, %v5565_v13  ;;  %vm449_vm9 = vmor %vm7273_vm13, %vm7272_vm6  ;;  %vm7279_vm14 = vcmp.eq.s32.totalorder %v4390_v47, %v4473_v60  ;;  %vm7280_vm13 = vcmask 64512  }
  0xa5   :  { %vm457_vm12 = vmor %vm7275_vm3, %vm7274_vm7  ;;  %3790 = vmatprep.mubr.msk.bf16.mxu0 %vm7280_vm13, %v5614_v43  ;;  %vm7281_vm7 = vcmp.eq.s32.totalorder %v4376_v45, %v4495_v0  ;;  %1452 = vmatmul.mubr.bf16.gmra.mrb[24].mxu1 %v5603_v42 }
  0xa6   :  { %vm3864_vm8 = vmpackc.low %vm457_vm12, %vm449_vm9  ;;  %vm7282_vm12 = vcmp.eq.s32.totalorder %v4390_v47, %v4498_v1 }
  0xa7   :  { %3865 = vmatprep.subr.msk.bf16.mxu0 %vm3864_vm8, %v4083_v25  ;;  %vm451_vm11 = vmor %vm7277_vm2, %vm7276_vm4  ;;  %vm7283_vm8 = vcmp.eq.s32.totalorder %v4390_v47, %v4495_v0 }
  0xa8   :  { %vm459_vm6 = vmor %vm7279_vm14, %vm7278_vm0  ;;  %vm7286_vm0 = vcmp.eq.s32.totalorder %v4376_v45, %v4557_v9 }
  0xa9   :  { %vm3913_vm9 = vmpackc.low %vm459_vm6, %vm451_vm11  ;;  %vm7287_vm6 = vcmp.eq.s32.totalorder %v4390_v47, %v4560_v12  ;;  %1269 = vmatmul.mubr.bf16.gmra.mrb[28].mxu0 %v5657_v14 }
  0xaa   :  { %3914 = vmatprep.subr.msk.bf16.mxu1 %vm3913_vm9, %v4083_v25  ;;  %vm448_vm3 = vmor %vm7281_vm7, %vm320_vm1  ;;  %vm7285_vm1 = vcmp.eq.s32.totalorder %v4376_v45, %v4560_v12  ;;  %v5706_v45 = vld [vmem:[%s7134_s2 + $0x80] ss:$8 sps:$4 sm:$0xff]  }
  0xab   :  { %vm456_vm4 = vmor %vm7283_vm8, %vm7282_vm12  ;;  %vm7290_vm12 = vcmp.eq.s32.totalorder %v4393_v48, %v4467_v58 }
  0xac   :  { %vm7284_vm2 = vmmov %vm7280_vm13  ;;  %vm7288_vm13 = vcmp.eq.s32.totalorder %v4390_v47, %v4557_v9  ;;  %v5717_v47 = vld [vmem:[%s7134_s2 + $0x94] ss:$8 sps:$4 sm:$0xff]  }
  0xad   :  { %3839 = vmatprep.mubr.msk.bf16.mxu1 %vm7284_vm2, %v5614_v43  ;;  %vm3866_vm11 = vmpackc.low %vm456_vm4, %vm448_vm3  ;;  %vm7289_vm3 = vcmp.eq.s32.totalorder %v4393_v48, %v4470_v59 }
  0xae   :  { %3867 = vmatpush1.bf16.msk.msra.mxu0 %vm3866_vm11, %v4083_v25  ;;  %vm450_vm14 = vmor %vm7286_vm0, %vm7285_vm1  ;;  %vm7293_vm11 = vcmp.eq.s32.totalorder %v4396_v49, %v4467_v58  ;;  %1462 = vmatmul.mubr.bf16.gmra.mrb[28].mxu1 %v5657_v14 }
  0xaf   :  { %vm458_vm9 = vmor %vm7288_vm13, %vm7287_vm6  ;;  %vm7295_vm6 = vcmp.eq.s32.totalorder %v4393_v48, %v4473_v60 }
  0xb0   :  { %vm3915_vm7 = vmpackc.low %vm458_vm9, %vm450_vm14  ;;  %vm7294_vm14 = vcmp.eq.s32.totalorder %v4393_v48, %v4476_v61 }
  0xb1   :  { %3916 = vmatpush1.bf16.msk.msra.mxu1 %vm3915_vm7, %v4083_v25  ;;  %vm465_vm8 = vmor %vm7290_vm12, %vm7289_vm3  ;;  %vm7297_vm7 = vcmp.eq.s32.totalorder %v4396_v49, %v4476_v61  ;;  %vm7298_vm3 = vcmp.eq.s32.totalorder %v4396_v49, %v4473_v60 }
  0xb2   :  { %vm7291_vm4 = vmmov %vm7284_vm2  ;;  %vm7292_vm2 = vcmp.eq.s32.totalorder %v4396_v49, %v4470_v59 }
  0xb3   :  { %3791 = vmatprep.mubr.msk.bf16.mxu0 %vm7291_vm4, %v5669_v15  ;;  %vm473_vm1 = vmor %vm7293_vm11, %vm7292_vm2  ;;  %vm7300_vm2 = vcmp.eq.s32.totalorder %v4393_v48, %v4495_v0 }
  0xb4   :  { %vm3868_vm0 = vmpackc.low %vm473_vm1, %vm465_vm8  ;;  %vm7301_vm1 = vcmp.eq.s32.totalorder %v4396_v49, %v4498_v1  ;;  %1279 = vmatmul.mubr.bf16.gmra.mrb[32].mxu0 %v5706_v45 }
  0xb5   :  { %3869 = vmatprep.subr.msk.bf16.mxu0 %vm3868_vm0, %v4083_v25  ;;  %vm467_vm13 = vmor %vm7295_vm6, %vm7294_vm14  ;;  %vm7302_vm0 = vcmp.eq.s32.totalorder %v4396_v49, %v4495_v0 }
  0xb6   :  { %vm7296_vm9 = vmmov %vm7291_vm4  ;;  %vm7299_vm4 = vcmp.eq.s32.totalorder %v4393_v48, %v4498_v1 }
  0xb7   :  { %3840 = vmatprep.mubr.msk.bf16.mxu1 %vm7296_vm9, %v5669_v15  ;;  %vm475_vm12 = vmor %vm7298_vm3, %vm7297_vm7  ;;  %vm7305_vm7 = vcmp.eq.s32.totalorder %v4393_v48, %v4557_v9 }
  0xb8   :  { %vm3917_vm8 = vmpackc.low %vm475_vm12, %vm467_vm13  ;;  %vm7306_vm12 = vcmp.eq.s32.totalorder %v4396_v49, %v4560_v12  ;;  %1472 = vmatmul.mubr.bf16.gmra.mrb[32].mxu1 %v5706_v45 }
  0xb9   :  { %3918 = vmatprep.subr.msk.bf16.mxu1 %vm3917_vm8, %v4083_v25  ;;  %vm464_vm11 = vmor %vm7300_vm2, %vm7299_vm4  ;;  %vm7307_vm8 = vcmp.eq.s32.totalorder %v4396_v49, %v4557_v9  ;;  %v5809_v49 = vld [vmem:[%s7134_s2 + $0xa0] ss:$8 sps:$4 sm:$0xff]  }
  0xba   :  { %vm472_vm14 = vmor %vm7302_vm0, %vm7301_vm1  ;;  %vm7309_vm1 = vcmp.eq.s32.totalorder %v4399_v50, %v4470_v59  ;;  %vm7310_vm0 = vcmp.eq.s32.totalorder %v4399_v50, %v4467_v58 }
  0xbb   :  { %vm3870_vm6 = vmpackc.low %vm472_vm14, %vm464_vm11 }
  0xbc   :  { %vm7303_vm13 = vmmov %vm7296_vm9  ;;  %3871 = vmatpush1.bf16.msk.msra.mxu0 %vm3870_vm6, %v4083_v25  ;;  %vm7304_vm9 = vcmp.eq.s32.totalorder %v4393_v48, %v4560_v12  ;;  %v5766_v48 = vld [vmem:[%s7134_s2 + $0xa4] ss:$8 sps:$4 sm:$0xff]   ;;  %vm7311_vm6 = vcmp.eq.s32.totalorder %v4901_v46, %v4470_v59 }
  0xbd   :  { %3792 = vmatprep.mubr.msk.bf16.mxu0 %vm7303_vm13, %v5717_v47  ;;  %vm466_vm3 = vmor %vm7305_vm7, %vm7304_vm9 }
  0xbe   :  { %vm474_vm4 = vmor %vm7307_vm8, %vm7306_vm12  ;;  %vm7314_vm12 = vcmp.eq.s32.totalorder %v4399_v50, %v4473_v60  ;;  %1289 = vmatmul.mubr.bf16.gmra.mrb[36].mxu0 %v5754_v16 }
  0xbf   :  { %vm3919_vm2 = vmpackc.low %vm474_vm4, %vm466_vm3  ;;  %vm7313_vm3 = vcmp.eq.s32.totalorder %v4399_v50, %v4476_v61  ;;  %vm7315_vm4 = vcmp.eq.s32.totalorder %v4901_v46, %v4476_v61 }
  0xc0   :  { %vm7308_vm11 = vmmov %vm7303_vm13  ;;  %3920 = vmatpush1.bf16.msk.msra.mxu1 %vm3919_vm2, %v4083_v25  ;;  %vm7312_vm13 = vcmp.eq.s32.totalorder %v4901_v46, %v4467_v58  ;;  %vm7316_vm2 = vcmp.eq.s32.totalorder %v4901_v46, %v4473_v60 }
  0xc1   :  { %3841 = vmatprep.mubr.msk.bf16.mxu1 %vm7308_vm11, %v5717_v47  ;;  %vm481_vm14 = vmor %vm7310_vm0, %vm7309_vm1  ;;  %vm7317_vm1 = vcmask 64512  }
  0xc2   :  { %vm489_vm9 = vmor %vm7312_vm13, %vm7311_vm6  ;;  %3793 = vmatprep.mubr.msk.bf16.mxu0 %vm7317_vm1, %v5766_v48  ;;  %vm7319_vm6 = vcmp.eq.s32.totalorder %v4399_v50, %v4495_v0  ;;  %1482 = vmatmul.mubr.bf16.gmra.mrb[36].mxu1 %v5754_v16 }
  0xc3   :  { %vm3872_vm7 = vmpackc.low %vm489_vm9, %vm481_vm14  ;;  %vm7318_vm14 = vcmp.eq.s32.totalorder %v4399_v50, %v4498_v1  ;;  %vm7320_vm9 = vcmp.eq.s32.totalorder %v4901_v46, %v4498_v1 }
  0xc4   :  { %3873 = vmatprep.subr.msk.bf16.mxu0 %vm3872_vm7, %v4083_v25  ;;  %vm483_vm8 = vmor %vm7314_vm12, %vm7313_vm3  ;;  %vm7321_vm7 = vcmp.eq.s32.totalorder %v4901_v46, %v4495_v0 }
  0xc5   :  { %vm491_vm11 = vmor %vm7316_vm2, %vm7315_vm4  ;;  %vm7323_vm4 = vcmp.eq.s32.totalorder %v4399_v50, %v4560_v12  ;;  %vm7324_vm2 = vcmp.eq.s32.totalorder %v4399_v50, %v4557_v9  ;;  %v702_v50 = vld [vmem:[%s7133_s1 + $0x10] sm:$0xff] }
  0xc6   :  { %vm3921_vm0 = vmpackc.low %vm491_vm11, %vm483_vm8  ;;  %1299 = vmatmul.mubr.bf16.gmra.mrb[40].mxu0 %v5809_v49 }
  0xc7   :  { %3922 = vmatprep.subr.msk.bf16.mxu1 %vm3921_vm0, %v4083_v25  ;;  %vm480_vm13 = vmor %vm7319_vm6, %vm7318_vm14  ;;  %vm7326_vm0 = vcmp.eq.s32.totalorder %v4901_v46, %v4557_v9 }
  0xc8   :  { %vm488_vm3 = vmor %vm7321_vm7, %vm7320_vm9  ;;  %vm7328_vm7 = vcmp.eq.s32.totalorder %v5073_v5, %v4470_v59  ;;  %v5872_v59 = vld [vmem:[%s7134_s2 + $0xc4] ss:$8 sps:$4 sm:$0xff]  }
  0xc9   :  { %vm7322_vm12 = vmmov %vm7317_vm1  ;;  %vm7325_vm1 = vcmp.eq.s32.totalorder %v4901_v46, %v4560_v12  ;;  %v3714_v46 = vcombine.low %v702_v50, %v702_v50 }
  0xca   :  { %3842 = vmatprep.mubr.msk.bf16.mxu1 %vm7322_vm12, %v5766_v48  ;;  %vm3874_vm8 = vmpackc.low %vm488_vm3, %vm480_vm13  ;;  %vm7329_vm3 = vcmp.eq.s32.totalorder %v5073_v5, %v4467_v58  ;;  %v5861_v58 = vld [vmem:[%s7134_s2 + $0xb0] ss:$8 sps:$4 sm:$0xff]  }
  0xcb   :  { %3875 = vmatpush1.bf16.msk.msra.mxu0 %vm3874_vm8, %v4083_v25  ;;  %vm482_vm11 = vmor %vm7324_vm2, %vm7323_vm4  ;;  %1492 = vmatmul.mubr.bf16.gmra.mrb[40].mxu1 %v5809_v49  ;;  %vm7330_vm4 = vcmp.eq.s32.totalorder %v5070_v2, %v4476_v61 }
  0xcc   :  { %vm490_vm14 = vmor %vm7326_vm0, %vm7325_vm1  ;;  %vm7334_vm1 = vcmp.eq.s32.totalorder %v5073_v5, %v4473_v60 }
  0xcd   :  { %vm3923_vm6 = vmpackc.low %vm490_vm14, %vm482_vm11  ;;  %vm7333_vm11 = vcmp.eq.s32.totalorder %v5073_v5, %v4476_v61  ;;  %v3715_v61 = vcombine.high %v702_v50, %v702_v50 }
  0xce   :  { %3924 = vmatpush1.bf16.msk.msra.mxu1 %vm3923_vm6, %v4083_v25  ;;  %vm497_vm13 = vmor %vm209_vm10, %vm369_vm5  ;;  %vm7331_vm5 = vcmp.eq.s32.totalorder %v5070_v2, %v4473_v60  ;;  %vm7335_vm6 = vcmp.eq.s32.totalorder %v5070_v2, %v4498_v1  ;;  %v703_v60 = vld [vmem:[%s7133_s1 + $0x18] sm:$0xff] }
  0xcf   :  { %vm7327_vm9 = vmmov %vm7322_vm12  ;;  %v3716_v17 = vcombine.low %v703_v60, %v703_v60 }
  0xd0   :  { %3794 = vmatprep.mubr.msk.bf16.mxu0 %vm7327_vm9, %v5814_v30  ;;  %vm505_vm12 = vmor %vm7329_vm3, %vm7328_vm7  ;;  %vm7337_vm7 = vcmp.eq.s32.totalorder %v5073_v5, %v4498_v1  ;;  %vm7338_vm3 = vcmp.eq.s32.totalorder %v5073_v5, %v4495_v0  ;;  %v3717_v1 = vcombine.high %v703_v60, %v703_v60 }
  0xd1   :  { %vm3876_vm8 = vmpackc.low %vm505_vm12, %vm497_vm13  ;;  %vm7336_vm13 = vcmp.eq.s32.totalorder %v5070_v2, %v4495_v0  ;;  %1309 = vmatmul.mubr.bf16.gmra.mrb[44].mxu0 %v5861_v58  ;;  %v1155_v0 = vsel %vm1141_vm15, %v3714_v46, 0 }
  0xd2   :  { %3877 = vmatprep.subr.msk.bf16.mxu0 %vm3876_vm8, %v4083_v25  ;;  %vm499_vm10 = vmor %vm7331_vm5, %vm7330_vm4  ;;  %vm7340_vm5 = vcmp.eq.s32.totalorder %v5070_v2, %v4560_v12 }
  0xd3   :  { %vm7332_vm2 = vmmov %vm7327_vm9 }
  0xd4   :  { %3843 = vmatprep.mubr.msk.bf16.mxu1 %vm7332_vm2, %v5814_v30  ;;  %vm507_vm0 = vmor %vm7334_vm1, %vm7333_vm11  ;;  %vm7342_vm11 = vcmp.eq.s32.totalorder %v5073_v5, %v4560_v12  ;;  %vm7343_vm1 = vcmp.eq.s32.totalorder %v5073_v5, %v4557_v9 }
  0xd5   :  { %vm3925_vm14 = vmpackc.low %vm507_vm0, %vm499_vm10  ;;  %vm7341_vm10 = vcmp.eq.s32.totalorder %v5070_v2, %v4557_v9  ;;  %1502 = vmatmul.mubr.bf16.gmra.mrb[44].mxu1 %v5861_v58  ;;  %v5914_v2 = vld [vmem:[%s7134_s2 + $0xc0] ss:$8 sps:$4 sm:$0xff]  }
  0xd6   :  { %3926 = vmatprep.subr.msk.bf16.mxu1 %vm3925_vm14, %v4083_v25  ;;  %vm496_vm9 = vmor %vm7336_vm13, %vm7335_vm6 }
  0xd7   :  { %vm504_vm12 = vmor %vm7338_vm3, %vm7337_vm7 }
  0xd8   :  { %vm3878_vm8 = vmpackc.low %vm504_vm12, %vm496_vm9 }
  0xd9   :  { %vm7339_vm4 = vmmov %vm7332_vm2  ;;  %3879 = vmatpush1.bf16.msk.msra.mxu0 %vm3878_vm8, %v4083_v25 }
  0xda   :  { %3795 = vmatprep.mubr.msk.bf16.mxu0 %vm7339_vm4, %v5872_v59  ;;  %vm498_vm2 = vmor %vm7341_vm10, %vm7340_vm5  ;;  %3880 = vmatprep.subr.msk.bf16.mxu0 %vm1141_vm15, %v3715_v61 }
  0xdb   :  { %vm506_vm0 = vmor %vm7343_vm1, %vm7342_vm11 }
  0xdc   :  { %vm3927_vm14 = vmpackc.low %vm506_vm0, %vm498_vm2 }
  0xdd   :  { %vm7344_vm6 = vmmov %vm7339_vm4  ;;  %3928 = vmatpush1.bf16.msk.msra.mxu1 %vm3927_vm14, %v4083_v25 }
  0xde   :  { %3844 = vmatprep.mubr.msk.bf16.mxu1 %vm7344_vm6, %v5872_v59 }
  0xdf   :  { %17 = vsyncpa [#allocation4], 0  ;;  %v5920_v9 = vld [vmem:[%s7134_s2 + $0xd4] ss:$8 sps:$4 sm:$0xff]   ;;  %3929 = vmatprep.subr.msk.bf16.mxu1 %vm1141_vm15, %v3717_v1  ;;  %1569 = vmatpush1.bf16.msra.mxu0 %v1155_v0  ;;  %v1161_v12 = vsel %vm1141_vm15, %v3716_v17, 0  ;;  %v6034_v23 = vpop.permute.xlu0 %790 }
  0xe0   :  { %1319 = vmatmul.mubr.bf16.gmra.mrb[48].mxu0 %v5914_v2  ;;  %vm7345_vm13 = vmmov %vm7339_vm4  ;;  %1512 = vmatmul.mubr.bf16.gmra.mrb[48].mxu1 %v5914_v2  ;;  %v5933_v25 = vld [vmem:[%s7134_s2 + $0xd0] ss:$8 sps:$4 sm:$0xff]   ;;  %v5938_v5 = vld [vmem:[%s7134_s2 + $0xe4] ss:$8 sps:$4 sm:$0xff]  }
  0xe1   :  { %1762 = vmatpush1.bf16.msra.mxu1 %v1161_v12  ;;  %3796 = vmatprep.mubr.msk.bf16.mxu0 %vm7345_vm13, %v5920_v9  ;;  %vm7346_vm9 = vmmov %vm7339_vm4  ;;  %v5949_v18 = vld [vmem:[%s7134_s2 + $0xe0] ss:$8 sps:$4 sm:$0xff]   ;;  %v5954_v31 = vld [vmem:[%s7134_s2 + $0xf4] ss:$8 sps:$4 sm:$0xff]  }
  0xe2   :  { %3845 = vmatprep.mubr.msk.bf16.mxu1 %vm7346_vm9, %v5920_v9  ;;  %vm7347_vm15 = vmmov %vm7339_vm4  ;;  %v5965_v32 = vld [vmem:[%s7134_s2 + $0xf0] ss:$8 sps:$4 sm:$0xff]   ;;  %v4056_v33 = vld [vmem:[%s7134_s2 + $0x4] ss:$8 sps:$4 sm:$0xff]  }
  0xe3   :  { %vm7348_vm7 = vmmov %vm7339_vm4 }
  0xe4   :  { %vm7349_vm3 = vmmov %vm7339_vm4 }
  0xe5   :  { %vm7350_vm12 = vmmov %vm7349_vm3 }
  0xe6   :  { %vm7351_vm8 = vmmov %vm7349_vm3 }
  0xe7   :  { %vm7352_vm4 = vmmov %vm7349_vm3 }
  0xe8   :  { %1329 = vmatmul.mubr.bf16.gmra.mrb[52].mxu0 %v5933_v25  ;;  %1522 = vmatmul.mubr.bf16.gmra.mrb[52].mxu1 %v5933_v25  ;;  %vm7353_vm5 = vmmov %vm7349_vm3 }
  0xe9   :  { %3797 = vmatprep.mubr.msk.bf16.mxu0 %vm7347_vm15, %v5938_v5  ;;  %3846 = vmatprep.mubr.msk.bf16.mxu1 %vm7348_vm7, %v5938_v5  ;;  %vm7354_vm10 = vmmov %vm7349_vm3 }
  0xea   :  { %vm7355_vm2 = vmmov %vm7349_vm3 }
  0xeb   :  { %vm7356_vm11 = vmmov %vm7355_vm2 }
  0xec   :  { %vm7357_vm1 = vmmov %vm7355_vm2 }
  0xed   :  { %vm7358_vm0 = vmmov %vm7357_vm1 }
  0xee   :  { %vm7359_vm14 = vmmov %vm7358_vm0 }
  0xef   :  { %vm7360_vm6 = vmmov %vm7358_vm0 }
  0xf0   :  { %1339 = vmatmul.mubr.bf16.gmra.mrb[56].mxu0 %v5949_v18  ;;  %1532 = vmatmul.mubr.bf16.gmra.mrb[56].mxu1 %v5949_v18  ;;  %vm7361_vm13 = vmmov %vm7358_vm0 }
  0xf1   :  { %3798 = vmatprep.mubr.msk.bf16.mxu0 %vm7349_vm3, %v5954_v31  ;;  %3847 = vmatprep.mubr.msk.bf16.mxu1 %vm7350_vm12, %v5954_v31  ;;  %vm7362_vm9 = vmmov %vm7358_vm0 }
  0xf2   :  { %vm7363_vm15 = vmmov %vm7358_vm0 }
  0xf3   :  { %vm7364_vm7 = vmmov %vm7358_vm0 }
  0xf4   :  { %vm7365_vm3 = vmmov %vm7358_vm0 }
  0xf5   :  { %vm7366_vm12 = vmmov %vm7358_vm0 }
  0xf8   :  { %1349 = vmatmul.mubr.bf16.gmra.mrb[60].mxu0 %v5965_v32  ;;  %1542 = vmatmul.mubr.bf16.gmra.mrb[60].mxu1 %v5965_v32 }
  0xf9   :  { %3881 = vmatprep.mubr.msk.bf16.mxu0 %vm7351_vm8, %v4056_v33  ;;  %3930 = vmatprep.mubr.msk.bf16.mxu1 %vm7352_vm4, %v4056_v33  ;;  %vm7367_vm8 = vmmov %vm7358_vm0 }
  0xfa   :  { %vm7368_vm4 = vmmov %vm7358_vm0 }
 0x100   :  { %1585 = vmatmul.mubr.bf16.vlgmr.msra.gmra.mrb[64].mxu0 %v5261_v37  ;;  %1778 = vmatmul.mubr.bf16.vlgmr.msra.gmra.mrb[64].mxu1 %v5261_v37  ;;  %v6042_v37 = vpop.permute.xlu0 %795 }
 0x101   :  { %3882 = vmatprep.mubr.msk.bf16.mxu0 %vm7353_vm5, %v5278_v39  ;;  %3931 = vmatprep.mubr.msk.bf16.mxu1 %vm7354_vm10, %v5278_v39  ;;  %vm7369_vm5 = vmmov %vm7358_vm0 }
 0x102   :  { %vm7370_vm10 = vmmov %vm7358_vm0 }
 0x104   :  { %v6079_v1 = vpop.permute.xlu0 %810 }
 0x108   :  { %1595 = vmatmul.mubr.bf16.gmra.mrb[68].mxu0 %v5320_v51  ;;  %1788 = vmatmul.mubr.bf16.gmra.mrb[68].mxu1 %v5320_v51  ;;  %v6046_v51 = vpop.permute.xlu1 %800 }
 0x109   :  { %3883 = vmatprep.mubr.msk.bf16.mxu0 %vm7355_vm2, %v5329_v53  ;;  %3932 = vmatprep.mubr.msk.bf16.mxu1 %vm7356_vm11, %v5329_v53  ;;  %vm7371_vm2 = vmmov %vm7358_vm0 }
 0x10a   :  { %vm7372_vm11 = vmmov %vm7358_vm0 }
 0x110   :  { %1605 = vmatmul.mubr.bf16.gmra.mrb[72].mxu0 %v5381_v56  ;;  %1798 = vmatmul.mubr.bf16.gmra.mrb[72].mxu1 %v5381_v56 }
 0x111   :  { %3884 = vmatprep.mubr.msk.bf16.mxu0 %vm7357_vm1, %v5386_v57  ;;  %3933 = vmatprep.mubr.msk.bf16.mxu1 %vm7358_vm0, %v5386_v57  ;;  %vm7373_vm1 = vmmov %vm7358_vm0 }
 0x118   :  { %1615 = vmatmul.mubr.bf16.gmra.mrb[76].mxu0 %v5436_v28  ;;  %1808 = vmatmul.mubr.bf16.gmra.mrb[76].mxu1 %v5436_v28 }
 0x119   :  { %3885 = vmatprep.mubr.msk.bf16.mxu0 %vm7359_vm14, %v5453_v19  ;;  %3934 = vmatprep.mubr.msk.bf16.mxu1 %vm7360_vm6, %v5453_v19  ;;  %vm7374_vm14 = vmmov %vm7358_vm0 }
 0x11a   :  { %vm7375_vm6 = vmmov %vm7358_vm0 }
 0x120   :  { %1625 = vmatmul.mubr.bf16.gmra.mrb[80].mxu0 %v5499_v22  ;;  %1818 = vmatmul.mubr.bf16.gmra.mrb[80].mxu1 %v5499_v22  ;;  %v6062_v22 = vpop.permute.xlu1 %805 }
 0x121   :  { %3886 = vmatprep.mubr.msk.bf16.mxu0 %vm7361_vm13, %v5511_v26  ;;  %3935 = vmatprep.mubr.msk.bf16.mxu1 %vm7362_vm9, %v5511_v26  ;;  %vm7376_vm13 = vmmov %vm7358_vm0 }
 0x122   :  { %vm7377_vm9 = vmmov %vm7358_vm0 }
 0x124   :  { %v6084_v33 = vpop.permute.xlu1 %815 }
 0x128   :  { %1635 = vmatmul.mubr.bf16.gmra.mrb[84].mxu0 %v5554_v36  ;;  %1828 = vmatmul.mubr.bf16.gmra.mrb[84].mxu1 %v5554_v36 }
 0x129   :  { %3887 = vmatprep.mubr.msk.bf16.mxu0 %vm7363_vm15, %v5565_v13  ;;  %3936 = vmatprep.mubr.msk.bf16.mxu1 %vm7364_vm7, %v5565_v13  ;;  %vm7378_vm15 = vmmov %vm7358_vm0 }
 0x12a   :  { %vm7379_vm7 = vmmov %vm7358_vm0 }
 0x130   :  { %1645 = vmatmul.mubr.bf16.gmra.mrb[88].mxu0 %v5603_v42  ;;  %1838 = vmatmul.mubr.bf16.gmra.mrb[88].mxu1 %v5603_v42 }
 0x131   :  { %3888 = vmatprep.mubr.msk.bf16.mxu0 %vm7365_vm3, %v5614_v43  ;;  %3937 = vmatprep.mubr.msk.bf16.mxu1 %vm7366_vm12, %v5614_v43  ;;  %vm7380_vm3 = vmmov %vm7358_vm0 }
 0x132   :  { %vm7381_vm12 = vmmov %vm7358_vm0 }
 0x138   :  { %1655 = vmatmul.mubr.bf16.gmra.mrb[92].mxu0 %v5657_v14  ;;  %1848 = vmatmul.mubr.bf16.gmra.mrb[92].mxu1 %v5657_v14 }
 0x139   :  { %3889 = vmatprep.mubr.msk.bf16.mxu0 %vm7367_vm8, %v5669_v15  ;;  %3938 = vmatprep.mubr.msk.bf16.mxu1 %vm7368_vm4, %v5669_v15 }
 0x140   :  { %1665 = vmatmul.mubr.bf16.gmra.mrb[96].mxu0 %v5706_v45  ;;  %1858 = vmatmul.mubr.bf16.gmra.mrb[96].mxu1 %v5706_v45 }
 0x141   :  { %3890 = vmatprep.mubr.msk.bf16.mxu0 %vm7369_vm5, %v5717_v47  ;;  %3939 = vmatprep.mubr.msk.bf16.mxu1 %vm7370_vm10, %v5717_v47 }
 0x143   :  { %v1200_v24 = vpop.f32.mrb[0].mxu0 }
 0x144   :  { %v1202_v35 = vpop.f32.mrb[1].mxu0  ;;  %v1201_v39 = vadd.f32 %v1200_v24, %v6034_v23 }
 0x145   :  { %v1204_v38 = vpop.f32.mrb[2].mxu0  ;;  %v1203_v52 = vadd.f32 %v1202_v35, %v6034_v23 }
 0x146   :  { %v1393_v40 = vpop.f32.mrb[0].mxu1  ;;  %v1205_v41 = vadd.f32 %v1204_v38, %v6042_v37  ;;  %v1206_v44 = vpop.f32.mrb[3].mxu0 }
 0x147   :  { %v1395_v53 = vpop.f32.mrb[1].mxu1  ;;  %v1207_v54 = vadd.f32 %v1206_v44, %v6042_v37  ;;  %v1394_v56 = vadd.f32 %v1393_v40, %v6034_v23 }
 0x148   :  { %1675 = vmatmul.mubr.bf16.gmra.mrb[100].mxu0 %v5754_v16  ;;  %1868 = vmatmul.mubr.bf16.gmra.mrb[100].mxu1 %v5754_v16  ;;  %v1938_v7 = vpack.c.bf16 %v1205_v41, %v1201_v39  ;;  %v1397_v55 = vpop.f32.mrb[2].mxu1  ;;  %v1396_v8 = vadd.f32 %v1395_v53, %v6034_v23 }
 0x149   :  { %3891 = vmatprep.mubr.msk.bf16.mxu0 %vm7371_vm2, %v5766_v48  ;;  %3940 = vmatprep.mubr.msk.bf16.mxu1 %vm7372_vm11, %v5766_v48  ;;  %v1398_v57 = vadd.f32 %v1397_v55, %v6042_v37  ;;  %v1939_v62 = vpack.c.bf16 %v1207_v54, %v1203_v52  ;;  %v1399_v63 = vpop.f32.mrb[3].mxu1 }
 0x14a   :  { %v1400_v27 = vadd.f32 %v1399_v63, %v6042_v37  ;;  %v2066_v6 = vmax.bf16 %v4082_v11, %v1938_v7 }
 0x14b   :  { %v1940_v28 = vpack.c.bf16 %v1398_v57, %v1394_v56  ;;  %v1210_v19 = vpop.f32.mrb[4].mxu0  ;;  %v2067_v4 = vmax.bf16 %v4082_v11, %v1939_v62 }
 0x14c   :  { %v1941_v20 = vpack.c.bf16 %v1400_v27, %v1396_v8  ;;  %v1212_v21 = vpop.f32.mrb[5].mxu0  ;;  %v1211_v29 = vadd.f32 %v1210_v19, %v6046_v51  ;;  %v6101_v19 = vpop.permute.xlu0 %820 }
 0x14d   :  { %v1214_v26 = vpop.f32.mrb[6].mxu0  ;;  %2386 = vmatprep.subr.bf16.mxu0 %v2067_v4  ;;  %v2068_v43 = vmax.bf16 %v4082_v11, %v1940_v28  ;;  %v1213_v14 = vadd.f32 %v1212_v21, %v6046_v51  ;;  %v6106_v21 = vpop.permute.xlu1 %825 }
 0x14e   :  { %v1403_v34 = vpop.f32.mrb[4].mxu1  ;;  %v1215_v36 = vadd.f32 %v1214_v26, %v6062_v22  ;;  %v2069_v13 = vmax.bf16 %v4082_v11, %v1941_v20  ;;  %v1216_v42 = vpop.f32.mrb[7].mxu0  ;;  %2387 = vmatpush1.bf16.msra.mxu0 %v2066_v6 }
 0x14f   :  { %v1405_v15 = vpop.f32.mrb[5].mxu1  ;;  %v1217_v45 = vadd.f32 %v1216_v42, %v6062_v22  ;;  %v1404_v48 = vadd.f32 %v1403_v34, %v6046_v51 }
 0x150   :  { %1685 = vmatmul.mubr.bf16.gmra.mrb[104].mxu0 %v5809_v49  ;;  %1878 = vmatmul.mubr.bf16.gmra.mrb[104].mxu1 %v5809_v49  ;;  %v1946_v47 = vpack.c.bf16 %v1215_v36, %v1211_v29  ;;  %v1407_v16 = vpop.f32.mrb[6].mxu1 }
 0x151   :  { %3892 = vmatprep.mubr.msk.bf16.mxu0 %vm7373_vm1, %v5814_v30  ;;  %3941 = vmatprep.mubr.msk.bf16.mxu1 %vm7358_vm0, %v5814_v30  ;;  %v1408_v49 = vadd.f32 %v1407_v16, %v6062_v22  ;;  %v1947_v30 = vpack.c.bf16 %v1217_v45, %v1213_v14  ;;  %v1409_v50 = vpop.f32.mrb[7].mxu1 }
 0x152   :  { %2499 = vmatprep.subr.bf16.mxu1 %v2069_v13  ;;  %v2074_v17 = vmax.bf16 %v4082_v11, %v1946_v47 }
 0x153   :  { %2500 = vmatpush1.bf16.msra.mxu1 %v2068_v43  ;;  %v1948_v61 = vpack.c.bf16 %v1408_v49, %v1404_v48  ;;  %v1220_v60 = vpop.f32.mrb[8].mxu0  ;;  %v2075_v46 = vmax.bf16 %v4082_v11, %v1947_v30 }
 0x154   :  { %v1222_v12 = vpop.f32.mrb[9].mxu0  ;;  %v1221_v35 = vadd.f32 %v1220_v60, %v6079_v1  ;;  %v6123_v60 = vpop.permute.xlu0 %830 }
 0x155   :  { %v1224_v24 = vpop.f32.mrb[10].mxu0  ;;  %2388 = vmatprep.subr.bf16.mxu0 %v2075_v46  ;;  %v2076_v41 = vmax.bf16 %v4082_v11, %v1948_v61  ;;  %v1223_v44 = vadd.f32 %v1222_v12, %v6079_v1  ;;  %v6128_v12 = vpop.permute.xlu1 %835 }
 0x156   :  { %v1413_v38 = vpop.f32.mrb[8].mxu1  ;;  %v1226_v40 = vpop.f32.mrb[11].mxu0  ;;  %2389 = vmatpush1.bf16.msra.mxu0 %v2074_v17 }
 0x157   :  { %v1415_v52 = vpop.f32.mrb[9].mxu1  ;;  %v1414_v7 = vadd.f32 %v1413_v38, %v6079_v1 }
 0x158   :  { %1695 = vmatmul.mubr.bf16.gmra.mrb[108].mxu0 %v5861_v58  ;;  %1888 = vmatmul.mubr.bf16.gmra.mrb[108].mxu1 %v5861_v58  ;;  %v1406_v58 = vadd.f32 %v1405_v15, %v6046_v51  ;;  %v1417_v54 = vpop.f32.mrb[10].mxu1  ;;  %v1416_v62 = vadd.f32 %v1415_v52, %v6079_v1 }
 0x159   :  { %3893 = vmatprep.mubr.msk.bf16.mxu0 %vm7374_vm14, %v5872_v59  ;;  %3942 = vmatprep.mubr.msk.bf16.mxu1 %vm7375_vm6, %v5872_v59  ;;  %v1410_v59 = vadd.f32 %v1409_v50, %v6062_v22  ;;  %v1418_v55 = vadd.f32 %v1417_v54, %v6084_v33  ;;  %v1419_v57 = vpop.f32.mrb[11].mxu1 }
 0x15a   :  { %v1420_v63 = vadd.f32 %v1419_v57, %v6084_v33 }
 0x15b   :  { %v1949_v0 = vpack.c.bf16 %v1410_v59, %v1406_v58  ;;  %v1956_v8 = vpack.c.bf16 %v1418_v55, %v1414_v7  ;;  %v1230_v27 = vpop.f32.mrb[12].mxu0 }
 0x15c   :  { %v1957_v6 = vpack.c.bf16 %v1420_v63, %v1416_v62  ;;  %v1232_v20 = vpop.f32.mrb[13].mxu0  ;;  %v1231_v29 = vadd.f32 %v1230_v27, %v6101_v19 }
 0x15d   :  { %v2077_v39 = vmax.bf16 %v4082_v11, %v1949_v0  ;;  %v1234_v26 = vpop.f32.mrb[14].mxu0  ;;  %v2084_v42 = vmax.bf16 %v4082_v11, %v1956_v8  ;;  %v1233_v43 = vadd.f32 %v1232_v20, %v6101_v19 }
 0x15e   :  { %v2085_v36 = vmax.bf16 %v4082_v11, %v1957_v6  ;;  %v1236_v13 = vpop.f32.mrb[15].mxu0 }
 0x15f   :  { %2501 = vmatprep.subr.bf16.mxu1 %v2077_v39  ;;  %v1423_v34 = vpop.f32.mrb[12].mxu1 }
 0x160   :  { %1705 = vmatmul.mubr.bf16.gmra.mrb[112].mxu0 %v5914_v2  ;;  %1898 = vmatmul.mubr.bf16.gmra.mrb[112].mxu1 %v5914_v2  ;;  %v1225_v2 = vadd.f32 %v1224_v24, %v6084_v33  ;;  %v1425_v14 = vpop.f32.mrb[13].mxu1  ;;  %v1424_v47 = vadd.f32 %v1423_v34, %v6101_v19 }
 0x161   :  { %3894 = vmatprep.mubr.msk.bf16.mxu0 %vm7376_vm13, %v5920_v9  ;;  %3943 = vmatprep.mubr.msk.bf16.mxu1 %vm7377_vm9, %v5920_v9  ;;  %v1227_v9 = vadd.f32 %v1226_v40, %v6084_v33  ;;  %v1427_v45 = vpop.f32.mrb[14].mxu1  ;;  %v1426_v30 = vadd.f32 %v1425_v14, %v6101_v19 }
 0x162   :  { %v1954_v53 = vpack.c.bf16 %v1225_v2, %v1221_v35  ;;  %2502 = vmatpush1.bf16.msra.mxu1 %v2076_v41  ;;  %v1428_v16 = vadd.f32 %v1427_v45, %v6106_v21  ;;  %v1429_v49 = vpop.f32.mrb[15].mxu1 }
 0x163   :  { %v1955_v56 = vpack.c.bf16 %v1227_v9, %v1223_v44  ;;  %2503 = vmatprep.subr.bf16.mxu1 %v2085_v36  ;;  %v1430_v50 = vadd.f32 %v1429_v49, %v6106_v21  ;;  %v1240_v59 = vpop.f32.mrb[16].mxu0 }
 0x164   :  { %v2082_v4 = vmax.bf16 %v4082_v11, %v1954_v53  ;;  %v1964_v58 = vpack.c.bf16 %v1428_v16, %v1424_v47  ;;  %v1242_v0 = vpop.f32.mrb[17].mxu0  ;;  %v1241_v35 = vadd.f32 %v1240_v59, %v6123_v60 }
 0x165   :  { %v2083_v28 = vmax.bf16 %v4082_v11, %v1955_v56  ;;  %v1965_v17 = vpack.c.bf16 %v1430_v50, %v1426_v30  ;;  %v1244_v24 = vpop.f32.mrb[18].mxu0 }
 0x166   :  { %2504 = vmatpush1.bf16.msra.mxu1 %v2084_v42  ;;  %v1245_v2 = vadd.f32 %v1244_v24, %v6128_v12  ;;  %v1246_v40 = vpop.f32.mrb[19].mxu0  ;;  %v2092_v41 = vmax.bf16 %v4082_v11, %v1964_v58 }
 0x167   :  { %2390 = vmatprep.subr.bf16.mxu0 %v2083_v28  ;;  %v1433_v38 = vpop.f32.mrb[16].mxu1  ;;  %v2093_v39 = vmax.bf16 %v4082_v11, %v1965_v17  ;;  %v1247_v52 = vadd.f32 %v1246_v40, %v6128_v12  ;;  %v6146_v28 = vpop.permute.xlu0 %840 }
 0x168   :  { %1715 = vmatmul.mubr.bf16.gmra.mrb[116].mxu0 %v5933_v25  ;;  %1908 = vmatmul.mubr.bf16.gmra.mrb[116].mxu1 %v5933_v25  ;;  %v1235_v25 = vadd.f32 %v1234_v26, %v6106_v21  ;;  %v1435_v44 = vpop.f32.mrb[17].mxu1  ;;  %v1970_v9 = vpack.c.bf16 %v1245_v2, %v1241_v35  ;;  %v1434_v54 = vadd.f32 %v1433_v38, %v6123_v60  ;;  %v6149_v26 = vpop.permute.xlu1 %845 }
 0x169   :  { %3895 = vmatprep.mubr.msk.bf16.mxu0 %vm7378_vm15, %v5938_v5  ;;  %3944 = vmatprep.mubr.msk.bf16.mxu1 %vm7379_vm7, %v5938_v5  ;;  %v1237_v5 = vadd.f32 %v1236_v13, %v6106_v21  ;;  %v1437_v53 = vpop.f32.mrb[18].mxu1  ;;  %v1436_v57 = vadd.f32 %v1435_v44, %v6123_v60 }
 0x16a   :  { %2391 = vmatpush1.bf16.msra.mxu0 %v2082_v4  ;;  %v1962_v15 = vpack.c.bf16 %v1235_v25, %v1231_v29  ;;  %2505 = vmatprep.subr.bf16.mxu1 %v2093_v39  ;;  %v1438_v7 = vadd.f32 %v1437_v53, %v6128_v12  ;;  %v1439_v56 = vpop.f32.mrb[19].mxu1  ;;  %v2098_v4 = vmax.bf16 %v4082_v11, %v1970_v9 }
 0x16b   :  { %v1963_v48 = vpack.c.bf16 %v1237_v5, %v1233_v43  ;;  %2506 = vmatpush1.bf16.msra.mxu1 %v2092_v41  ;;  %v1440_v62 = vadd.f32 %v1439_v56, %v6128_v12  ;;  %v1250_v8 = vpop.f32.mrb[20].mxu0 }
 0x16c   :  { %v2090_v46 = vmax.bf16 %v4082_v11, %v1962_v15  ;;  %v1972_v63 = vpack.c.bf16 %v1438_v7, %v1434_v54  ;;  %v1252_v20 = vpop.f32.mrb[21].mxu0  ;;  %v1251_v34 = vadd.f32 %v1250_v8, %v6146_v28 }
 0x16d   :  { %v2091_v61 = vmax.bf16 %v4082_v11, %v1963_v48  ;;  %v1973_v6 = vpack.c.bf16 %v1440_v62, %v1436_v57  ;;  %v1254_v29 = vpop.f32.mrb[22].mxu0  ;;  %v1253_v43 = vadd.f32 %v1252_v20, %v6146_v28 }
 0x16e   :  { %v1255_v36 = vadd.f32 %v1254_v29, %v6149_v26  ;;  %v1256_v13 = vpop.f32.mrb[23].mxu0  ;;  %v2100_v42 = vmax.bf16 %v4082_v11, %v1972_v63 }
 0x16f   :  { %2392 = vmatprep.subr.bf16.mxu0 %v2091_v61  ;;  %v1443_v25 = vpop.f32.mrb[20].mxu1  ;;  %v1257_v5 = vadd.f32 %v1256_v13, %v6149_v26 }
 0x170   :  { %1725 = vmatmul.mubr.bf16.gmra.mrb[120].mxu0 %v5949_v18  ;;  %1918 = vmatmul.mubr.bf16.gmra.mrb[120].mxu1 %v5949_v18  ;;  %v4030_v18 = vld [vmem:[%s7136_s4 + $0x4] ss:$8 sps:$4 sm:$0xff]   ;;  %v1445_v14 = vpop.f32.mrb[21].mxu1  ;;  %v1978_v15 = vpack.c.bf16 %v1255_v36, %v1251_v34  ;;  %v1444_v47 = vadd.f32 %v1443_v25, %v6146_v28 }
 0x171   :  { %3896 = vmatprep.mubr.msk.bf16.mxu0 %vm7380_vm3, %v5954_v31  ;;  %3945 = vmatprep.mubr.msk.bf16.mxu1 %vm7381_vm12, %v5954_v31  ;;  %v1243_v31 = vadd.f32 %v1242_v0, %v6123_v60  ;;  %v1447_v45 = vpop.f32.mrb[22].mxu1  ;;  %v1979_v48 = vpack.c.bf16 %v1257_v5, %v1253_v43  ;;  %v1446_v30 = vadd.f32 %v1445_v14, %v6146_v28 }
 0x172   :  { %2393 = vmatpush1.bf16.msra.mxu0 %v2090_v46  ;;  %v1448_v16 = vadd.f32 %v1447_v45, %v6149_v26  ;;  %v1449_v49 = vpop.f32.mrb[23].mxu1  ;;  %v6162_v46 = vpop.permute.xlu0 %850  ;;  %v2106_v17 = vmax.bf16 %v4082_v11, %v1978_v15 }
 0x173   :  { %v1971_v55 = vpack.c.bf16 %v1247_v52, %v1243_v31  ;;  %v1450_v50 = vadd.f32 %v1449_v49, %v6149_v26  ;;  %v2107_v61 = vmax.bf16 %v4082_v11, %v1979_v48 }
 0x174   :  { %v1980_v58 = vpack.c.bf16 %v1448_v16, %v1444_v47  ;;  %v1260_v59 = vpop.f32.mrb[24].mxu0 }
 0x175   :  { %v2099_v27 = vmax.bf16 %v4082_v11, %v1971_v55  ;;  %v1981_v0 = vpack.c.bf16 %v1450_v50, %v1446_v30  ;;  %v1262_v24 = vpop.f32.mrb[25].mxu0  ;;  %v1261_v38 = vadd.f32 %v1260_v59, %v6162_v46 }
 0x176   :  { %v1264_v35 = vpop.f32.mrb[26].mxu0  ;;  %v2108_v31 = vmax.bf16 %v4082_v11, %v1980_v58  ;;  %v1263_v44 = vadd.f32 %v1262_v24, %v6162_v46 }
 0x177   :  { %2394 = vmatprep.subr.bf16.mxu0 %v2099_v27  ;;  %v2109_v40 = vmax.bf16 %v4082_v11, %v1981_v0  ;;  %v1266_v41 = vpop.f32.mrb[27].mxu0 }
 0x178   :  { %1735 = vmatmul.mubr.bf16.gmra.mrb[124].mxu0 %v5965_v32  ;;  %1928 = vmatmul.mubr.bf16.gmra.mrb[124].mxu1 %v5965_v32  ;;  %v2101_v32 = vmax.bf16 %v4082_v11, %v1973_v6  ;;  %v1453_v2 = vpop.f32.mrb[24].mxu1  ;;  %v6178_v6 = vpop.permute.xlu0 %860 }
 0x179   :  { %2418 = vmatprep.mubr.bf16.mxu0 %v4030_v18  ;;  %2531 = vmatprep.mubr.bf16.mxu1 %v4030_v18  ;;  %v6165_v18 = vpop.permute.xlu1 %855  ;;  %v1455_v52 = vpop.f32.mrb[25].mxu1  ;;  %v1454_v7 = vadd.f32 %v1453_v2, %v6162_v46 }
 0x17a   :  { %2395 = vmatpush1.bf16.msra.mxu0 %v2098_v4  ;;  %2507 = vmatprep.subr.bf16.mxu1 %v2101_v32  ;;  %v1265_v39 = vadd.f32 %v1264_v35, %v6165_v18  ;;  %v1267_v9 = vadd.f32 %v1266_v41, %v6165_v18  ;;  %v1457_v54 = vpop.f32.mrb[26].mxu1  ;;  %v1456_v62 = vadd.f32 %v1455_v52, %v6162_v46 }
 0x17b   :  { %2508 = vmatpush1.bf16.msra.mxu1 %v2100_v42  ;;  %2396 = vmatprep.subr.bf16.mxu0 %v2107_v61  ;;  %v1458_v55 = vadd.f32 %v1457_v54, %v6165_v18  ;;  %v1459_v57 = vpop.f32.mrb[27].mxu1 }
 0x17c   :  { %v1986_v53 = vpack.c.bf16 %v1265_v39, %v1261_v38  ;;  %2509 = vmatprep.subr.bf16.mxu1 %v2109_v40  ;;  %v1987_v56 = vpack.c.bf16 %v1267_v9, %v1263_v44  ;;  %v1460_v63 = vadd.f32 %v1459_v57, %v6165_v18  ;;  %v1270_v27 = vpop.f32.mrb[28].mxu0  ;;  %v6194_v35 = vpop.permute.xlu0 %870 }
 0x17d   :  { %v1988_v8 = vpack.c.bf16 %v1458_v55, %v1454_v7  ;;  %v1272_v34 = vpop.f32.mrb[29].mxu0  ;;  %v6181_v25 = vpop.permute.xlu1 %865  ;;  %v1271_v32 = vadd.f32 %v1270_v27, %v6178_v6 }
 0x17e   :  { %2397 = vmatpush1.bf16.msra.mxu0 %v2106_v17  ;;  %v2115_v4 = vmax.bf16 %v4082_v11, %v1987_v56  ;;  %v2114_v20 = vmax.bf16 %v4082_v11, %v1986_v53  ;;  %v1989_v29 = vpack.c.bf16 %v1460_v63, %v1456_v62  ;;  %v1274_v36 = vpop.f32.mrb[30].mxu0  ;;  %v1273_v15 = vadd.f32 %v1272_v34, %v6178_v6 }
 0x17f   :  { %2510 = vmatpush1.bf16.msra.mxu1 %v2108_v31  ;;  %v1275_v42 = vadd.f32 %v1274_v36, %v6181_v25  ;;  %v1276_v14 = vpop.f32.mrb[31].mxu0  ;;  %v2116_v5 = vmax.bf16 %v4082_v11, %v1988_v8 }
 0x180   :  { %2398 = vmatprep.subr.bf16.mxu0 %v2115_v4  ;;  %v2117_v43 = vmax.bf16 %v4082_v11, %v1989_v29  ;;  %v1277_v47 = vadd.f32 %v1276_v14, %v6181_v25 }
 0x181   :  { %v1463_v13 = vpop.f32.mrb[28].mxu1  ;;  %v1994_v16 = vpack.c.bf16 %v1275_v42, %v1271_v32  ;;  %v6197_v40 = vpop.permute.xlu1 %875 }
 0x182   :  { %2399 = vmatpush1.bf16.msra.mxu0 %v2114_v20  ;;  %v1465_v45 = vpop.f32.mrb[29].mxu1  ;;  %2511 = vmatprep.subr.bf16.mxu1 %v2117_v43  ;;  %v1464_v49 = vadd.f32 %v1463_v13, %v6178_v6  ;;  %v1995_v50 = vpack.c.bf16 %v1277_v47, %v1273_v15  ;;  %v6210_v13 = vpop.permute.xlu0 %880 }
 0x183   :  { %v1467_v48 = vpop.f32.mrb[30].mxu1  ;;  %2512 = vmatpush1.bf16.msra.mxu1 %v2116_v5  ;;  %v1466_v59 = vadd.f32 %v1465_v45, %v6178_v6  ;;  %v2122_v38 = vmax.bf16 %v4082_v11, %v1994_v16 }
 0x184   :  { %v1468_v30 = vadd.f32 %v1467_v48, %v6181_v25  ;;  %v1469_v58 = vpop.f32.mrb[31].mxu1  ;;  %v2123_v24 = vmax.bf16 %v4082_v11, %v1995_v50 }
 0x185   :  { %v1470_v61 = vadd.f32 %v1469_v58, %v6181_v25  ;;  %v6213_v5 = vpop.permute.xlu1 %885 }
 0x186   :  { %v1996_v17 = vpack.c.bf16 %v1468_v30, %v1464_v49  ;;  %2400 = vmatprep.subr.bf16.mxu0 %v2123_v24 }
 0x187   :  { %v1280_v0 = vpop.f32.mrb[32].mxu0  ;;  %v1997_v2 = vpack.c.bf16 %v1470_v61, %v1466_v59  ;;  %2401 = vmatpush1.bf16.msra.mxu0 %v2122_v38 }
 0x188   :  { %v1282_v39 = vpop.f32.mrb[33].mxu0  ;;  %v1281_v31 = vadd.f32 %v1280_v0, %v6194_v35  ;;  %v2124_v54 = vmax.bf16 %v4082_v11, %v1996_v17 }
 0x189   :  { %v1284_v41 = vpop.f32.mrb[34].mxu0  ;;  %v2125_v9 = vmax.bf16 %v4082_v11, %v1997_v2  ;;  %v1283_v7 = vadd.f32 %v1282_v39, %v6194_v35 }
 0x18a   :  { %v1285_v52 = vadd.f32 %v1284_v41, %v6197_v40  ;;  %v1286_v53 = vpop.f32.mrb[35].mxu0 }
 0x18b   :  { %v1473_v44 = vpop.f32.mrb[32].mxu1  ;;  %v1287_v56 = vadd.f32 %v1286_v53, %v6197_v40  ;;  %2513 = vmatprep.subr.bf16.mxu1 %v2125_v9  ;;  %v6226_v9 = vpop.permute.xlu0 %890 }
 0x18c   :  { %v1475_v55 = vpop.f32.mrb[33].mxu1  ;;  %v2002_v57 = vpack.c.bf16 %v1285_v52, %v1281_v31  ;;  %v1474_v63 = vadd.f32 %v1473_v44, %v6194_v35  ;;  %2514 = vmatpush1.bf16.msra.mxu1 %v2124_v54 }
 0x18d   :  { %v1477_v62 = vpop.f32.mrb[34].mxu1  ;;  %v2003_v27 = vpack.c.bf16 %v1287_v56, %v1283_v7  ;;  %v1476_v20 = vadd.f32 %v1475_v55, %v6194_v35  ;;  %v6229_v55 = vpop.permute.xlu1 %895 }
 0x18e   :  { %v1478_v8 = vadd.f32 %v1477_v62, %v6197_v40  ;;  %v1479_v4 = vpop.f32.mrb[35].mxu1  ;;  %v2130_v42 = vmax.bf16 %v4082_v11, %v2002_v57 }
 0x18f   :  { %v1480_v29 = vadd.f32 %v1479_v4, %v6197_v40  ;;  %v2131_v32 = vmax.bf16 %v4082_v11, %v2003_v27 }
 0x190   :  { %v2004_v34 = vpack.c.bf16 %v1478_v8, %v1474_v63 }
 0x191   :  { %v1290_v36 = vpop.f32.mrb[36].mxu0  ;;  %v2005_v43 = vpack.c.bf16 %v1480_v29, %v1476_v20  ;;  %2402 = vmatprep.subr.bf16.mxu0 %v2131_v32 }
 0x192   :  { %v1292_v14 = vpop.f32.mrb[37].mxu0  ;;  %v1291_v45 = vadd.f32 %v1290_v36, %v6210_v13  ;;  %2403 = vmatpush1.bf16.msra.mxu0 %v2130_v42  ;;  %v2132_v30 = vmax.bf16 %v4082_v11, %v2004_v34 }
 0x193   :  { %v1294_v15 = vpop.f32.mrb[38].mxu0  ;;  %v2133_v48 = vmax.bf16 %v4082_v11, %v2005_v43  ;;  %v1293_v50 = vadd.f32 %v1292_v14, %v6210_v13 }
 0x194   :  { %v1295_v16 = vadd.f32 %v1294_v15, %v6213_v5  ;;  %v1296_v49 = vpop.f32.mrb[39].mxu0 }
 0x195   :  { %v1483_v47 = vpop.f32.mrb[36].mxu1  ;;  %v1297_v59 = vadd.f32 %v1296_v49, %v6213_v5  ;;  %2515 = vmatprep.subr.bf16.mxu1 %v2133_v48 }
 0x196   :  { %v1485_v58 = vpop.f32.mrb[37].mxu1  ;;  %v2010_v61 = vpack.c.bf16 %v1295_v16, %v1291_v45  ;;  %v1484_v0 = vadd.f32 %v1483_v47, %v6210_v13  ;;  %2516 = vmatpush1.bf16.msra.mxu1 %v2132_v30  ;;  %v6242_v30 = vpop.permute.xlu0 %900 }
 0x197   :  { %v1487_v17 = vpop.f32.mrb[38].mxu1  ;;  %v2011_v38 = vpack.c.bf16 %v1297_v59, %v1293_v50  ;;  %v1486_v39 = vadd.f32 %v1485_v58, %v6210_v13 }
 0x198   :  { %v1488_v24 = vadd.f32 %v1487_v17, %v6213_v5  ;;  %v1489_v2 = vpop.f32.mrb[39].mxu1  ;;  %v2138_v53 = vmax.bf16 %v4082_v11, %v2010_v61  ;;  %v6245_v61 = vpop.permute.xlu1 %905 }
 0x199   :  { %v1490_v41 = vadd.f32 %v1489_v2, %v6213_v5  ;;  %v1300_v44 = vpop.f32.mrb[40].mxu0  ;;  %v2139_v52 = vmax.bf16 %v4082_v11, %v2011_v38 }
 0x19a   :  { %v2012_v31 = vpack.c.bf16 %v1488_v24, %v1484_v0  ;;  %v1302_v7 = vpop.f32.mrb[41].mxu0  ;;  %v1301_v57 = vadd.f32 %v1300_v44, %v6226_v9 }
 0x19b   :  { %v2013_v54 = vpack.c.bf16 %v1490_v41, %v1486_v39  ;;  %v1304_v56 = vpop.f32.mrb[42].mxu0  ;;  %2404 = vmatprep.subr.bf16.mxu0 %v2139_v52  ;;  %v1303_v20 = vadd.f32 %v1302_v7, %v6226_v9 }
 0x19c   :  { %v1305_v63 = vadd.f32 %v1304_v56, %v6229_v55  ;;  %v1306_v27 = vpop.f32.mrb[43].mxu0  ;;  %2405 = vmatpush1.bf16.msra.mxu0 %v2138_v53  ;;  %v2140_v4 = vmax.bf16 %v4082_v11, %v2012_v31 }
 0x19d   :  { %v2141_v8 = vmax.bf16 %v4082_v11, %v2013_v54  ;;  %v1307_v34 = vadd.f32 %v1306_v27, %v6229_v55 }
 0x19e   :  { %v1493_v62 = vpop.f32.mrb[40].mxu1  ;;  %v2018_v36 = vpack.c.bf16 %v1305_v63, %v1301_v57 }
 0x19f   :  { %v1495_v29 = vpop.f32.mrb[41].mxu1  ;;  %2517 = vmatprep.subr.bf16.mxu1 %v2141_v8  ;;  %v1494_v42 = vadd.f32 %v1493_v62, %v6226_v9  ;;  %v2019_v14 = vpack.c.bf16 %v1307_v34, %v1303_v20 }
 0x1a0   :  { %v1497_v32 = vpop.f32.mrb[42].mxu1  ;;  %2518 = vmatpush1.bf16.msra.mxu1 %v2140_v4  ;;  %v1496_v45 = vadd.f32 %v1495_v29, %v6226_v9  ;;  %v2146_v50 = vmax.bf16 %v4082_v11, %v2018_v36  ;;  %v6258_v29 = vpop.permute.xlu0 %910 }
 0x1a1   :  { %v1498_v43 = vadd.f32 %v1497_v32, %v6229_v55  ;;  %v1499_v15 = vpop.f32.mrb[43].mxu1  ;;  %v2147_v49 = vmax.bf16 %v4082_v11, %v2019_v14 }
 0x1a2   :  { %v1500_v47 = vadd.f32 %v1499_v15, %v6229_v55 }
 0x1a3   :  { %v2020_v16 = vpack.c.bf16 %v1498_v43, %v1494_v42  ;;  %2406 = vmatprep.subr.bf16.mxu0 %v2147_v49  ;;  %v6261_v42 = vpop.permute.xlu1 %915 }
 0x1a4   :  { %v1310_v48 = vpop.f32.mrb[44].mxu0  ;;  %v2021_v58 = vpack.c.bf16 %v1500_v47, %v1496_v45  ;;  %2407 = vmatpush1.bf16.msra.mxu0 %v2146_v50 }
 0x1a5   :  { %v1312_v59 = vpop.f32.mrb[45].mxu0  ;;  %v1311_v0 = vadd.f32 %v1310_v48, %v6242_v30  ;;  %v2148_v41 = vmax.bf16 %v4082_v11, %v2020_v16 }
 0x1a6   :  { %v1314_v17 = vpop.f32.mrb[46].mxu0  ;;  %v2149_v2 = vmax.bf16 %v4082_v11, %v2021_v58  ;;  %v1313_v31 = vadd.f32 %v1312_v59, %v6242_v30 }
 0x1a7   :  { %v1315_v38 = vadd.f32 %v1314_v17, %v6245_v61  ;;  %v1316_v39 = vpop.f32.mrb[47].mxu0 }
 0x1a8   :  { %v1503_v24 = vpop.f32.mrb[44].mxu1  ;;  %v1317_v52 = vadd.f32 %v1316_v39, %v6245_v61  ;;  %2519 = vmatprep.subr.bf16.mxu1 %v2149_v2 }
 0x1a9   :  { %v1505_v44 = vpop.f32.mrb[45].mxu1  ;;  %v2026_v53 = vpack.c.bf16 %v1315_v38, %v1311_v0  ;;  %v1504_v7 = vadd.f32 %v1503_v24, %v6242_v30  ;;  %2520 = vmatpush1.bf16.msra.mxu1 %v2148_v41 }
 0x1aa   :  { %v1507_v54 = vpop.f32.mrb[46].mxu1  ;;  %v2027_v57 = vpack.c.bf16 %v1317_v52, %v1313_v31  ;;  %v1506_v63 = vadd.f32 %v1505_v44, %v6242_v30 }
 0x1ab   :  { %v1508_v56 = vadd.f32 %v1507_v54, %v6245_v61  ;;  %v1509_v62 = vpop.f32.mrb[47].mxu1  ;;  %v2154_v34 = vmax.bf16 %v4082_v11, %v2026_v53  ;;  %v6274_v53 = vpop.permute.xlu0 %920 }
 0x1ac   :  { %v1510_v8 = vadd.f32 %v1509_v62, %v6245_v61  ;;  %v2155_v20 = vmax.bf16 %v4082_v11, %v2027_v57  ;;  %v6277_v57 = vpop.permute.xlu1 %925 }
 0x1ad   :  { %v2028_v27 = vpack.c.bf16 %v1508_v56, %v1504_v7 }
 0x1ae   :  { %v2029_v36 = vpack.c.bf16 %v1510_v8, %v1506_v63  ;;  %2408 = vmatprep.subr.bf16.mxu0 %v2155_v20 }
 0x1af   :  { %2409 = vmatpush1.bf16.msra.mxu0 %v2154_v34  ;;  %v2156_v48 = vmax.bf16 %v4082_v11, %v2028_v27 }
 0x1b0   :  { %v2157_v47 = vmax.bf16 %v4082_v11, %v2029_v36 }
 0x1b2   :  { %2521 = vmatprep.subr.bf16.mxu1 %v2157_v47 }
 0x1b3   :  { %v1320_v4 = vpop.f32.mrb[48].mxu0  ;;  %v1513_v15 = vpop.f32.mrb[48].mxu1  ;;  %2522 = vmatpush1.bf16.msra.mxu1 %v2156_v48 }
 0x1b4   :  { %v1322_v32 = vpop.f32.mrb[49].mxu0  ;;  %v1321_v14 = vadd.f32 %v1320_v4, %v6258_v29  ;;  %v1515_v50 = vpop.f32.mrb[49].mxu1  ;;  %v1514_v0 = vadd.f32 %v1513_v15, %v6258_v29 }
 0x1b5   :  { %v1324_v43 = vpop.f32.mrb[50].mxu0  ;;  %v1323_v49 = vadd.f32 %v1322_v32, %v6258_v29  ;;  %v1517_v17 = vpop.f32.mrb[50].mxu1  ;;  %v1516_v39 = vadd.f32 %v1515_v50, %v6258_v29 }
 0x1b6   :  { %v1325_v45 = vadd.f32 %v1324_v43, %v6261_v42  ;;  %v1326_v16 = vpop.f32.mrb[51].mxu0  ;;  %v1518_v24 = vadd.f32 %v1517_v17, %v6261_v42  ;;  %v1519_v2 = vpop.f32.mrb[51].mxu1 }
 0x1b7   :  { %v1327_v58 = vadd.f32 %v1326_v16, %v6261_v42  ;;  %v1520_v41 = vadd.f32 %v1519_v2, %v6261_v42 }
 0x1b8   :  { %v2034_v59 = vpack.c.bf16 %v1325_v45, %v1321_v14  ;;  %v2036_v31 = vpack.c.bf16 %v1518_v24, %v1514_v0  ;;  %v6290_v0 = vpop.permute.xlu0 %930 }
 0x1b9   :  { %v2035_v38 = vpack.c.bf16 %v1327_v58, %v1323_v49  ;;  %v2037_v7 = vpack.c.bf16 %v1520_v41, %v1516_v39  ;;  %v6293_v39 = vpop.permute.xlu1 %935 }
 0x1ba   :  { %v2162_v54 = vmax.bf16 %v4082_v11, %v2034_v59  ;;  %v2164_v34 = vmax.bf16 %v4082_v11, %v2036_v31 }
 0x1bb   :  { %v1330_v44 = vpop.f32.mrb[52].mxu0  ;;  %v2163_v52 = vmax.bf16 %v4082_v11, %v2035_v38  ;;  %v1523_v8 = vpop.f32.mrb[52].mxu1  ;;  %v2165_v4 = vmax.bf16 %v4082_v11, %v2037_v7 }
 0x1bc   :  { %v1332_v56 = vpop.f32.mrb[53].mxu0  ;;  %v1331_v63 = vadd.f32 %v1330_v44, %v6274_v53  ;;  %v1525_v32 = vpop.f32.mrb[53].mxu1  ;;  %v1524_v45 = vadd.f32 %v1523_v8, %v6274_v53 }
 0x1bd   :  { %v1334_v62 = vpop.f32.mrb[54].mxu0  ;;  %2410 = vmatprep.subr.bf16.mxu0 %v2163_v52  ;;  %v1333_v36 = vadd.f32 %v1332_v56, %v6274_v53  ;;  %v1527_v15 = vpop.f32.mrb[54].mxu1  ;;  %2523 = vmatprep.subr.bf16.mxu1 %v2165_v4  ;;  %v1526_v49 = vadd.f32 %v1525_v32, %v6274_v53 }
 0x1be   :  { %v1335_v27 = vadd.f32 %v1334_v62, %v6277_v57  ;;  %v1336_v20 = vpop.f32.mrb[55].mxu0  ;;  %2411 = vmatpush1.bf16.msra.mxu0 %v2162_v54  ;;  %v1528_v47 = vadd.f32 %v1527_v15, %v6277_v57  ;;  %v1529_v48 = vpop.f32.mrb[55].mxu1  ;;  %2524 = vmatpush1.bf16.msra.mxu1 %v2164_v34 }
 0x1bf   :  { %v1337_v43 = vadd.f32 %v1336_v20, %v6277_v57  ;;  %v1530_v50 = vadd.f32 %v1529_v48, %v6277_v57 }
 0x1c0   :  { %v2042_v14 = vpack.c.bf16 %v1335_v27, %v1331_v63  ;;  %v2044_v58 = vpack.c.bf16 %v1528_v47, %v1524_v45 }
 0x1c1   :  { %v2043_v16 = vpack.c.bf16 %v1337_v43, %v1333_v36  ;;  %v2045_v38 = vpack.c.bf16 %v1530_v50, %v1526_v49 }
 0x1c2   :  { %v2170_v24 = vmax.bf16 %v4082_v11, %v2042_v14  ;;  %v2172_v56 = vmax.bf16 %v4082_v11, %v2044_v58  ;;  %v6309_v58 = vpop.permute.xlu1 %945 }
 0x1c3   :  { %v1340_v59 = vpop.f32.mrb[56].mxu0  ;;  %v2171_v17 = vmax.bf16 %v4082_v11, %v2043_v16  ;;  %v1533_v44 = vpop.f32.mrb[56].mxu1  ;;  %v2173_v54 = vmax.bf16 %v4082_v11, %v2045_v38 }
 0x1c4   :  { %v1342_v2 = vpop.f32.mrb[57].mxu0  ;;  %v1341_v31 = vadd.f32 %v1340_v59, %v6290_v0  ;;  %v1535_v63 = vpop.f32.mrb[57].mxu1  ;;  %v1534_v20 = vadd.f32 %v1533_v44, %v6290_v0 }
 0x1c5   :  { %v1344_v41 = vpop.f32.mrb[58].mxu0  ;;  %2412 = vmatprep.subr.bf16.mxu0 %v2171_v17  ;;  %v1343_v62 = vadd.f32 %v1342_v2, %v6290_v0  ;;  %v1537_v4 = vpop.f32.mrb[58].mxu1  ;;  %2525 = vmatprep.subr.bf16.mxu1 %v2173_v54  ;;  %v1536_v43 = vadd.f32 %v1535_v63, %v6290_v0 }
 0x1c6   :  { %v1345_v52 = vadd.f32 %v1344_v41, %v6293_v39  ;;  %v1346_v7 = vpop.f32.mrb[59].mxu0  ;;  %2413 = vmatpush1.bf16.msra.mxu0 %v2170_v24  ;;  %v1538_v34 = vadd.f32 %v1537_v4, %v6293_v39  ;;  %v1539_v32 = vpop.f32.mrb[59].mxu1  ;;  %2526 = vmatpush1.bf16.msra.mxu1 %v2172_v56 }
 0x1c7   :  { %v1347_v8 = vadd.f32 %v1346_v7, %v6293_v39  ;;  %v1540_v14 = vadd.f32 %v1539_v32, %v6293_v39  ;;  %v6306_v16 = vpop.permute.xlu0 %940 }
 0x1c8   :  { %v2050_v27 = vpack.c.bf16 %v1345_v52, %v1341_v31  ;;  %v2052_v15 = vpack.c.bf16 %v1538_v34, %v1534_v20 }
 0x1c9   :  { %v2051_v36 = vpack.c.bf16 %v1347_v8, %v1343_v62  ;;  %v2053_v49 = vpack.c.bf16 %v1540_v14, %v1536_v43 }
 0x1ca   :  { %v2178_v48 = vmax.bf16 %v4082_v11, %v2050_v27  ;;  %v2180_v31 = vmax.bf16 %v4082_v11, %v2052_v15 }
 0x1cb   :  { %v1350_v45 = vpop.f32.mrb[60].mxu0  ;;  %v2179_v47 = vmax.bf16 %v4082_v11, %v2051_v36  ;;  %v1543_v24 = vpop.f32.mrb[60].mxu1  ;;  %v2181_v2 = vmax.bf16 %v4082_v11, %v2053_v49 }
 0x1cc   :  { %v1352_v50 = vpop.f32.mrb[61].mxu0  ;;  %v1351_v17 = vadd.f32 %v1350_v45, %v6306_v16  ;;  %v1545_v52 = vpop.f32.mrb[61].mxu1  ;;  %v1544_v62 = vadd.f32 %v1543_v24, %v6306_v16  ;;  %v6334_v24 = vld [vmem:[%s7136_s4 + $0x14] ss:$8 sps:$4 sm:$0xff]  }
 0x1cd   :  { %v1354_v59 = vpop.f32.mrb[62].mxu0  ;;  %2414 = vmatprep.subr.bf16.mxu0 %v2179_v47  ;;  %v1353_v44 = vadd.f32 %v1352_v50, %v6306_v16  ;;  %v1547_v56 = vpop.f32.mrb[62].mxu1  ;;  %2527 = vmatprep.subr.bf16.mxu1 %v2181_v2  ;;  %v1546_v4 = vadd.f32 %v1545_v52, %v6306_v16  ;;  %v6326_v47 = vld [vmem:[%s7136_s4] ss:$8 sps:$4 sm:$0xff]  }
 0x1ce   :  { %v1355_v38 = vadd.f32 %v1354_v59, %v6309_v58  ;;  %v1356_v41 = vpop.f32.mrb[63].mxu0  ;;  %2415 = vmatpush1.bf16.msra.mxu0 %v2178_v48  ;;  %v1548_v63 = vadd.f32 %v1547_v56, %v6309_v58  ;;  %v1549_v27 = vpop.f32.mrb[63].mxu1  ;;  %2528 = vmatpush1.bf16.msra.mxu1 %v2180_v31 }
 0x1cf   :  { %v1357_v54 = vadd.f32 %v1356_v41, %v6309_v58  ;;  %v1550_v20 = vadd.f32 %v1549_v27, %v6309_v58 }
 0x1d0   :  { %v2058_v7 = vpack.c.bf16 %v1355_v38, %v1351_v17  ;;  %v2060_v34 = vpack.c.bf16 %v1548_v63, %v1544_v62 }
 0x1d1   :  { %v2059_v8 = vpack.c.bf16 %v1357_v54, %v1353_v44  ;;  %v2061_v14 = vpack.c.bf16 %v1550_v20, %v1546_v4 }
 0x1d2   :  { %v2186_v43 = vmax.bf16 %v4082_v11, %v2058_v7  ;;  %v2188_v38 = vmax.bf16 %v4082_v11, %v2060_v34 }
 0x1d3   :  { %v1586_v36 = vpop.f32.mrb[64].mxu0  ;;  %v2187_v32 = vmax.bf16 %v4082_v11, %v2059_v8  ;;  %v1779_v49 = vpop.f32.mrb[64].mxu1  ;;  %v2189_v59 = vmax.bf16 %v4082_v11, %v2061_v14 }
 0x1d4   :  { %v1588_v15 = vpop.f32.mrb[65].mxu0  ;;  %v1587_v48 = vadd.f32 %v1586_v36, %v6034_v23  ;;  %v1781_v41 = vpop.f32.mrb[65].mxu1  ;;  %v1780_v54 = vadd.f32 %v1779_v49, %v6034_v23  ;;  %v6360_v49 = vld [vmem:[%s7136_s4 + $0x24] ss:$8 sps:$4 sm:$0xff]  }
 0x1d5   :  { %v1590_v45 = vpop.f32.mrb[66].mxu0  ;;  %2416 = vmatprep.subr.bf16.mxu0 %v2187_v32  ;;  %v1589_v2 = vadd.f32 %v1588_v15, %v6034_v23  ;;  %v1783_v52 = vpop.f32.mrb[66].mxu1  ;;  %2529 = vmatprep.subr.bf16.mxu1 %v2189_v59  ;;  %v1782_v63 = vadd.f32 %v1781_v41, %v6034_v23  ;;  %v6352_v23 = vld [vmem:[%s7136_s4 + $0x10] ss:$8 sps:$4 sm:$0xff]  }
 0x1d6   :  { %v1591_v50 = vadd.f32 %v1590_v45, %v6042_v37  ;;  %v1592_v17 = vpop.f32.mrb[67].mxu0  ;;  %2417 = vmatpush1.bf16.msra.mxu0 %v2186_v43  ;;  %v1784_v7 = vadd.f32 %v1783_v52, %v6042_v37  ;;  %v1785_v62 = vpop.f32.mrb[67].mxu1  ;;  %2530 = vmatpush1.bf16.msra.mxu1 %v2188_v38 }
 0x1d7   :  { %v1593_v31 = vadd.f32 %v1592_v17, %v6042_v37  ;;  %v1786_v8 = vadd.f32 %v1785_v62, %v6042_v37 }
 0x1d8   :  { %v1942_v44 = vpack.c.bf16 %v1591_v50, %v1587_v48  ;;  %v1944_v27 = vpack.c.bf16 %v1784_v7, %v1780_v54 }
 0x1d9   :  { %v1943_v56 = vpack.c.bf16 %v1593_v31, %v1589_v2  ;;  %2419 = vmatmul.mubr.bf16.vlgmr.msra.gmra.mrb[128].mxu0 %v6326_v47  ;;  %v1945_v36 = vpack.c.bf16 %v1786_v8, %v1782_v63  ;;  %2532 = vmatmul.mubr.bf16.vlgmr.msra.gmra.mrb[128].mxu1 %v6326_v47 }
 0x1da   :  { %2428 = vmatprep.mubr.bf16.mxu0 %v6334_v24  ;;  %v2070_v34 = vmax.bf16 %v4082_v11, %v1942_v44  ;;  %2541 = vmatprep.mubr.bf16.mxu1 %v6334_v24  ;;  %v2072_v50 = vmax.bf16 %v4082_v11, %v1944_v27 }
 0x1db   :  { %v1596_v4 = vpop.f32.mrb[68].mxu0  ;;  %v2071_v20 = vmax.bf16 %v4082_v11, %v1943_v56  ;;  %v1789_v14 = vpop.f32.mrb[68].mxu1  ;;  %v2073_v45 = vmax.bf16 %v4082_v11, %v1945_v36 }
 0x1dc   :  { %v1598_v32 = vpop.f32.mrb[69].mxu0  ;;  %v1597_v37 = vadd.f32 %v1596_v4, %v6046_v51  ;;  %v1791_v17 = vpop.f32.mrb[69].mxu1  ;;  %v1790_v31 = vadd.f32 %v1789_v14, %v6046_v51  ;;  %v6386_v14 = vld [vmem:[%s7136_s4 + $0x34] ss:$8 sps:$4 sm:$0xff]  }
 0x1dd   :  { %v1600_v43 = vpop.f32.mrb[70].mxu0  ;;  %2612 = vmatprep.subr.bf16.mxu0 %v2071_v20  ;;  %v1599_v59 = vadd.f32 %v1598_v32, %v6046_v51  ;;  %v1793_v41 = vpop.f32.mrb[70].mxu1  ;;  %2725 = vmatprep.subr.bf16.mxu1 %v2073_v45  ;;  %v1792_v7 = vadd.f32 %v1791_v17, %v6046_v51  ;;  %v6378_v51 = vld [vmem:[%s7136_s4 + $0x20] ss:$8 sps:$4 sm:$0xff]  }
 0x1de   :  { %v1601_v15 = vadd.f32 %v1600_v43, %v6062_v22  ;;  %v1602_v48 = vpop.f32.mrb[71].mxu0  ;;  %2613 = vmatpush1.bf16.msra.mxu0 %v2070_v34  ;;  %v1794_v44 = vadd.f32 %v1793_v41, %v6062_v22  ;;  %v1795_v54 = vpop.f32.mrb[71].mxu1  ;;  %2726 = vmatpush1.bf16.msra.mxu1 %v2072_v50 }
 0x1df   :  { %v1603_v38 = vadd.f32 %v1602_v48, %v6062_v22  ;;  %v1796_v56 = vadd.f32 %v1795_v54, %v6062_v22 }
 0x1e0   :  { %v1950_v2 = vpack.c.bf16 %v1601_v15, %v1597_v37  ;;  %v1952_v62 = vpack.c.bf16 %v1794_v44, %v1790_v31 }
 0x1e1   :  { %v1951_v52 = vpack.c.bf16 %v1603_v38, %v1599_v59  ;;  %2429 = vmatmul.mubr.bf16.gmra.mrb[132].mxu0 %v6352_v23  ;;  %v1953_v4 = vpack.c.bf16 %v1796_v56, %v1792_v7  ;;  %2542 = vmatmul.mubr.bf16.gmra.mrb[132].mxu1 %v6352_v23 }
 0x1e2   :  { %2438 = vmatprep.mubr.bf16.mxu0 %v6360_v49  ;;  %v2078_v27 = vmax.bf16 %v4082_v11, %v1950_v2  ;;  %2551 = vmatprep.mubr.bf16.mxu1 %v6360_v49  ;;  %v2080_v15 = vmax.bf16 %v4082_v11, %v1952_v62 }
 0x1e3   :  { %v1606_v63 = vpop.f32.mrb[72].mxu0  ;;  %v2079_v8 = vmax.bf16 %v4082_v11, %v1951_v52  ;;  %v1799_v36 = vpop.f32.mrb[72].mxu1  ;;  %v2081_v43 = vmax.bf16 %v4082_v11, %v1953_v4 }
 0x1e4   :  { %v1608_v20 = vpop.f32.mrb[73].mxu0  ;;  %v1607_v22 = vadd.f32 %v1606_v63, %v6079_v1  ;;  %v1801_v48 = vpop.f32.mrb[73].mxu1  ;;  %v1800_v38 = vadd.f32 %v1799_v36, %v6079_v1  ;;  %v6412_v36 = vld [vmem:[%s7136_s4 + $0x44] ss:$8 sps:$4 sm:$0xff]  }
 0x1e5   :  { %v1610_v34 = vpop.f32.mrb[74].mxu0  ;;  %2614 = vmatprep.subr.bf16.mxu0 %v2079_v8  ;;  %v1609_v45 = vadd.f32 %v1608_v20, %v6079_v1  ;;  %v1803_v17 = vpop.f32.mrb[74].mxu1  ;;  %2727 = vmatprep.subr.bf16.mxu1 %v2081_v43  ;;  %v1802_v44 = vadd.f32 %v1801_v48, %v6079_v1  ;;  %v6404_v1 = vld [vmem:[%s7136_s4 + $0x30] ss:$8 sps:$4 sm:$0xff]  }
 0x1e6   :  { %v1611_v32 = vadd.f32 %v1610_v34, %v6084_v33  ;;  %v1612_v37 = vpop.f32.mrb[75].mxu0  ;;  %2615 = vmatpush1.bf16.msra.mxu0 %v2078_v27  ;;  %v1804_v2 = vadd.f32 %v1803_v17, %v6084_v33  ;;  %v1805_v31 = vpop.f32.mrb[75].mxu1  ;;  %2728 = vmatpush1.bf16.msra.mxu1 %v2080_v15 }
 0x1e7   :  { %v1613_v50 = vadd.f32 %v1612_v37, %v6084_v33  ;;  %v1806_v52 = vadd.f32 %v1805_v31, %v6084_v33 }
 0x1e8   :  { %v1958_v59 = vpack.c.bf16 %v1611_v32, %v1607_v22  ;;  %v1960_v54 = vpack.c.bf16 %v1804_v2, %v1800_v38 }
 0x1e9   :  { %v1959_v41 = vpack.c.bf16 %v1613_v50, %v1609_v45  ;;  %2439 = vmatmul.mubr.bf16.gmra.mrb[136].mxu0 %v6378_v51  ;;  %v1961_v63 = vpack.c.bf16 %v1806_v52, %v1802_v44  ;;  %2552 = vmatmul.mubr.bf16.gmra.mrb[136].mxu1 %v6378_v51 }
 0x1ea   :  { %2448 = vmatprep.mubr.bf16.mxu0 %v6386_v14  ;;  %v2086_v62 = vmax.bf16 %v4082_v11, %v1958_v59  ;;  %2561 = vmatprep.mubr.bf16.mxu1 %v6386_v14  ;;  %v2088_v32 = vmax.bf16 %v4082_v11, %v1960_v54 }
 0x1eb   :  { %v1616_v7 = vpop.f32.mrb[76].mxu0  ;;  %v2087_v56 = vmax.bf16 %v4082_v11, %v1959_v41  ;;  %v1809_v4 = vpop.f32.mrb[76].mxu1  ;;  %v2089_v34 = vmax.bf16 %v4082_v11, %v1961_v63 }
 0x1ec   :  { %v1618_v8 = vpop.f32.mrb[77].mxu0  ;;  %v1617_v33 = vadd.f32 %v1616_v7, %v6101_v19  ;;  %v1811_v37 = vpop.f32.mrb[77].mxu1  ;;  %v1810_v50 = vadd.f32 %v1809_v4, %v6101_v19  ;;  %v6438_v4 = vld [vmem:[%s7136_s4 + $0x54] ss:$8 sps:$4 sm:$0xff]  }
 0x1ed   :  { %v1620_v27 = vpop.f32.mrb[78].mxu0  ;;  %2616 = vmatprep.subr.bf16.mxu0 %v2087_v56  ;;  %v1619_v43 = vadd.f32 %v1618_v8, %v6101_v19  ;;  %v1813_v48 = vpop.f32.mrb[78].mxu1  ;;  %2729 = vmatprep.subr.bf16.mxu1 %v2089_v34  ;;  %v1812_v2 = vadd.f32 %v1811_v37, %v6101_v19  ;;  %v6430_v19 = vld [vmem:[%s7136_s4 + $0x40] ss:$8 sps:$4 sm:$0xff]  }
 0x1ee   :  { %v1621_v20 = vadd.f32 %v1620_v27, %v6106_v21  ;;  %v1622_v22 = vpop.f32.mrb[79].mxu0  ;;  %2617 = vmatpush1.bf16.msra.mxu0 %v2086_v62  ;;  %v1814_v59 = vadd.f32 %v1813_v48, %v6106_v21  ;;  %v1815_v38 = vpop.f32.mrb[79].mxu1  ;;  %2730 = vmatpush1.bf16.msra.mxu1 %v2088_v32 }
 0x1ef   :  { %v1623_v15 = vadd.f32 %v1622_v22, %v6106_v21  ;;  %v1816_v41 = vadd.f32 %v1815_v38, %v6106_v21 }
 0x1f0   :  { %v1966_v45 = vpack.c.bf16 %v1621_v20, %v1617_v33  ;;  %v1968_v31 = vpack.c.bf16 %v1814_v59, %v1810_v50 }
 0x1f1   :  { %v1967_v17 = vpack.c.bf16 %v1623_v15, %v1619_v43  ;;  %2449 = vmatmul.mubr.bf16.gmra.mrb[140].mxu0 %v6404_v1  ;;  %v1969_v7 = vpack.c.bf16 %v1816_v41, %v1812_v2  ;;  %2562 = vmatmul.mubr.bf16.gmra.mrb[140].mxu1 %v6404_v1 }
 0x1f2   :  { %2458 = vmatprep.mubr.bf16.mxu0 %v6412_v36  ;;  %v2094_v54 = vmax.bf16 %v4082_v11, %v1966_v45  ;;  %2571 = vmatprep.mubr.bf16.mxu1 %v6412_v36  ;;  %v2096_v20 = vmax.bf16 %v4082_v11, %v1968_v31 }
 0x1f3   :  { %v1626_v44 = vpop.f32.mrb[80].mxu0  ;;  %v2095_v52 = vmax.bf16 %v4082_v11, %v1967_v17  ;;  %v1819_v63 = vpop.f32.mrb[80].mxu1  ;;  %v2097_v27 = vmax.bf16 %v4082_v11, %v1969_v7 }
 0x1f4   :  { %v1628_v56 = vpop.f32.mrb[81].mxu0  ;;  %v1627_v21 = vadd.f32 %v1626_v44, %v6123_v60  ;;  %v1821_v22 = vpop.f32.mrb[81].mxu1  ;;  %v1820_v15 = vadd.f32 %v1819_v63, %v6123_v60  ;;  %v6464_v63 = vld [vmem:[%s7136_s4 + $0x64] ss:$8 sps:$4 sm:$0xff]  }
 0x1f5   :  { %v1630_v62 = vpop.f32.mrb[82].mxu0  ;;  %2618 = vmatprep.subr.bf16.mxu0 %v2095_v52  ;;  %v1629_v34 = vadd.f32 %v1628_v56, %v6123_v60  ;;  %v1823_v37 = vpop.f32.mrb[82].mxu1  ;;  %2731 = vmatprep.subr.bf16.mxu1 %v2097_v27  ;;  %v1822_v59 = vadd.f32 %v1821_v22, %v6123_v60  ;;  %v6456_v60 = vld [vmem:[%s7136_s4 + $0x50] ss:$8 sps:$4 sm:$0xff]  }
 0x1f6   :  { %v1631_v8 = vadd.f32 %v1630_v62, %v6128_v12  ;;  %v1632_v33 = vpop.f32.mrb[83].mxu0  ;;  %2619 = vmatpush1.bf16.msra.mxu0 %v2094_v54  ;;  %v1824_v45 = vadd.f32 %v1823_v37, %v6128_v12  ;;  %v1825_v50 = vpop.f32.mrb[83].mxu1  ;;  %2732 = vmatpush1.bf16.msra.mxu1 %v2096_v20 }
 0x1f7   :  { %v1633_v32 = vadd.f32 %v1632_v33, %v6128_v12  ;;  %v1826_v17 = vadd.f32 %v1825_v50, %v6128_v12 }
 0x1f8   :  { %v1974_v43 = vpack.c.bf16 %v1631_v8, %v1627_v21  ;;  %v1976_v38 = vpack.c.bf16 %v1824_v45, %v1820_v15 }
 0x1f9   :  { %v1975_v48 = vpack.c.bf16 %v1633_v32, %v1629_v34  ;;  %2459 = vmatmul.mubr.bf16.gmra.mrb[144].mxu0 %v6430_v19  ;;  %v1977_v44 = vpack.c.bf16 %v1826_v17, %v1822_v59  ;;  %2572 = vmatmul.mubr.bf16.gmra.mrb[144].mxu1 %v6430_v19 }
 0x1fa   :  { %2468 = vmatprep.mubr.bf16.mxu0 %v6438_v4  ;;  %v2102_v31 = vmax.bf16 %v4082_v11, %v1974_v43  ;;  %2581 = vmatprep.mubr.bf16.mxu1 %v6438_v4  ;;  %v2104_v8 = vmax.bf16 %v4082_v11, %v1976_v38 }
 0x1fb   :  { %v1636_v2 = vpop.f32.mrb[84].mxu0  ;;  %v2103_v41 = vmax.bf16 %v4082_v11, %v1975_v48  ;;  %v1829_v7 = vpop.f32.mrb[84].mxu1  ;;  %v2105_v62 = vmax.bf16 %v4082_v11, %v1977_v44 }
 0x1fc   :  { %v1638_v52 = vpop.f32.mrb[85].mxu0  ;;  %v1637_v12 = vadd.f32 %v1636_v2, %v6146_v28  ;;  %v1831_v33 = vpop.f32.mrb[85].mxu1  ;;  %v1830_v32 = vadd.f32 %v1829_v7, %v6146_v28  ;;  %v6490_v7 = vld [vmem:[%s7136_s4 + $0x74] ss:$8 sps:$4 sm:$0xff]  }
 0x1fd   :  { %v1640_v54 = vpop.f32.mrb[86].mxu0  ;;  %2620 = vmatprep.subr.bf16.mxu0 %v2103_v41  ;;  %v1639_v27 = vadd.f32 %v1638_v52, %v6146_v28  ;;  %v1833_v22 = vpop.f32.mrb[86].mxu1  ;;  %2733 = vmatprep.subr.bf16.mxu1 %v2105_v62  ;;  %v1832_v45 = vadd.f32 %v1831_v33, %v6146_v28  ;;  %v6482_v28 = vld [vmem:[%s7136_s4 + $0x60] ss:$8 sps:$4 sm:$0xff]  }
 0x1fe   :  { %v1641_v56 = vadd.f32 %v1640_v54, %v6149_v26  ;;  %v1642_v21 = vpop.f32.mrb[87].mxu0  ;;  %2621 = vmatpush1.bf16.msra.mxu0 %v2102_v31  ;;  %v1834_v43 = vadd.f32 %v1833_v22, %v6149_v26  ;;  %v1835_v15 = vpop.f32.mrb[87].mxu1  ;;  %2734 = vmatpush1.bf16.msra.mxu1 %v2104_v8 }
 0x1ff   :  { %v1643_v20 = vadd.f32 %v1642_v21, %v6149_v26  ;;  %v1836_v48 = vadd.f32 %v1835_v15, %v6149_v26 }
 0x200   :  { %v1982_v34 = vpack.c.bf16 %v1641_v56, %v1637_v12  ;;  %v1984_v50 = vpack.c.bf16 %v1834_v43, %v1830_v32 }
 0x201   :  { %v1983_v37 = vpack.c.bf16 %v1643_v20, %v1639_v27  ;;  %2469 = vmatmul.mubr.bf16.gmra.mrb[148].mxu0 %v6456_v60  ;;  %v1985_v2 = vpack.c.bf16 %v1836_v48, %v1832_v45  ;;  %2582 = vmatmul.mubr.bf16.gmra.mrb[148].mxu1 %v6456_v60 }
 0x202   :  { %2478 = vmatprep.mubr.bf16.mxu0 %v6464_v63  ;;  %v2110_v38 = vmax.bf16 %v4082_v11, %v1982_v34  ;;  %2591 = vmatprep.mubr.bf16.mxu1 %v6464_v63  ;;  %v2112_v56 = vmax.bf16 %v4082_v11, %v1984_v50 }
 0x203   :  { %v1646_v59 = vpop.f32.mrb[88].mxu0  ;;  %v2111_v17 = vmax.bf16 %v4082_v11, %v1983_v37  ;;  %v1839_v44 = vpop.f32.mrb[88].mxu1  ;;  %v2113_v54 = vmax.bf16 %v4082_v11, %v1985_v2 }
 0x204   :  { %v1648_v41 = vpop.f32.mrb[89].mxu0  ;;  %v1647_v26 = vadd.f32 %v1646_v59, %v6162_v46  ;;  %v1841_v21 = vpop.f32.mrb[89].mxu1  ;;  %v1840_v20 = vadd.f32 %v1839_v44, %v6162_v46 }
 0x205   :  { %v1650_v31 = vpop.f32.mrb[90].mxu0  ;;  %2622 = vmatprep.subr.bf16.mxu0 %v2111_v17  ;;  %v1649_v62 = vadd.f32 %v1648_v41, %v6162_v46  ;;  %v1843_v33 = vpop.f32.mrb[90].mxu1  ;;  %2735 = vmatprep.subr.bf16.mxu1 %v2113_v54  ;;  %v1842_v43 = vadd.f32 %v1841_v21, %v6162_v46  ;;  %v6508_v46 = vld [vmem:[%s7136_s4 + $0x70] ss:$8 sps:$4 sm:$0xff]  }
 0x206   :  { %v1651_v52 = vadd.f32 %v1650_v31, %v6165_v18  ;;  %v1652_v12 = vpop.f32.mrb[91].mxu0  ;;  %2623 = vmatpush1.bf16.msra.mxu0 %v2110_v38  ;;  %v1844_v34 = vadd.f32 %v1843_v33, %v6165_v18  ;;  %v1845_v32 = vpop.f32.mrb[91].mxu1  ;;  %2736 = vmatpush1.bf16.msra.mxu1 %v2112_v56 }
 0x207   :  { %v1653_v8 = vadd.f32 %v1652_v12, %v6165_v18  ;;  %v1846_v37 = vadd.f32 %v1845_v32, %v6165_v18 }
 0x208   :  { %v1990_v27 = vpack.c.bf16 %v1651_v52, %v1647_v26  ;;  %v1992_v15 = vpack.c.bf16 %v1844_v34, %v1840_v20 }
 0x209   :  { %v1991_v22 = vpack.c.bf16 %v1653_v8, %v1649_v62  ;;  %2479 = vmatmul.mubr.bf16.gmra.mrb[152].mxu0 %v6482_v28  ;;  %v1993_v59 = vpack.c.bf16 %v1846_v37, %v1842_v43  ;;  %2592 = vmatmul.mubr.bf16.gmra.mrb[152].mxu1 %v6482_v28 }
 0x20a   :  { %2488 = vmatprep.mubr.bf16.mxu0 %v6490_v7  ;;  %v2118_v50 = vmax.bf16 %v4082_v11, %v1990_v27  ;;  %2601 = vmatprep.mubr.bf16.mxu1 %v6490_v7  ;;  %v2120_v44 = vmax.bf16 %v4082_v11, %v1992_v15 }
 0x20b   :  { %v1656_v45 = vpop.f32.mrb[92].mxu0  ;;  %v2119_v48 = vmax.bf16 %v4082_v11, %v1991_v22  ;;  %v1849_v2 = vpop.f32.mrb[92].mxu1  ;;  %v2121_v31 = vmax.bf16 %v4082_v11, %v1993_v59  ;;  %v4057_v22 = vld [vmem:[%s7136_s4 + $0x4] ss:$8 sps:$4 sm:$0xff]  }
 0x20c   :  { %v1658_v17 = vpop.f32.mrb[93].mxu0  ;;  %v1657_v18 = vadd.f32 %v1656_v45, %v6178_v6  ;;  %v1851_v54 = vpop.f32.mrb[93].mxu1  ;;  %v1850_v21 = vadd.f32 %v1849_v2, %v6178_v6 }
 0x20d   :  { %v1660_v38 = vpop.f32.mrb[94].mxu0  ;;  %2624 = vmatprep.subr.bf16.mxu0 %v2119_v48  ;;  %v1659_v52 = vadd.f32 %v1658_v17, %v6178_v6  ;;  %v1853_v62 = vpop.f32.mrb[94].mxu1  ;;  %2737 = vmatprep.subr.bf16.mxu1 %v2121_v31  ;;  %v1852_v20 = vadd.f32 %v1851_v54, %v6178_v6 }
 0x20e   :  { %v1661_v41 = vadd.f32 %v1660_v38, %v6181_v25  ;;  %v1662_v26 = vpop.f32.mrb[95].mxu0  ;;  %2625 = vmatpush1.bf16.msra.mxu0 %v2118_v50  ;;  %v1854_v8 = vadd.f32 %v1853_v62, %v6181_v25  ;;  %v1855_v33 = vpop.f32.mrb[95].mxu1  ;;  %2738 = vmatpush1.bf16.msra.mxu1 %v2120_v44 }
 0x20f   :  { %v1663_v12 = vadd.f32 %v1662_v26, %v6181_v25  ;;  %v1856_v34 = vadd.f32 %v1855_v33, %v6181_v25 }
 0x210   :  { %v1998_v56 = vpack.c.bf16 %v1661_v41, %v1657_v18  ;;  %v2000_v32 = vpack.c.bf16 %v1854_v8, %v1850_v21 }
 0x211   :  { %v1999_v27 = vpack.c.bf16 %v1663_v12, %v1659_v52  ;;  %2489 = vmatmul.mubr.bf16.gmra.mrb[156].mxu0 %v6508_v46  ;;  %v2001_v45 = vpack.c.bf16 %v1856_v34, %v1852_v20  ;;  %2602 = vmatmul.mubr.bf16.gmra.mrb[156].mxu1 %v6508_v46 }
 0x212   :  { %2644 = vmatprep.mubr.bf16.mxu0 %v4057_v22  ;;  %v2126_v15 = vmax.bf16 %v4082_v11, %v1998_v56  ;;  %2757 = vmatprep.mubr.bf16.mxu1 %v4057_v22  ;;  %v2128_v18 = vmax.bf16 %v4082_v11, %v2000_v32 }
 0x213   :  { %v1666_v43 = vpop.f32.mrb[96].mxu0  ;;  %v2127_v37 = vmax.bf16 %v4082_v11, %v1999_v27  ;;  %v1859_v25 = vpop.f32.mrb[96].mxu1  ;;  %v2129_v17 = vmax.bf16 %v4082_v11, %v2001_v45 }
 0x214   :  { %v1668_v48 = vpop.f32.mrb[97].mxu0  ;;  %v1667_v6 = vadd.f32 %v1666_v43, %v6194_v35  ;;  %v1861_v41 = vpop.f32.mrb[97].mxu1  ;;  %v1860_v52 = vadd.f32 %v1859_v25, %v6194_v35 }
 0x215   :  { %v1670_v50 = vpop.f32.mrb[98].mxu0  ;;  %2626 = vmatprep.subr.bf16.mxu0 %v2127_v37  ;;  %v1669_v2 = vadd.f32 %v1668_v48, %v6194_v35  ;;  %v1863_v44 = vpop.f32.mrb[98].mxu1  ;;  %2739 = vmatprep.subr.bf16.mxu1 %v2129_v17  ;;  %v1862_v62 = vadd.f32 %v1861_v41, %v6194_v35 }
 0x216   :  { %v1671_v59 = vadd.f32 %v1670_v50, %v6197_v40  ;;  %v1672_v38 = vpop.f32.mrb[99].mxu0  ;;  %2627 = vmatpush1.bf16.msra.mxu0 %v2126_v15  ;;  %v1864_v54 = vadd.f32 %v1863_v44, %v6197_v40  ;;  %v1865_v56 = vpop.f32.mrb[99].mxu1  ;;  %2740 = vmatpush1.bf16.msra.mxu1 %v2128_v18 }
 0x217   :  { %v1673_v31 = vadd.f32 %v1672_v38, %v6197_v40  ;;  %v1866_v21 = vadd.f32 %v1865_v56, %v6197_v40 }
 0x218   :  { %v2006_v26 = vpack.c.bf16 %v1671_v59, %v1667_v6  ;;  %v2008_v8 = vpack.c.bf16 %v1864_v54, %v1860_v52 }
 0x219   :  { %v2007_v12 = vpack.c.bf16 %v1673_v31, %v1669_v2  ;;  %v2009_v34 = vpack.c.bf16 %v1866_v21, %v1862_v62 }
 0x21a   :  { %v2134_v20 = vmax.bf16 %v4082_v11, %v2006_v26  ;;  %v2136_v40 = vmax.bf16 %v4082_v11, %v2008_v8 }
 0x21b   :  { %v1676_v27 = vpop.f32.mrb[100].mxu0  ;;  %v2135_v33 = vmax.bf16 %v4082_v11, %v2007_v12  ;;  %v1869_v37 = vpop.f32.mrb[100].mxu1  ;;  %v2137_v45 = vmax.bf16 %v4082_v11, %v2009_v34 }
 0x21c   :  { %v1678_v22 = vpop.f32.mrb[101].mxu0  ;;  %v1677_v43 = vadd.f32 %v1676_v27, %v6210_v13  ;;  %v1871_v50 = vpop.f32.mrb[101].mxu1  ;;  %v1870_v17 = vadd.f32 %v1869_v37, %v6210_v13 }
 0x21d   :  { %v1680_v32 = vpop.f32.mrb[102].mxu0  ;;  %2628 = vmatprep.subr.bf16.mxu0 %v2135_v33  ;;  %v1679_v48 = vadd.f32 %v1678_v22, %v6210_v13  ;;  %v1873_v59 = vpop.f32.mrb[102].mxu1  ;;  %2741 = vmatprep.subr.bf16.mxu1 %v2137_v45  ;;  %v1872_v41 = vadd.f32 %v1871_v50, %v6210_v13 }
 0x21e   :  { %v1681_v15 = vadd.f32 %v1680_v32, %v6213_v5  ;;  %v1682_v35 = vpop.f32.mrb[103].mxu0  ;;  %2629 = vmatpush1.bf16.msra.mxu0 %v2134_v20  ;;  %v1874_v38 = vadd.f32 %v1873_v59, %v6213_v5  ;;  %v1875_v2 = vpop.f32.mrb[103].mxu1  ;;  %2742 = vmatpush1.bf16.msra.mxu1 %v2136_v40 }
 0x21f   :  { %v1683_v6 = vadd.f32 %v1682_v35, %v6213_v5  ;;  %v1876_v31 = vadd.f32 %v1875_v2, %v6213_v5 }
 0x220   :  { %v2014_v25 = vpack.c.bf16 %v1681_v15, %v1677_v43  ;;  %v2016_v26 = vpack.c.bf16 %v1874_v38, %v1870_v17 }
 0x221   :  { %v2015_v18 = vpack.c.bf16 %v1683_v6, %v1679_v48  ;;  %v2017_v12 = vpack.c.bf16 %v1876_v31, %v1872_v41 }
 0x222   :  { %v2142_v54 = vmax.bf16 %v4082_v11, %v2014_v25  ;;  %v2144_v5 = vmax.bf16 %v4082_v11, %v2016_v26 }
 0x223   :  { %v1686_v44 = vpop.f32.mrb[104].mxu0  ;;  %v2143_v52 = vmax.bf16 %v4082_v11, %v2015_v18  ;;  %v1879_v8 = vpop.f32.mrb[104].mxu1  ;;  %v2145_v33 = vmax.bf16 %v4082_v11, %v2017_v12 }
 0x224   :  { %v1688_v56 = vpop.f32.mrb[105].mxu0  ;;  %v1687_v21 = vadd.f32 %v1686_v44, %v6226_v9  ;;  %v1881_v34 = vpop.f32.mrb[105].mxu1  ;;  %v1880_v37 = vadd.f32 %v1879_v8, %v6226_v9 }
 0x225   :  { %v1690_v62 = vpop.f32.mrb[106].mxu0  ;;  %2630 = vmatprep.subr.bf16.mxu0 %v2143_v52  ;;  %v1689_v20 = vadd.f32 %v1688_v56, %v6226_v9  ;;  %v1883_v43 = vpop.f32.mrb[106].mxu1  ;;  %2743 = vmatprep.subr.bf16.mxu1 %v2145_v33  ;;  %v1882_v40 = vadd.f32 %v1881_v34, %v6226_v9 }
 0x226   :  { %v1691_v27 = vadd.f32 %v1690_v62, %v6229_v55  ;;  %v1692_v13 = vpop.f32.mrb[107].mxu0  ;;  %2631 = vmatpush1.bf16.msra.mxu0 %v2142_v54  ;;  %v1884_v15 = vadd.f32 %v1883_v43, %v6229_v55  ;;  %v1885_v35 = vpop.f32.mrb[107].mxu1  ;;  %2744 = vmatpush1.bf16.msra.mxu1 %v2144_v5 }
 0x227   :  { %v1693_v22 = vadd.f32 %v1692_v13, %v6229_v55  ;;  %v1886_v48 = vadd.f32 %v1885_v35, %v6229_v55 }
 0x228   :  { %v2022_v32 = vpack.c.bf16 %v1691_v27, %v1687_v21  ;;  %v2024_v50 = vpack.c.bf16 %v1884_v15, %v1880_v37 }
 0x229   :  { %v2023_v45 = vpack.c.bf16 %v1693_v22, %v1689_v20  ;;  %v2025_v17 = vpack.c.bf16 %v1886_v48, %v1882_v40 }
 0x22a   :  { %v2150_v59 = vmax.bf16 %v4082_v11, %v2022_v32  ;;  %v2152_v55 = vmax.bf16 %v4082_v11, %v2024_v50 }
 0x22b   :  { %v1696_v6 = vpop.f32.mrb[108].mxu0  ;;  %v2151_v25 = vmax.bf16 %v4082_v11, %v2023_v45  ;;  %v1889_v41 = vpop.f32.mrb[108].mxu1  ;;  %v2153_v26 = vmax.bf16 %v4082_v11, %v2025_v17 }
 0x22c   :  { %v1698_v38 = vpop.f32.mrb[109].mxu0  ;;  %v1697_v2 = vadd.f32 %v1696_v6, %v6242_v30  ;;  %v1891_v52 = vpop.f32.mrb[109].mxu1  ;;  %v1890_v62 = vadd.f32 %v1889_v41, %v6242_v30 }
 0x22d   :  { %v1700_v18 = vpop.f32.mrb[110].mxu0  ;;  %2632 = vmatprep.subr.bf16.mxu0 %v2151_v25  ;;  %v1699_v44 = vadd.f32 %v1698_v38, %v6242_v30  ;;  %v1893_v56 = vpop.f32.mrb[110].mxu1  ;;  %2745 = vmatprep.subr.bf16.mxu1 %v2153_v26  ;;  %v1892_v33 = vadd.f32 %v1891_v52, %v6242_v30 }
 0x22e   :  { %v1701_v31 = vadd.f32 %v1700_v18, %v6245_v61  ;;  %v1702_v9 = vpop.f32.mrb[111].mxu0  ;;  %2633 = vmatpush1.bf16.msra.mxu0 %v2150_v59  ;;  %v1894_v21 = vadd.f32 %v1893_v56, %v6245_v61  ;;  %v1895_v27 = vpop.f32.mrb[111].mxu1  ;;  %2746 = vmatpush1.bf16.msra.mxu1 %v2152_v55 }
 0x22f   :  { %v1703_v54 = vadd.f32 %v1702_v9, %v6245_v61  ;;  %v1896_v13 = vadd.f32 %v1895_v27, %v6245_v61 }
 0x230   :  { %v2030_v12 = vpack.c.bf16 %v1701_v31, %v1697_v2  ;;  %v2032_v5 = vpack.c.bf16 %v1894_v21, %v1890_v62 }
 0x231   :  { %v2031_v8 = vpack.c.bf16 %v1703_v54, %v1699_v44  ;;  %v2033_v32 = vpack.c.bf16 %v1896_v13, %v1892_v33 }
 0x232   :  { %v2158_v22 = vmax.bf16 %v4082_v11, %v2030_v12  ;;  %v2160_v61 = vmax.bf16 %v4082_v11, %v2032_v5 }
 0x233   :  { %v1706_v20 = vpop.f32.mrb[112].mxu0  ;;  %v2159_v34 = vmax.bf16 %v4082_v11, %v2031_v8  ;;  %v1899_v45 = vpop.f32.mrb[112].mxu1  ;;  %v2161_v40 = vmax.bf16 %v4082_v11, %v2033_v32 }
 0x234   :  { %v1708_v43 = vpop.f32.mrb[113].mxu0  ;;  %v1707_v15 = vadd.f32 %v1706_v20, %v6258_v29  ;;  %v1901_v50 = vpop.f32.mrb[113].mxu1  ;;  %v1900_v17 = vadd.f32 %v1899_v45, %v6258_v29 }
 0x235   :  { %v1710_v37 = vpop.f32.mrb[114].mxu0  ;;  %2634 = vmatprep.subr.bf16.mxu0 %v2159_v34  ;;  %v1709_v48 = vadd.f32 %v1708_v43, %v6258_v29  ;;  %v1903_v59 = vpop.f32.mrb[114].mxu1  ;;  %2747 = vmatprep.subr.bf16.mxu1 %v2161_v40  ;;  %v1902_v41 = vadd.f32 %v1901_v50, %v6258_v29 }
 0x236   :  { %v1711_v35 = vadd.f32 %v1710_v37, %v6261_v42  ;;  %v1712_v30 = vpop.f32.mrb[115].mxu0  ;;  %2635 = vmatpush1.bf16.msra.mxu0 %v2158_v22  ;;  %v1904_v38 = vadd.f32 %v1903_v59, %v6261_v42  ;;  %v1905_v2 = vpop.f32.mrb[115].mxu1  ;;  %2748 = vmatpush1.bf16.msra.mxu1 %v2160_v61 }
 0x237   :  { %v1713_v6 = vadd.f32 %v1712_v30, %v6261_v42  ;;  %v1906_v31 = vadd.f32 %v1905_v2, %v6261_v42 }
 0x238   :  { %v2038_v25 = vpack.c.bf16 %v1711_v35, %v1707_v15  ;;  %v2040_v26 = vpack.c.bf16 %v1904_v38, %v1900_v17 }
 0x239   :  { %v2039_v18 = vpack.c.bf16 %v1713_v6, %v1709_v48  ;;  %v2041_v52 = vpack.c.bf16 %v1906_v31, %v1902_v41 }
 0x23a   :  { %v2166_v44 = vmax.bf16 %v4082_v11, %v2038_v25  ;;  %v2168_v42 = vmax.bf16 %v4082_v11, %v2040_v26 }
 0x23b   :  { %v1716_v9 = vpop.f32.mrb[116].mxu0  ;;  %v2167_v55 = vmax.bf16 %v4082_v11, %v2039_v18  ;;  %v1909_v62 = vpop.f32.mrb[116].mxu1  ;;  %v2169_v8 = vmax.bf16 %v4082_v11, %v2041_v52 }
 0x23c   :  { %v1718_v54 = vpop.f32.mrb[117].mxu0  ;;  %v1717_v56 = vadd.f32 %v1716_v9, %v6274_v53  ;;  %v1911_v33 = vpop.f32.mrb[117].mxu1  ;;  %v1910_v34 = vadd.f32 %v1909_v62, %v6274_v53 }
 0x23d   :  { %v1720_v12 = vpop.f32.mrb[118].mxu0  ;;  %2636 = vmatprep.subr.bf16.mxu0 %v2167_v55  ;;  %v1719_v27 = vadd.f32 %v1718_v54, %v6274_v53  ;;  %v1913_v20 = vpop.f32.mrb[118].mxu1  ;;  %2749 = vmatprep.subr.bf16.mxu1 %v2169_v8  ;;  %v1912_v37 = vadd.f32 %v1911_v33, %v6274_v53 }
 0x23e   :  { %v1721_v21 = vadd.f32 %v1720_v12, %v6277_v57  ;;  %v1722_v29 = vpop.f32.mrb[119].mxu0  ;;  %2637 = vmatpush1.bf16.msra.mxu0 %v2166_v44  ;;  %v1914_v22 = vadd.f32 %v1913_v20, %v6277_v57  ;;  %v1915_v43 = vpop.f32.mrb[119].mxu1  ;;  %2750 = vmatpush1.bf16.msra.mxu1 %v2168_v42 }
 0x23f   :  { %v1723_v13 = vadd.f32 %v1722_v29, %v6277_v57  ;;  %v1916_v15 = vadd.f32 %v1915_v43, %v6277_v57 }
 0x240   :  { %v2046_v5 = vpack.c.bf16 %v1721_v21, %v1717_v56  ;;  %v2048_v45 = vpack.c.bf16 %v1914_v22, %v1910_v34 }
 0x241   :  { %v2047_v32 = vpack.c.bf16 %v1723_v13, %v1719_v27  ;;  %v2049_v61 = vpack.c.bf16 %v1916_v15, %v1912_v37 }
 0x242   :  { %v2174_v30 = vmax.bf16 %v4082_v11, %v2046_v5  ;;  %v2176_v57 = vmax.bf16 %v4082_v11, %v2048_v45 }
 0x243   :  { %v1726_v35 = vpop.f32.mrb[120].mxu0  ;;  %v2175_v40 = vmax.bf16 %v4082_v11, %v2047_v32  ;;  %v1919_v25 = vpop.f32.mrb[120].mxu1  ;;  %v2177_v17 = vmax.bf16 %v4082_v11, %v2049_v61 }
 0x244   :  { %v1728_v48 = vpop.f32.mrb[121].mxu0  ;;  %v1727_v6 = vadd.f32 %v1726_v35, %v6290_v0  ;;  %v1921_v18 = vpop.f32.mrb[121].mxu1  ;;  %v1920_v26 = vadd.f32 %v1919_v25, %v6290_v0 }
 0x245   :  { %v1730_v50 = vpop.f32.mrb[122].mxu0  ;;  %2638 = vmatprep.subr.bf16.mxu0 %v2175_v40  ;;  %v1729_v38 = vadd.f32 %v1728_v48, %v6290_v0  ;;  %v1923_v31 = vpop.f32.mrb[122].mxu1  ;;  %2751 = vmatprep.subr.bf16.mxu1 %v2177_v17  ;;  %v1922_v52 = vadd.f32 %v1921_v18, %v6290_v0 }
 0x246   :  { %v1731_v59 = vadd.f32 %v1730_v50, %v6293_v39  ;;  %v1732_v53 = vpop.f32.mrb[123].mxu0  ;;  %2639 = vmatpush1.bf16.msra.mxu0 %v2174_v30  ;;  %v1924_v9 = vadd.f32 %v1923_v31, %v6293_v39  ;;  %v1925_v44 = vpop.f32.mrb[123].mxu1  ;;  %2752 = vmatpush1.bf16.msra.mxu1 %v2176_v57 }
 0x247   :  { %v1733_v2 = vadd.f32 %v1732_v53, %v6293_v39  ;;  %v1926_v54 = vadd.f32 %v1925_v44, %v6293_v39 }
 0x248   :  { %v2054_v41 = vpack.c.bf16 %v1731_v59, %v1727_v6  ;;  %v2056_v12 = vpack.c.bf16 %v1924_v9, %v1920_v26 }
 0x249   :  { %v2055_v55 = vpack.c.bf16 %v1733_v2, %v1729_v38  ;;  %v2057_v8 = vpack.c.bf16 %v1926_v54, %v1922_v52 }
 0x24a   :  { %v2182_v21 = vmax.bf16 %v4082_v11, %v2054_v41  ;;  %v2184_v39 = vmax.bf16 %v4082_v11, %v2056_v12 }
 0x24b   :  { %v1736_v56 = vpop.f32.mrb[124].mxu0  ;;  %v2183_v62 = vmax.bf16 %v4082_v11, %v2055_v55  ;;  %v1929_v33 = vpop.f32.mrb[124].mxu1  ;;  %v2185_v5 = vmax.bf16 %v4082_v11, %v2057_v8 }
 0x24c   :  { %v1738_v29 = vpop.f32.mrb[125].mxu0  ;;  %v1737_v27 = vadd.f32 %v1736_v56, %v6306_v16  ;;  %v1931_v34 = vpop.f32.mrb[125].mxu1  ;;  %v1930_v37 = vadd.f32 %v1929_v33, %v6306_v16 }
 0x24d   :  { %v1740_v42 = vpop.f32.mrb[126].mxu0  ;;  %2640 = vmatprep.subr.bf16.mxu0 %v2183_v62  ;;  %v1739_v20 = vadd.f32 %v1738_v29, %v6306_v16  ;;  %v1933_v43 = vpop.f32.mrb[126].mxu1  ;;  %2753 = vmatprep.subr.bf16.mxu1 %v2185_v5  ;;  %v1932_v40 = vadd.f32 %v1931_v34, %v6306_v16 }
 0x24e   :  { %v1741_v13 = vadd.f32 %v1740_v42, %v6309_v58  ;;  %v1742_v0 = vpop.f32.mrb[127].mxu0  ;;  %2641 = vmatpush1.bf16.msra.mxu0 %v2182_v21  ;;  %v1934_v15 = vadd.f32 %v1933_v43, %v6309_v58  ;;  %v1935_v35 = vpop.f32.mrb[127].mxu1  ;;  %2754 = vmatpush1.bf16.msra.mxu1 %v2184_v39 }
 0x24f   :  { %v1743_v22 = vadd.f32 %v1742_v0, %v6309_v58  ;;  %v1936_v30 = vadd.f32 %v1935_v35, %v6309_v58  ;;  %v6657_v58 = vpop.permute.xlu0 %2228 }
 0x250   :  { %v2062_v32 = vpack.c.bf16 %v1741_v13, %v1737_v27  ;;  %v2064_v61 = vpack.c.bf16 %v1934_v15, %v1930_v37 }
 0x251   :  { %v2063_v45 = vpack.c.bf16 %v1743_v22, %v1739_v20  ;;  %v2065_v6 = vpack.c.bf16 %v1936_v30, %v1932_v40 }
 0x252   :  { %v2190_v50 = vmax.bf16 %v4082_v11, %v2062_v32  ;;  %v2192_v59 = vmax.bf16 %v4082_v11, %v2064_v61 }
 0x253   :  { %v2191_v48 = vmax.bf16 %v4082_v11, %v2063_v45  ;;  %v2193_v25 = vmax.bf16 %v4082_v11, %v2065_v6  ;;  %v6670_v41 = vpop.permute.xlu0 %2238 }
 0x255   :  { %2642 = vmatprep.subr.bf16.mxu0 %v2191_v48  ;;  %2755 = vmatprep.subr.bf16.mxu1 %v2193_v25 }
 0x256   :  { %2643 = vmatpush1.bf16.msra.mxu0 %v2190_v50  ;;  %2756 = vmatpush1.bf16.msra.mxu1 %v2192_v59 }
 0x257   :  { %v6686_v37 = vpop.permute.xlu0 %2248 }
 0x259   :  { %2645 = vmatmul.mubr.bf16.vlgmr.msra.gmra.mrb[160].mxu0 %v6326_v47  ;;  %2758 = vmatmul.mubr.bf16.vlgmr.msra.gmra.mrb[160].mxu1 %v6326_v47 }
 0x25a   :  { %2654 = vmatprep.mubr.bf16.mxu0 %v6334_v24  ;;  %2767 = vmatprep.mubr.bf16.mxu1 %v6334_v24  ;;  %v6659_v24 = vpop.permute.xlu1 %2233 }
 0x25e   :  { %v6673_v55 = vpop.permute.xlu1 %2243 }
 0x261   :  { %2655 = vmatmul.mubr.bf16.gmra.mrb[164].mxu0 %v6352_v23  ;;  %2768 = vmatmul.mubr.bf16.gmra.mrb[164].mxu1 %v6352_v23 }
 0x262   :  { %2664 = vmatprep.mubr.bf16.mxu0 %v6360_v49  ;;  %2777 = vmatprep.mubr.bf16.mxu1 %v6360_v49  ;;  %v6689_v40 = vpop.permute.xlu1 %2253 }
 0x269   :  { %2665 = vmatmul.mubr.bf16.gmra.mrb[168].mxu0 %v6378_v51  ;;  %2778 = vmatmul.mubr.bf16.gmra.mrb[168].mxu1 %v6378_v51 }
 0x26a   :  { %2674 = vmatprep.mubr.bf16.mxu0 %v6386_v14  ;;  %2787 = vmatprep.mubr.bf16.mxu1 %v6386_v14 }
 0x271   :  { %2675 = vmatmul.mubr.bf16.gmra.mrb[172].mxu0 %v6404_v1  ;;  %2788 = vmatmul.mubr.bf16.gmra.mrb[172].mxu1 %v6404_v1 }
 0x272   :  { %2684 = vmatprep.mubr.bf16.mxu0 %v6412_v36  ;;  %2797 = vmatprep.mubr.bf16.mxu1 %v6412_v36 }
 0x279   :  { %2685 = vmatmul.mubr.bf16.gmra.mrb[176].mxu0 %v6430_v19  ;;  %2798 = vmatmul.mubr.bf16.gmra.mrb[176].mxu1 %v6430_v19 }
 0x27a   :  { %2694 = vmatprep.mubr.bf16.mxu0 %v6438_v4  ;;  %2807 = vmatprep.mubr.bf16.mxu1 %v6438_v4 }
 0x281   :  { %2695 = vmatmul.mubr.bf16.gmra.mrb[180].mxu0 %v6456_v60  ;;  %2808 = vmatmul.mubr.bf16.gmra.mrb[180].mxu1 %v6456_v60 }
 0x282   :  { %2704 = vmatprep.mubr.bf16.mxu0 %v6464_v63  ;;  %2817 = vmatprep.mubr.bf16.mxu1 %v6464_v63 }
 0x289   :  { %2705 = vmatmul.mubr.bf16.gmra.mrb[184].mxu0 %v6482_v28  ;;  %2818 = vmatmul.mubr.bf16.gmra.mrb[184].mxu1 %v6482_v28 }
 0x28a   :  { %2714 = vmatprep.mubr.bf16.mxu0 %v6490_v7  ;;  %2827 = vmatprep.mubr.bf16.mxu1 %v6490_v7 }
 0x291   :  { %2715 = vmatmul.mubr.bf16.gmra.mrb[188].mxu0 %v6508_v46  ;;  %2828 = vmatmul.mubr.bf16.gmra.mrb[188].mxu1 %v6508_v46 }
 0x292   :  { %3078 = vmatprep.mubr.bf16.mxu0 %v4082_v11  ;;  %3151 = vmatprep.mubr.bf16.mxu1 %v4082_v11 }
 0x2ac   :  { %v2420_v16 = vpop.f32.mrb[128].mxu0  ;;  %v2533_v51 = vpop.f32.mrb[128].mxu1 }
 0x2ad   :  { %v2422_v47 = vpop.f32.mrb[129].mxu0  ;;  %v2421_v49 = vadd.f32 %v2420_v16, %v6657_v58  ;;  %v2535_v19 = vpop.f32.mrb[129].mxu1  ;;  %v2534_v28 = vadd.f32 %v2533_v51, %v6657_v58 }
 0x2ae   :  { %v2424_v23 = vpop.f32.mrb[130].mxu0  ;;  %v2423_v36 = vadd.f32 %v2422_v47, %v6657_v58  ;;  %v2537_v63 = vpop.f32.mrb[130].mxu1  ;;  %v2536_v53 = vadd.f32 %v2535_v19, %v6657_v58 }
 0x2af   :  { %v2425_v14 = vadd.f32 %v2424_v23, %v6659_v24  ;;  %v2426_v1 = vpop.f32.mrb[131].mxu0  ;;  %v2538_v7 = vadd.f32 %v2537_v63, %v6659_v24  ;;  %v2539_v17 = vpop.f32.mrb[131].mxu1 }
 0x2b0   :  { %v2427_v4 = vadd.f32 %v2426_v1, %v6659_v24  ;;  %v2540_v57 = vadd.f32 %v2539_v17, %v6659_v24 }
 0x2b1   :  { %v2838_v60 = vpack.c.bf16 %v2425_v14, %v2421_v49  ;;  %v2840_v38 = vpack.c.bf16 %v2538_v7, %v2534_v28 }
 0x2b2   :  { %v2839_v46 = vpack.c.bf16 %v2427_v4, %v2423_v36  ;;  %v2841_v26 = vpack.c.bf16 %v2540_v57, %v2536_v53 }
 0x2b3   :  { %v2902_v31 = vmax.bf16 %v4082_v11, %v2838_v60  ;;  %v2904_v21 = vmax.bf16 %v4082_v11, %v2840_v38  ;;  %v6705_v38 = vpop.permute.xlu1 %2263 }
 0x2b4   :  { %v2430_v18 = vpop.f32.mrb[132].mxu0  ;;  %v2903_v2 = vmax.bf16 %v4082_v11, %v2839_v46  ;;  %v2543_v54 = vpop.f32.mrb[132].mxu1  ;;  %v2905_v56 = vmax.bf16 %v4082_v11, %v2841_v26 }
 0x2b5   :  { %v2432_v9 = vpop.f32.mrb[133].mxu0  ;;  %v2431_v52 = vadd.f32 %v2430_v18, %v6670_v41  ;;  %v2545_v29 = vpop.f32.mrb[133].mxu1  ;;  %v2544_v13 = vadd.f32 %v2543_v54, %v6670_v41 }
 0x2b6   :  { %v2434_v44 = vpop.f32.mrb[134].mxu0  ;;  %3046 = vmatprep.subr.bf16.mxu0 %v2903_v2  ;;  %v2433_v8 = vadd.f32 %v2432_v9, %v6670_v41  ;;  %v2547_v33 = vpop.f32.mrb[134].mxu1  ;;  %3119 = vmatprep.subr.bf16.mxu1 %v2905_v56  ;;  %v2546_v20 = vadd.f32 %v2545_v29, %v6670_v41 }
 0x2b7   :  { %v2435_v12 = vadd.f32 %v2434_v44, %v6673_v55  ;;  %v2436_v62 = vpop.f32.mrb[135].mxu0  ;;  %3047 = vmatpush1.bf16.msra.mxu0 %v2902_v31  ;;  %v2548_v5 = vadd.f32 %v2547_v33, %v6673_v55  ;;  %v2549_v39 = vpop.f32.mrb[135].mxu1  ;;  %3120 = vmatpush1.bf16.msra.mxu1 %v2904_v21 }
 0x2b8   :  { %v2437_v42 = vadd.f32 %v2436_v62, %v6673_v55  ;;  %v2550_v34 = vadd.f32 %v2549_v39, %v6673_v55  ;;  %v6702_v46 = vpop.permute.xlu0 %2258 }
 0x2b9   :  { %v2846_v27 = vpack.c.bf16 %v2435_v12, %v2431_v52  ;;  %v2848_v22 = vpack.c.bf16 %v2548_v5, %v2544_v13 }
 0x2ba   :  { %v2847_v0 = vpack.c.bf16 %v2437_v42, %v2433_v8  ;;  %v2849_v45 = vpack.c.bf16 %v2550_v34, %v2546_v20 }
 0x2bb   :  { %v2910_v15 = vmax.bf16 %v4082_v11, %v2846_v27  ;;  %v2912_v59 = vmax.bf16 %v4082_v11, %v2848_v22 }
 0x2bc   :  { %v2440_v32 = vpop.f32.mrb[136].mxu0  ;;  %v2911_v43 = vmax.bf16 %v4082_v11, %v2847_v0  ;;  %v2553_v48 = vpop.f32.mrb[136].mxu1  ;;  %v2913_v6 = vmax.bf16 %v4082_v11, %v2849_v45 }
 0x2bd   :  { %v2442_v35 = vpop.f32.mrb[137].mxu0  ;;  %v2441_v61 = vadd.f32 %v2440_v32, %v6686_v37  ;;  %v2555_v47 = vpop.f32.mrb[137].mxu1  ;;  %v2554_v14 = vadd.f32 %v2553_v48, %v6686_v37 }
 0x2be   :  { %v2444_v30 = vpop.f32.mrb[138].mxu0  ;;  %3048 = vmatprep.subr.bf16.mxu0 %v2911_v43  ;;  %v2443_v16 = vadd.f32 %v2442_v35, %v6686_v37  ;;  %v2557_v51 = vpop.f32.mrb[138].mxu1  ;;  %3121 = vmatprep.subr.bf16.mxu1 %v2913_v6  ;;  %v2556_v4 = vadd.f32 %v2555_v47, %v6686_v37 }
 0x2bf   :  { %v2445_v50 = vadd.f32 %v2444_v30, %v6689_v40  ;;  %v2446_v25 = vpop.f32.mrb[139].mxu0  ;;  %3049 = vmatpush1.bf16.msra.mxu0 %v2910_v15  ;;  %v2558_v1 = vadd.f32 %v2557_v51, %v6689_v40  ;;  %v2559_v19 = vpop.f32.mrb[139].mxu1  ;;  %3122 = vmatpush1.bf16.msra.mxu1 %v2912_v59 }
 0x2c0   :  { %v2447_v23 = vadd.f32 %v2446_v25, %v6689_v40  ;;  %v2560_v60 = vadd.f32 %v2559_v19, %v6689_v40  ;;  %v6718_v20 = vpop.permute.xlu0 %2268  ;;  %v6721_v43 = vpop.permute.xlu1 %2273 }
 0x2c1   :  { %v2854_v49 = vpack.c.bf16 %v2445_v50, %v2441_v61  ;;  %v2856_v63 = vpack.c.bf16 %v2558_v1, %v2554_v14 }
 0x2c2   :  { %v2855_v36 = vpack.c.bf16 %v2447_v23, %v2443_v16  ;;  %v2857_v53 = vpack.c.bf16 %v2560_v60, %v2556_v4 }
 0x2c3   :  { %v2918_v17 = vmax.bf16 %v4082_v11, %v2854_v49  ;;  %v2920_v52 = vmax.bf16 %v4082_v11, %v2856_v63 }
 0x2c4   :  { %v2450_v28 = vpop.f32.mrb[140].mxu0  ;;  %v2919_v7 = vmax.bf16 %v4082_v11, %v2855_v36  ;;  %v2563_v31 = vpop.f32.mrb[140].mxu1  ;;  %v2921_v9 = vmax.bf16 %v4082_v11, %v2857_v53 }
 0x2c5   :  { %v2452_v57 = vpop.f32.mrb[141].mxu0  ;;  %v2451_v2 = vadd.f32 %v2450_v28, %v6702_v46  ;;  %v2565_v12 = vpop.f32.mrb[141].mxu1  ;;  %v2564_v8 = vadd.f32 %v2563_v31, %v6702_v46 }
 0x2c6   :  { %v2454_v18 = vpop.f32.mrb[142].mxu0  ;;  %3050 = vmatprep.subr.bf16.mxu0 %v2919_v7  ;;  %v2453_v54 = vadd.f32 %v2452_v57, %v6702_v46  ;;  %v2567_v21 = vpop.f32.mrb[142].mxu1  ;;  %3123 = vmatprep.subr.bf16.mxu1 %v2921_v9  ;;  %v2566_v33 = vadd.f32 %v2565_v12, %v6702_v46 }
 0x2c7   :  { %v2455_v26 = vadd.f32 %v2454_v18, %v6705_v38  ;;  %v2456_v44 = vpop.f32.mrb[143].mxu0  ;;  %3051 = vmatpush1.bf16.msra.mxu0 %v2918_v17  ;;  %v2568_v29 = vadd.f32 %v2567_v21, %v6705_v38  ;;  %v2569_v27 = vpop.f32.mrb[143].mxu1  ;;  %3124 = vmatpush1.bf16.msra.mxu1 %v2920_v52 }
 0x2c8   :  { %v2457_v56 = vadd.f32 %v2456_v44, %v6705_v38  ;;  %v2570_v13 = vadd.f32 %v2569_v27, %v6705_v38  ;;  %v6734_v63 = vpop.permute.xlu0 %2278  ;;  %v6737_v53 = vpop.permute.xlu1 %2283 }
 0x2c9   :  { %v2862_v62 = vpack.c.bf16 %v2455_v26, %v2451_v2  ;;  %v2864_v5 = vpack.c.bf16 %v2568_v29, %v2564_v8 }
 0x2ca   :  { %v2863_v42 = vpack.c.bf16 %v2457_v56, %v2453_v54  ;;  %v2865_v22 = vpack.c.bf16 %v2570_v13, %v2566_v33 }
 0x2cb   :  { %v2926_v34 = vmax.bf16 %v4082_v11, %v2862_v62  ;;  %v2928_v50 = vmax.bf16 %v4082_v11, %v2864_v5 }
 0x2cc   :  { %v2460_v0 = vpop.f32.mrb[144].mxu0  ;;  %v2927_v39 = vmax.bf16 %v4082_v11, %v2863_v42  ;;  %v2573_v35 = vpop.f32.mrb[144].mxu1  ;;  %v2929_v61 = vmax.bf16 %v4082_v11, %v2865_v22 }
 0x2cd   :  { %v2462_v32 = vpop.f32.mrb[145].mxu0  ;;  %v2461_v45 = vadd.f32 %v2460_v0, %v6718_v20  ;;  %v2575_v25 = vpop.f32.mrb[145].mxu1  ;;  %v2574_v23 = vadd.f32 %v2573_v35, %v6718_v20 }
 0x2ce   :  { %v2464_v15 = vpop.f32.mrb[146].mxu0  ;;  %3052 = vmatprep.subr.bf16.mxu0 %v2927_v39  ;;  %v2463_v6 = vadd.f32 %v2462_v32, %v6718_v20  ;;  %v2577_v47 = vpop.f32.mrb[146].mxu1  ;;  %3125 = vmatprep.subr.bf16.mxu1 %v2929_v61  ;;  %v2576_v1 = vadd.f32 %v2575_v25, %v6718_v20 }
 0x2cf   :  { %v2465_v30 = vadd.f32 %v2464_v15, %v6721_v43  ;;  %v2466_v48 = vpop.f32.mrb[147].mxu0  ;;  %3053 = vmatpush1.bf16.msra.mxu0 %v2926_v34  ;;  %v2578_v49 = vadd.f32 %v2577_v47, %v6721_v43  ;;  %v2579_v14 = vpop.f32.mrb[147].mxu1  ;;  %3126 = vmatpush1.bf16.msra.mxu1 %v2928_v50 }
 0x2d0   :  { %v2467_v59 = vadd.f32 %v2466_v48, %v6721_v43  ;;  %v2580_v36 = vadd.f32 %v2579_v14, %v6721_v43  ;;  %v6750_v39 = vpop.permute.xlu0 %2288  ;;  %v6753_v15 = vpop.permute.xlu1 %2293 }
 0x2d1   :  { %v2870_v16 = vpack.c.bf16 %v2465_v30, %v2461_v45  ;;  %v2872_v19 = vpack.c.bf16 %v2578_v49, %v2574_v23 }
 0x2d2   :  { %v2871_v51 = vpack.c.bf16 %v2467_v59, %v2463_v6  ;;  %v2873_v7 = vpack.c.bf16 %v2580_v36, %v2576_v1 }
 0x2d3   :  { %v2934_v28 = vmax.bf16 %v4082_v11, %v2870_v16  ;;  %v2936_v44 = vmax.bf16 %v4082_v11, %v2872_v19 }
 0x2d4   :  { %v2470_v4 = vpop.f32.mrb[148].mxu0  ;;  %v2935_v60 = vmax.bf16 %v4082_v11, %v2871_v51  ;;  %v2583_v2 = vpop.f32.mrb[148].mxu1  ;;  %v2937_v26 = vmax.bf16 %v4082_v11, %v2873_v7 }
 0x2d5   :  { %v2472_v17 = vpop.f32.mrb[149].mxu0  ;;  %v2471_v18 = vadd.f32 %v2470_v4, %v6734_v63  ;;  %v2585_v54 = vpop.f32.mrb[149].mxu1  ;;  %v2584_v21 = vadd.f32 %v2583_v2, %v6734_v63 }
 0x2d6   :  { %v2474_v57 = vpop.f32.mrb[150].mxu0  ;;  %3054 = vmatprep.subr.bf16.mxu0 %v2935_v60  ;;  %v2473_v52 = vadd.f32 %v2472_v17, %v6734_v63  ;;  %v2587_v62 = vpop.f32.mrb[150].mxu1  ;;  %3127 = vmatprep.subr.bf16.mxu1 %v2937_v26  ;;  %v2586_v27 = vadd.f32 %v2585_v54, %v6734_v63 }
 0x2d7   :  { %v2475_v31 = vadd.f32 %v2474_v57, %v6737_v53  ;;  %v2476_v9 = vpop.f32.mrb[151].mxu0  ;;  %3055 = vmatpush1.bf16.msra.mxu0 %v2934_v28  ;;  %v2588_v8 = vadd.f32 %v2587_v62, %v6737_v53  ;;  %v2589_v42 = vpop.f32.mrb[151].mxu1  ;;  %3128 = vmatpush1.bf16.msra.mxu1 %v2936_v44 }
 0x2d8   :  { %v2477_v12 = vadd.f32 %v2476_v9, %v6737_v53  ;;  %v2590_v33 = vadd.f32 %v2589_v42, %v6737_v53  ;;  %v6766_v7 = vpop.permute.xlu0 %2298  ;;  %v6769_v2 = vpop.permute.xlu1 %2303 }
 0x2d9   :  { %v2878_v56 = vpack.c.bf16 %v2475_v31, %v2471_v18  ;;  %v2880_v13 = vpack.c.bf16 %v2588_v8, %v2584_v21 }
 0x2da   :  { %v2879_v29 = vpack.c.bf16 %v2477_v12, %v2473_v52  ;;  %v2881_v22 = vpack.c.bf16 %v2590_v33, %v2586_v27 }
 0x2db   :  { %v2942_v34 = vmax.bf16 %v4082_v11, %v2878_v56  ;;  %v2944_v6 = vmax.bf16 %v4082_v11, %v2880_v13 }
 0x2dc   :  { %v2480_v5 = vpop.f32.mrb[152].mxu0  ;;  %v2943_v0 = vmax.bf16 %v4082_v11, %v2879_v29  ;;  %v2593_v30 = vpop.f32.mrb[152].mxu1  ;;  %v2945_v48 = vmax.bf16 %v4082_v11, %v2881_v22 }
 0x2dd   :  { %v2482_v32 = vpop.f32.mrb[153].mxu0  ;;  %v2481_v35 = vadd.f32 %v2480_v5, %v6750_v39  ;;  %v2595_v59 = vpop.f32.mrb[153].mxu1  ;;  %v2594_v49 = vadd.f32 %v2593_v30, %v6750_v39 }
 0x2de   :  { %v2484_v45 = vpop.f32.mrb[154].mxu0  ;;  %3056 = vmatprep.subr.bf16.mxu0 %v2943_v0  ;;  %v2483_v25 = vadd.f32 %v2482_v32, %v6750_v39  ;;  %v2597_v23 = vpop.f32.mrb[154].mxu1  ;;  %3129 = vmatprep.subr.bf16.mxu1 %v2945_v48  ;;  %v2596_v36 = vadd.f32 %v2595_v59, %v6750_v39  ;;  %v6797_v48 = vld [vmem:[%s7138_s6 + $0x8] sm:$0xff]  }
 0x2df   :  { %v2485_v61 = vadd.f32 %v2484_v45, %v6753_v15  ;;  %v2486_v50 = vpop.f32.mrb[155].mxu0  ;;  %3057 = vmatpush1.bf16.msra.mxu0 %v2942_v34  ;;  %v2598_v51 = vadd.f32 %v2597_v23, %v6753_v15  ;;  %v2599_v1 = vpop.f32.mrb[155].mxu1  ;;  %3130 = vmatpush1.bf16.msra.mxu1 %v2944_v6  ;;  %v6815_v6 = vld [vmem:[%s7138_s6 + $0x18] sm:$0xff]  }
 0x2e0   :  { %v2487_v16 = vadd.f32 %v2486_v50, %v6753_v15  ;;  %v2600_v19 = vadd.f32 %v2599_v1, %v6753_v15  ;;  %v6806_v50 = vld [vmem:[%s7138_s6 + $0x10] sm:$0xff]  }
 0x2e1   :  { %v2886_v47 = vpack.c.bf16 %v2485_v61, %v2481_v35  ;;  %v2888_v4 = vpack.c.bf16 %v2598_v51, %v2594_v49  ;;  %v6786_v35 = vld [vmem:[%s7138_s6] sm:$0xff]   ;;  %s4085_s6 = smov [#allocation3]  }
 0x2e2   :  { %v2887_v14 = vpack.c.bf16 %v2487_v16, %v2483_v25  ;;  %v2889_v57 = vpack.c.bf16 %v2600_v19, %v2596_v36  ;;  %s3701_s5 = sshll.u32 %s4085_s6, 4  ;;  %s3702_s5 = int_to_ptr.vmem [resolvable:$true] %s3701_s5 }
 0x2e3   :  { %v2950_v17 = vmax.bf16 %v4082_v11, %v2886_v47  ;;  %v2952_v12 = vmax.bf16 %v4082_v11, %v2888_v4  ;;  %s4058_s17 = scalar_lea.vmem %s3702_s5, 128  ;;  %p4063_p1 = scmp.lt.s32.totalorder %s3702_s5, %s3702_s5 }
 0x2e4   :  { %v2490_v60 = vpop.f32.mrb[156].mxu0  ;;  %v2951_v28 = vmax.bf16 %v4082_v11, %v2887_v14  ;;  %v2603_v9 = vpop.f32.mrb[156].mxu1  ;;  %v2953_v52 = vmax.bf16 %v4082_v11, %v2889_v57  ;;  %p4059_p0 = scmp.ne.s32.totalorder %s3702_s5, %s4058_s17  ;;  %p4064_p2 = scmp.lt.s32.totalorder %s4058_s17, %s4058_s17 }
 0x2e5   :  { %v2492_v18 = vpop.f32.mrb[157].mxu0  ;;  %v2491_v26 = vadd.f32 %v2490_v60, %v6766_v7  ;;  %v2605_v62 = vpop.f32.mrb[157].mxu1  ;;  %v2604_v42 = vadd.f32 %v2603_v9, %v6766_v7 }
 0x2e6   :  { %v2494_v31 = vpop.f32.mrb[158].mxu0  ;;  %3058 = vmatprep.subr.bf16.mxu0 %v2951_v28  ;;  %v2493_v56 = vadd.f32 %v2492_v18, %v6766_v7  ;;  %v2607_v29 = vpop.f32.mrb[158].mxu1  ;;  %3131 = vmatprep.subr.bf16.mxu1 %v2953_v52  ;;  %v2606_v5 = vadd.f32 %v2605_v62, %v6766_v7  ;;  %p4065_p3 = por %p4064_p2, %p4063_p1 }
 0x2e7   :  { %v2495_v44 = vadd.f32 %v2494_v31, %v6769_v2  ;;  %v2496_v54 = vpop.f32.mrb[159].mxu0  ;;  %3059 = vmatpush1.bf16.msra.mxu0 %v2950_v17  ;;  %v2608_v27 = vadd.f32 %v2607_v29, %v6769_v2  ;;  %v2609_v13 = vpop.f32.mrb[159].mxu1  ;;  %3132 = vmatpush1.bf16.msra.mxu1 %v2952_v12 }
 0x2e8   :  { %v2497_v21 = vadd.f32 %v2496_v54, %v6769_v2  ;;  %v2610_v0 = vadd.f32 %v2609_v13, %v6769_v2  ;;  %p4066_p4 = pnand %p4065_p3, %p4059_p0 }
 0x2e9   :  { %v2894_v8 = vpack.c.bf16 %v2495_v44, %v2491_v26  ;;  %v2896_v34 = vpack.c.bf16 %v2608_v27, %v2604_v42 }
 0x2ea   :  { %v2895_v33 = vpack.c.bf16 %v2497_v21, %v2493_v56  ;;  %v2897_v45 = vpack.c.bf16 %v2610_v0, %v2606_v5 }
 0x2eb   :  { %v2958_v32 = vmax.bf16 %v4082_v11, %v2894_v8  ;;  %v2960_v61 = vmax.bf16 %v4082_v11, %v2896_v34 }
 0x2ec   :  { %v2959_v22 = vmax.bf16 %v4082_v11, %v2895_v33  ;;  %v2961_v30 = vmax.bf16 %v4082_v11, %v2897_v45 }
 0x2ee   :  { %3060 = vmatprep.subr.bf16.mxu0 %v2959_v22  ;;  %3133 = vmatprep.subr.bf16.mxu1 %v2961_v30 }
 0x2ef   :  { %3061 = vmatpush1.bf16.msra.mxu0 %v2958_v32  ;;  %3134 = vmatpush1.bf16.msra.mxu1 %v2960_v61 }
 0x2f2   :  { %3079 = vmatmul.mubr.bf16.vlgmr.msra.gmra.mrb[192].mxu0 %v6786_v35  ;;  %3152 = vmatmul.mubr.bf16.vlgmr.msra.gmra.mrb[192].mxu1 %v6786_v35 }
 0x2f3   :  { %3088 = vmatprep.mubr.bf16.mxu0 %v4082_v11  ;;  %3161 = vmatprep.mubr.bf16.mxu1 %v4082_v11 }
 0x2fa   :  { %3089 = vmatmul.mubr.bf16.gmra.mrb[196].mxu0 %v6797_v48  ;;  %3162 = vmatmul.mubr.bf16.gmra.mrb[196].mxu1 %v6797_v48 }
 0x2fb   :  { %3098 = vmatprep.mubr.bf16.mxu0 %v4082_v11  ;;  %3171 = vmatprep.mubr.bf16.mxu1 %v4082_v11 }
 0x302   :  { %3099 = vmatmul.mubr.bf16.gmra.mrb[200].mxu0 %v6806_v50  ;;  %3172 = vmatmul.mubr.bf16.gmra.mrb[200].mxu1 %v6806_v50 }
 0x303   :  { %3108 = vmatprep.mubr.bf16.mxu0 %v4082_v11  ;;  %3181 = vmatprep.mubr.bf16.mxu1 %v4082_v11 }
 0x30a   :  { %3109 = vmatmul.mubr.bf16.gmra.mrb[204].mxu0 %v6815_v6  ;;  %3182 = vmatmul.mubr.bf16.gmra.mrb[204].mxu1 %v6815_v6 }
 0x30b   :  { %3224 = vmatprep.mubr.bf16.mxu0 %v4082_v11  ;;  %3297 = vmatprep.mubr.bf16.mxu1 %v4082_v11 }
 0x32c   :  { %v2646_v25 = vpop.f32.mrb[160].mxu0  ;;  %v2759_v23 = vpop.f32.mrb[160].mxu1 }
 0x32d   :  { %v2648_v59 = vpop.f32.mrb[161].mxu0  ;;  %v2647_v47 = vadd.f32 %v2646_v25, %v6657_v58  ;;  %v2761_v1 = vpop.f32.mrb[161].mxu1  ;;  %v2760_v60 = vadd.f32 %v2759_v23, %v6657_v58 }
 0x32e   :  { %v2650_v16 = vpop.f32.mrb[162].mxu0  ;;  %v2649_v14 = vadd.f32 %v2648_v59, %v6657_v58  ;;  %v2763_v4 = vpop.f32.mrb[162].mxu1  ;;  %v2762_v18 = vadd.f32 %v2761_v1, %v6657_v58 }
 0x32f   :  { %v2651_v49 = vadd.f32 %v2650_v16, %v6659_v24  ;;  %v2652_v51 = vpop.f32.mrb[163].mxu0  ;;  %v2764_v28 = vadd.f32 %v2763_v4, %v6659_v24  ;;  %v2765_v57 = vpop.f32.mrb[163].mxu1 }
 0x330   :  { %v2653_v36 = vadd.f32 %v2652_v51, %v6659_v24  ;;  %v2766_v31 = vadd.f32 %v2765_v57, %v6659_v24 }
 0x331   :  { %v2842_v19 = vpack.c.bf16 %v2651_v49, %v2647_v47  ;;  %v2844_v26 = vpack.c.bf16 %v2764_v28, %v2760_v60 }
 0x332   :  { %v2843_v17 = vpack.c.bf16 %v2653_v36, %v2649_v14  ;;  %v2845_v54 = vpack.c.bf16 %v2766_v31, %v2762_v18 }
 0x333   :  { %v2906_v52 = vmax.bf16 %v4082_v11, %v2842_v19  ;;  %v2908_v24 = vmax.bf16 %v4082_v11, %v2844_v26 }
 0x334   :  { %v2656_v9 = vpop.f32.mrb[164].mxu0  ;;  %v2907_v44 = vmax.bf16 %v4082_v11, %v2843_v17  ;;  %v2769_v21 = vpop.f32.mrb[164].mxu1  ;;  %v2909_v29 = vmax.bf16 %v4082_v11, %v2845_v54 }
 0x335   :  { %v2658_v12 = vpop.f32.mrb[165].mxu0  ;;  %v2657_v62 = vadd.f32 %v2656_v9, %v6670_v41  ;;  %v2771_v27 = vpop.f32.mrb[165].mxu1  ;;  %v2770_v0 = vadd.f32 %v2769_v21, %v6670_v41 }
 0x336   :  { %v2660_v56 = vpop.f32.mrb[166].mxu0  ;;  %3192 = vmatprep.subr.bf16.mxu0 %v2907_v44  ;;  %v2659_v42 = vadd.f32 %v2658_v12, %v6670_v41  ;;  %v2773_v5 = vpop.f32.mrb[166].mxu1  ;;  %3265 = vmatprep.subr.bf16.mxu1 %v2909_v29  ;;  %v2772_v45 = vadd.f32 %v2771_v27, %v6670_v41 }
 0x337   :  { %v2661_v8 = vadd.f32 %v2660_v56, %v6673_v55  ;;  %v2662_v58 = vpop.f32.mrb[167].mxu0  ;;  %3193 = vmatpush1.bf16.msra.mxu0 %v2906_v52  ;;  %v2774_v34 = vadd.f32 %v2773_v5, %v6673_v55  ;;  %v2775_v32 = vpop.f32.mrb[167].mxu1  ;;  %3266 = vmatpush1.bf16.msra.mxu1 %v2908_v24 }
 0x338   :  { %v2663_v33 = vadd.f32 %v2662_v58, %v6673_v55  ;;  %v2776_v30 = vadd.f32 %v2775_v32, %v6673_v55 }
 0x339   :  { %v2850_v13 = vpack.c.bf16 %v2661_v8, %v2657_v62  ;;  %v2852_v61 = vpack.c.bf16 %v2774_v34, %v2770_v0 }
 0x33a   :  { %v2851_v22 = vpack.c.bf16 %v2663_v33, %v2659_v42  ;;  %v2853_v47 = vpack.c.bf16 %v2776_v30, %v2772_v45 }
 0x33b   :  { %v2914_v16 = vmax.bf16 %v4082_v11, %v2850_v13  ;;  %v2916_v55 = vmax.bf16 %v4082_v11, %v2852_v61 }
 0x33c   :  { %v2666_v25 = vpop.f32.mrb[168].mxu0  ;;  %v2915_v59 = vmax.bf16 %v4082_v11, %v2851_v22  ;;  %v2779_v14 = vpop.f32.mrb[168].mxu1  ;;  %v2917_v36 = vmax.bf16 %v4082_v11, %v2853_v47 }
 0x33d   :  { %v2668_v23 = vpop.f32.mrb[169].mxu0  ;;  %v2667_v51 = vadd.f32 %v2666_v25, %v6686_v37  ;;  %v2781_v4 = vpop.f32.mrb[169].mxu1  ;;  %v2780_v57 = vadd.f32 %v2779_v14, %v6686_v37 }
 0x33e   :  { %v2670_v49 = vpop.f32.mrb[170].mxu0  ;;  %3194 = vmatprep.subr.bf16.mxu0 %v2915_v59  ;;  %v2669_v19 = vadd.f32 %v2668_v23, %v6686_v37  ;;  %v2783_v17 = vpop.f32.mrb[170].mxu1  ;;  %3267 = vmatprep.subr.bf16.mxu1 %v2917_v36  ;;  %v2782_v9 = vadd.f32 %v2781_v4, %v6686_v37 }
 0x33f   :  { %v2671_v1 = vadd.f32 %v2670_v49, %v6689_v40  ;;  %v2672_v41 = vpop.f32.mrb[171].mxu0  ;;  %3195 = vmatpush1.bf16.msra.mxu0 %v2914_v16  ;;  %v2784_v18 = vadd.f32 %v2783_v17, %v6689_v40  ;;  %v2785_v26 = vpop.f32.mrb[171].mxu1  ;;  %3268 = vmatpush1.bf16.msra.mxu1 %v2916_v55 }
 0x340   :  { %v2673_v60 = vadd.f32 %v2672_v41, %v6689_v40  ;;  %v2786_v44 = vadd.f32 %v2785_v26, %v6689_v40 }
 0x341   :  { %v2858_v28 = vpack.c.bf16 %v2671_v1, %v2667_v51  ;;  %v2860_v52 = vpack.c.bf16 %v2784_v18, %v2780_v57 }
 0x342   :  { %v2859_v31 = vpack.c.bf16 %v2673_v60, %v2669_v19  ;;  %v2861_v62 = vpack.c.bf16 %v2786_v44, %v2782_v9 }
 0x343   :  { %v2922_v56 = vmax.bf16 %v4082_v11, %v2858_v28  ;;  %v2924_v40 = vmax.bf16 %v4082_v11, %v2860_v52 }
 0x344   :  { %v2676_v54 = vpop.f32.mrb[172].mxu0  ;;  %v2923_v12 = vmax.bf16 %v4082_v11, %v2859_v31  ;;  %v2789_v58 = vpop.f32.mrb[172].mxu1  ;;  %v2925_v42 = vmax.bf16 %v4082_v11, %v2861_v62 }
 0x345   :  { %v2678_v21 = vpop.f32.mrb[173].mxu0  ;;  %v2677_v29 = vadd.f32 %v2676_v54, %v6702_v46  ;;  %v2791_v33 = vpop.f32.mrb[173].mxu1  ;;  %v2790_v34 = vadd.f32 %v2789_v58, %v6702_v46 }
 0x346   :  { %v2680_v8 = vpop.f32.mrb[174].mxu0  ;;  %3196 = vmatprep.subr.bf16.mxu0 %v2923_v12  ;;  %v2679_v27 = vadd.f32 %v2678_v21, %v6702_v46  ;;  %v2793_v0 = vpop.f32.mrb[174].mxu1  ;;  %3269 = vmatprep.subr.bf16.mxu1 %v2925_v42  ;;  %v2792_v30 = vadd.f32 %v2791_v33, %v6702_v46 }
 0x347   :  { %v2681_v24 = vadd.f32 %v2680_v8, %v6705_v38  ;;  %v2682_v37 = vpop.f32.mrb[175].mxu0  ;;  %3197 = vmatpush1.bf16.msra.mxu0 %v2922_v56  ;;  %v2794_v22 = vadd.f32 %v2793_v0, %v6705_v38  ;;  %v2795_v45 = vpop.f32.mrb[175].mxu1  ;;  %3270 = vmatpush1.bf16.msra.mxu1 %v2924_v40 }
 0x348   :  { %v2683_v13 = vadd.f32 %v2682_v37, %v6705_v38  ;;  %v2796_v61 = vadd.f32 %v2795_v45, %v6705_v38 }
 0x349   :  { %v2866_v5 = vpack.c.bf16 %v2681_v24, %v2677_v29  ;;  %v2868_v25 = vpack.c.bf16 %v2794_v22, %v2790_v34 }
 0x34a   :  { %v2867_v32 = vpack.c.bf16 %v2683_v13, %v2679_v27  ;;  %v2869_v23 = vpack.c.bf16 %v2796_v61, %v2792_v30 }
 0x34b   :  { %v2930_v47 = vmax.bf16 %v4082_v11, %v2866_v5  ;;  %v2932_v38 = vmax.bf16 %v4082_v11, %v2868_v25 }
 0x34c   :  { %v2686_v59 = vpop.f32.mrb[176].mxu0  ;;  %v2931_v16 = vmax.bf16 %v4082_v11, %v2867_v32  ;;  %v2799_v1 = vpop.f32.mrb[176].mxu1  ;;  %v2933_v41 = vmax.bf16 %v4082_v11, %v2869_v23 }
 0x34d   :  { %v2688_v49 = vpop.f32.mrb[177].mxu0  ;;  %v2687_v14 = vadd.f32 %v2686_v59, %v6718_v20  ;;  %v2801_v19 = vpop.f32.mrb[177].mxu1  ;;  %v2800_v17 = vadd.f32 %v2799_v1, %v6718_v20 }
 0x34e   :  { %v2690_v51 = vpop.f32.mrb[178].mxu0  ;;  %3198 = vmatprep.subr.bf16.mxu0 %v2931_v16  ;;  %v2689_v55 = vadd.f32 %v2688_v49, %v6718_v20  ;;  %v2803_v28 = vpop.f32.mrb[178].mxu1  ;;  %3271 = vmatprep.subr.bf16.mxu1 %v2933_v41  ;;  %v2802_v26 = vadd.f32 %v2801_v19, %v6718_v20 }
 0x34f   :  { %v2691_v36 = vadd.f32 %v2690_v51, %v6721_v43  ;;  %v2692_v46 = vpop.f32.mrb[179].mxu0  ;;  %3199 = vmatpush1.bf16.msra.mxu0 %v2930_v47  ;;  %v2804_v57 = vadd.f32 %v2803_v28, %v6721_v43  ;;  %v2805_v31 = vpop.f32.mrb[179].mxu1  ;;  %3272 = vmatpush1.bf16.msra.mxu1 %v2932_v38 }
 0x350   :  { %v2693_v4 = vadd.f32 %v2692_v46, %v6721_v43  ;;  %v2806_v9 = vadd.f32 %v2805_v31, %v6721_v43 }
 0x351   :  { %v2874_v60 = vpack.c.bf16 %v2691_v36, %v2687_v14  ;;  %v2876_v44 = vpack.c.bf16 %v2804_v57, %v2800_v17 }
 0x352   :  { %v2875_v18 = vpack.c.bf16 %v2693_v4, %v2689_v55  ;;  %v2877_v56 = vpack.c.bf16 %v2806_v9, %v2802_v26 }
 0x353   :  { %v2938_v12 = vmax.bf16 %v4082_v11, %v2874_v60  ;;  %v2940_v43 = vmax.bf16 %v4082_v11, %v2876_v44 }
 0x354   :  { %v2696_v52 = vpop.f32.mrb[180].mxu0  ;;  %v2939_v54 = vmax.bf16 %v4082_v11, %v2875_v18  ;;  %v2809_v29 = vpop.f32.mrb[180].mxu1  ;;  %v2941_v24 = vmax.bf16 %v4082_v11, %v2877_v56 }
 0x355   :  { %v2698_v62 = vpop.f32.mrb[181].mxu0  ;;  %v2697_v8 = vadd.f32 %v2696_v52, %v6734_v63  ;;  %v2811_v37 = vpop.f32.mrb[181].mxu1  ;;  %v2810_v13 = vadd.f32 %v2809_v29, %v6734_v63 }
 0x356   :  { %v2700_v21 = vpop.f32.mrb[182].mxu0  ;;  %3200 = vmatprep.subr.bf16.mxu0 %v2939_v54  ;;  %v2699_v42 = vadd.f32 %v2698_v62, %v6734_v63  ;;  %v2813_v33 = vpop.f32.mrb[182].mxu1  ;;  %3273 = vmatprep.subr.bf16.mxu1 %v2941_v24  ;;  %v2812_v22 = vadd.f32 %v2811_v37, %v6734_v63 }
 0x357   :  { %v2701_v58 = vadd.f32 %v2700_v21, %v6737_v53  ;;  %v2702_v20 = vpop.f32.mrb[183].mxu0  ;;  %3201 = vmatpush1.bf16.msra.mxu0 %v2938_v12  ;;  %v2814_v5 = vadd.f32 %v2813_v33, %v6737_v53  ;;  %v2815_v34 = vpop.f32.mrb[183].mxu1  ;;  %3274 = vmatpush1.bf16.msra.mxu1 %v2940_v43 }
 0x358   :  { %v2703_v40 = vadd.f32 %v2702_v20, %v6737_v53  ;;  %v2816_v32 = vadd.f32 %v2815_v34, %v6737_v53 }
 0x359   :  { %v2882_v27 = vpack.c.bf16 %v2701_v58, %v2697_v8  ;;  %v2884_v45 = vpack.c.bf16 %v2814_v5, %v2810_v13 }
 0x35a   :  { %v2883_v0 = vpack.c.bf16 %v2703_v40, %v2699_v42  ;;  %v2885_v59 = vpack.c.bf16 %v2816_v32, %v2812_v22 }
 0x35b   :  { %v2946_v25 = vmax.bf16 %v4082_v11, %v2882_v27  ;;  %v2948_v53 = vmax.bf16 %v4082_v11, %v2884_v45 }
 0x35c   :  { %v2706_v30 = vpop.f32.mrb[184].mxu0  ;;  %v2947_v61 = vmax.bf16 %v4082_v11, %v2883_v0  ;;  %v2819_v49 = vpop.f32.mrb[184].mxu1  ;;  %v2949_v14 = vmax.bf16 %v4082_v11, %v2885_v59 }
 0x35d   :  { %v2708_v16 = vpop.f32.mrb[185].mxu0  ;;  %v2707_v23 = vadd.f32 %v2706_v30, %v6750_v39  ;;  %v2821_v36 = vpop.f32.mrb[185].mxu1  ;;  %v2820_v55 = vadd.f32 %v2819_v49, %v6750_v39 }
 0x35e   :  { %v2710_v47 = vpop.f32.mrb[186].mxu0  ;;  %3202 = vmatprep.subr.bf16.mxu0 %v2947_v61  ;;  %v2709_v1 = vadd.f32 %v2708_v16, %v6750_v39  ;;  %v2823_v38 = vpop.f32.mrb[186].mxu1  ;;  %3275 = vmatprep.subr.bf16.mxu1 %v2949_v14  ;;  %v2822_v28 = vadd.f32 %v2821_v36, %v6750_v39 }
 0x35f   :  { %v2711_v51 = vadd.f32 %v2710_v47, %v6753_v15  ;;  %v2712_v63 = vpop.f32.mrb[187].mxu0  ;;  %3203 = vmatpush1.bf16.msra.mxu0 %v2946_v25  ;;  %v2824_v19 = vadd.f32 %v2823_v38, %v6753_v15  ;;  %v2825_v60 = vpop.f32.mrb[187].mxu1  ;;  %3276 = vmatpush1.bf16.msra.mxu1 %v2948_v53 }
 0x360   :  { %v2713_v41 = vadd.f32 %v2712_v63, %v6753_v15  ;;  %v2826_v17 = vadd.f32 %v2825_v60, %v6753_v15 }
 0x361   :  { %v2890_v46 = vpack.c.bf16 %v2711_v51, %v2707_v23  ;;  %v2892_v57 = vpack.c.bf16 %v2824_v19, %v2820_v55 }
 0x362   :  { %v2891_v4 = vpack.c.bf16 %v2713_v41, %v2709_v1  ;;  %v2893_v9 = vpack.c.bf16 %v2826_v17, %v2822_v28 }
 0x363   :  { %v2954_v26 = vmax.bf16 %v4082_v11, %v2890_v46  ;;  %v2956_v15 = vmax.bf16 %v4082_v11, %v2892_v57 }
 0x364   :  { %v2716_v18 = vpop.f32.mrb[188].mxu0  ;;  %v2955_v31 = vmax.bf16 %v4082_v11, %v2891_v4  ;;  %v2829_v12 = vpop.f32.mrb[188].mxu1  ;;  %v2957_v62 = vmax.bf16 %v4082_v11, %v2893_v9 }
 0x365   :  { %v2718_v44 = vpop.f32.mrb[189].mxu0  ;;  %v2717_v54 = vadd.f32 %v2716_v18, %v6766_v7  ;;  %v2831_v8 = vpop.f32.mrb[189].mxu1  ;;  %v2830_v20 = vadd.f32 %v2829_v12, %v6766_v7 }
 0x366   :  { %v2720_v52 = vpop.f32.mrb[190].mxu0  ;;  %3204 = vmatprep.subr.bf16.mxu0 %v2955_v31  ;;  %v2719_v21 = vadd.f32 %v2718_v44, %v6766_v7  ;;  %v2833_v24 = vpop.f32.mrb[190].mxu1  ;;  %3277 = vmatprep.subr.bf16.mxu1 %v2957_v62  ;;  %v2832_v40 = vadd.f32 %v2831_v8, %v6766_v7 }
 0x367   :  { %v2721_v56 = vadd.f32 %v2720_v52, %v6769_v2  ;;  %v2722_v39 = vpop.f32.mrb[191].mxu0  ;;  %3205 = vmatpush1.bf16.msra.mxu0 %v2954_v26  ;;  %v2834_v43 = vadd.f32 %v2833_v24, %v6769_v2  ;;  %v2835_v37 = vpop.f32.mrb[191].mxu1  ;;  %3278 = vmatpush1.bf16.msra.mxu1 %v2956_v15 }
 0x368   :  { %v2723_v29 = vadd.f32 %v2722_v39, %v6769_v2  ;;  %v2836_v27 = vadd.f32 %v2835_v37, %v6769_v2  ;;  %v6931_v7 = vpop.permute.xlu0 %2984  ;;  %v6933_v2 = vpop.permute.xlu1 %2989 }
 0x369   :  { %v2898_v58 = vpack.c.bf16 %v2721_v56, %v2717_v54  ;;  %v2900_v33 = vpack.c.bf16 %v2834_v43, %v2830_v20 }
 0x36a   :  { %v2899_v42 = vpack.c.bf16 %v2723_v29, %v2719_v21  ;;  %v2901_v0 = vpack.c.bf16 %v2836_v27, %v2832_v40 }
 0x36b   :  { %v2962_v5 = vmax.bf16 %v4082_v11, %v2898_v58  ;;  %v2964_v22 = vmax.bf16 %v4082_v11, %v2900_v33 }
 0x36c   :  { %v2963_v13 = vmax.bf16 %v4082_v11, %v2899_v42  ;;  %v2965_v34 = vmax.bf16 %v4082_v11, %v2901_v0 }
 0x36e   :  { %3206 = vmatprep.subr.bf16.mxu0 %v2963_v13  ;;  %3279 = vmatprep.subr.bf16.mxu1 %v2965_v34 }
 0x36f   :  { %3207 = vmatpush1.bf16.msra.mxu0 %v2962_v5  ;;  %3280 = vmatpush1.bf16.msra.mxu1 %v2964_v22 }
 0x372   :  { %3225 = vmatmul.mubr.bf16.vlgmr.msra.gmra.mrb[208].mxu0 %v6786_v35  ;;  %3298 = vmatmul.mubr.bf16.vlgmr.msra.gmra.mrb[208].mxu1 %v6786_v35  ;;  %v6935_v35 = vpop.permute.xlu0 %2994 }
 0x373   :  { %3234 = vmatprep.mubr.bf16.mxu0 %v4082_v11  ;;  %3307 = vmatprep.mubr.bf16.mxu1 %v4082_v11 }
 0x376   :  { %v6939_v32 = vpop.permute.xlu0 %3412 }
 0x37a   :  { %3235 = vmatmul.mubr.bf16.gmra.mrb[212].mxu0 %v6797_v48  ;;  %3308 = vmatmul.mubr.bf16.gmra.mrb[212].mxu1 %v6797_v48  ;;  %v6937_v48 = vpop.permute.xlu1 %2999  ;;  %v6944_v61 = vpop.permute.xlu0 %3004 }
 0x37b   :  { %3244 = vmatprep.mubr.bf16.mxu0 %v4082_v11  ;;  %3317 = vmatprep.mubr.bf16.mxu1 %v4082_v11 }
 0x37e   :  { %v6941_v45 = vpop.permute.xlu1 %3417  ;;  %v6959_v9 = vpop.permute.xlu0 %3009 }
 0x382   :  { %3245 = vmatmul.mubr.bf16.gmra.mrb[216].mxu0 %v6806_v50  ;;  %3318 = vmatmul.mubr.bf16.gmra.mrb[216].mxu1 %v6806_v50  ;;  %v6948_v49 = vpop.permute.xlu1 %3422 }
 0x383   :  { %3254 = vmatprep.mubr.bf16.mxu0 %v4082_v11  ;;  %3327 = vmatprep.mubr.bf16.mxu1 %v4082_v11 }
 0x386   :  { %v6962_v56 = vpop.permute.xlu1 %3427 }
 0x38a   :  { %3255 = vmatmul.mubr.bf16.gmra.mrb[220].mxu0 %v6815_v6  ;;  %3328 = vmatmul.mubr.bf16.gmra.mrb[220].mxu1 %v6815_v6 }
 0x3c5   :  { %v3080_v30 = vpop.f32.mrb[192].mxu0  ;;  %v3153_v16 = vpop.f32.mrb[192].mxu1 }
 0x3c6   :  { %v3081_v50 = vadd.f32 %v3080_v30, %v6931_v7  ;;  %v3082_v11 = vpop.f32.mrb[193].mxu0  ;;  %v3154_v51 = vadd.f32 %v3153_v16, %v6931_v7  ;;  %v3155_v63 = vpop.f32.mrb[193].mxu1 }
 0x3c7   :  { %v3083_v6 = vadd.f32 %v3082_v11, %v6931_v7  ;;  %v3084_v25 = vpop.f32.mrb[194].mxu0  ;;  %v3156_v1 = vadd.f32 %v3155_v63, %v6931_v7  ;;  %v3157_v41 = vpop.f32.mrb[194].mxu1 }
 0x3c8   :  { %v3338_v59 = vmax.f32 %v3081_v50, 0.0  ;;  %v3085_v47 = vadd.f32 %v3084_v25, %v6933_v2  ;;  %v3086_v23 = vpop.f32.mrb[195].mxu0  ;;  %v3340_v46 = vmax.f32 %v3154_v51, 0.0  ;;  %v3158_v38 = vadd.f32 %v3157_v41, %v6933_v2  ;;  %v3159_v19 = vpop.f32.mrb[195].mxu1 }
 0x3c9   :  { %v3339_v14 = vmax.f32 %v3083_v6, 0.0  ;;  %v3087_v53 = vadd.f32 %v3086_v23, %v6933_v2  ;;  %v3341_v60 = vmax.f32 %v3156_v1, 0.0  ;;  %v3160_v17 = vadd.f32 %v3159_v19, %v6933_v2  ;;  %v6976_v16 = vpop.permute.xlu0 %3014  ;;  %v6980_v63 = vpop.permute.xlu1 %3432 }
 0x3ca   :  { %v3346_v36 = vmax.f32 %v3085_v47, 0.0  ;;  %v3450_v4 = vmul.f32 %v6939_v32, %v3338_v59  ;;  %v3348_v18 = vmax.f32 %v3158_v38, 0.0  ;;  %v3452_v62 = vmul.f32 %v6939_v32, %v3340_v46 }
 0x3cb   :  { %v3347_v55 = vmax.f32 %v3087_v53, 0.0  ;;  %v3451_v57 = vmul.f32 %v6939_v32, %v3339_v14  ;;  %v3349_v52 = vmax.f32 %v3160_v17, 0.0  ;;  %v3453_v29 = vmul.f32 %v6939_v32, %v3341_v60 }
 0x3cc   :  { %v3458_v28 = vmul.f32 %v6941_v45, %v3346_v36  ;;  %v3460_v39 = vmul.f32 %v6941_v45, %v3348_v18 }
 0x3cd   :  { %v3459_v31 = vmul.f32 %v6941_v45, %v3347_v55  ;;  %v3090_v26 = vpop.f32.mrb[196].mxu0  ;;  %v3461_v58 = vmul.f32 %v6941_v45, %v3349_v52  ;;  %v3163_v20 = vpop.f32.mrb[196].mxu1 }
 0x3ce   :  { %v3514_v44 = vadd.f32 %v3458_v28, %v3450_v4  ;;  %v3091_v54 = vadd.f32 %v3090_v26, %v6935_v35  ;;  %v3092_v12 = vpop.f32.mrb[197].mxu0  ;;  %v3540_v37 = vadd.f32 %v3460_v39, %v3452_v62  ;;  %v3164_v40 = vadd.f32 %v3163_v20, %v6935_v35  ;;  %v3165_v33 = vpop.f32.mrb[197].mxu1 }
 0x3cf   :  { %v3527_v15 = vadd.f32 %v3459_v31, %v3451_v57  ;;  %v3093_v21 = vadd.f32 %v3092_v12, %v6935_v35  ;;  %v3094_v8 = vpop.f32.mrb[198].mxu0  ;;  %v3553_v5 = vadd.f32 %v3461_v58, %v3453_v29  ;;  %v3166_v34 = vadd.f32 %v3165_v33, %v6935_v35  ;;  %v3167_v30 = vpop.f32.mrb[198].mxu1 }
 0x3d0   :  { %v3354_v24 = vmax.f32 %v3091_v54, 0.0  ;;  %v3095_v43 = vadd.f32 %v3094_v8, %v6937_v48  ;;  %v3096_v42 = vpop.f32.mrb[199].mxu0  ;;  %v3356_v50 = vmax.f32 %v3164_v40, 0.0  ;;  %v3168_v6 = vadd.f32 %v3167_v30, %v6937_v48  ;;  %v3169_v59 = vpop.f32.mrb[199].mxu1 }
 0x3d1   :  { %v3355_v27 = vmax.f32 %v3093_v21, 0.0  ;;  %v3097_v13 = vadd.f32 %v3096_v42, %v6937_v48  ;;  %v3357_v23 = vmax.f32 %v3166_v34, 0.0  ;;  %v3170_v14 = vadd.f32 %v3169_v59, %v6937_v48  ;;  %v6992_v58 = vpop.permute.xlu0 %3019  ;;  %v6996_v40 = vpop.permute.xlu1 %3437 }
 0x3d2   :  { %v3466_v0 = vmul.f32 %v6948_v49, %v3354_v24  ;;  %v3362_v22 = vmax.f32 %v3095_v43, 0.0  ;;  %v3468_v53 = vmul.f32 %v6948_v49, %v3356_v50  ;;  %v3364_v36 = vmax.f32 %v3168_v6, 0.0 }
 0x3d3   :  { %v3467_v11 = vmul.f32 %v6948_v49, %v3355_v27  ;;  %v3363_v25 = vmax.f32 %v3097_v13, 0.0  ;;  %v3469_v38 = vmul.f32 %v6948_v49, %v3357_v23  ;;  %v3365_v19 = vmax.f32 %v3170_v14, 0.0 }
 0x3d4   :  { %v3515_v47 = vadd.f32 %v3514_v44, %v3466_v0  ;;  %v3474_v51 = vmul.f32 %v6962_v56, %v3362_v22  ;;  %v3541_v28 = vadd.f32 %v3540_v37, %v3468_v53  ;;  %v3476_v17 = vmul.f32 %v6962_v56, %v3364_v36 }
 0x3d5   :  { %v3528_v1 = vadd.f32 %v3527_v15, %v3467_v11  ;;  %v3475_v41 = vmul.f32 %v6962_v56, %v3363_v25  ;;  %v3100_v46 = vpop.f32.mrb[200].mxu0  ;;  %v3554_v26 = vadd.f32 %v3553_v5, %v3469_v38  ;;  %v3477_v44 = vmul.f32 %v6962_v56, %v3365_v19  ;;  %v3173_v54 = vpop.f32.mrb[200].mxu1 }
 0x3d6   :  { %v3516_v55 = vadd.f32 %v3515_v47, %v3474_v51  ;;  %v3101_v4 = vadd.f32 %v3100_v46, %v6944_v61  ;;  %v3102_v60 = vpop.f32.mrb[201].mxu0  ;;  %v3542_v39 = vadd.f32 %v3541_v28, %v3476_v17  ;;  %v3174_v15 = vadd.f32 %v3173_v54, %v6944_v61  ;;  %v3175_v8 = vpop.f32.mrb[201].mxu1 }
 0x3d7   :  { %v3529_v57 = vadd.f32 %v3528_v1, %v3475_v41  ;;  %v3103_v18 = vadd.f32 %v3102_v60, %v6944_v61  ;;  %v3104_v31 = vpop.f32.mrb[202].mxu0  ;;  %v3555_v24 = vadd.f32 %v3554_v26, %v3477_v44  ;;  %v3176_v43 = vadd.f32 %v3175_v8, %v6944_v61  ;;  %v3177_v37 = vpop.f32.mrb[202].mxu1 }
 0x3d8   :  { %v3370_v52 = vmax.f32 %v3101_v4, 0.0  ;;  %v3105_v12 = vadd.f32 %v3104_v31, %v6959_v9  ;;  %v3106_v62 = vpop.f32.mrb[203].mxu0  ;;  %v3372_v27 = vmax.f32 %v3174_v15, 0.0  ;;  %v3178_v13 = vadd.f32 %v3177_v37, %v6959_v9  ;;  %v3179_v0 = vpop.f32.mrb[203].mxu1 }
 0x3d9   :  { %v3371_v21 = vmax.f32 %v3103_v18, 0.0  ;;  %v3107_v29 = vadd.f32 %v3106_v62, %v6959_v9  ;;  %v3373_v22 = vmax.f32 %v3176_v43, 0.0  ;;  %v3180_v50 = vadd.f32 %v3179_v0, %v6959_v9  ;;  %v7010_v18 = vpop.permute.xlu0 %3442  ;;  %v7016_v8 = vpop.permute.xlu1 %3447 }
 0x3da   :  { %v3482_v20 = vmul.f32 %v6980_v63, %v3370_v52  ;;  %v3378_v42 = vmax.f32 %v3105_v12, 0.0  ;;  %v3484_v11 = vmul.f32 %v6980_v63, %v3372_v27  ;;  %v3380_v25 = vmax.f32 %v3178_v13, 0.0 }
 0x3db   :  { %v3483_v33 = vmul.f32 %v6980_v63, %v3371_v21  ;;  %v3379_v5 = vmax.f32 %v3107_v29, 0.0  ;;  %v3485_v23 = vmul.f32 %v6980_v63, %v3373_v22  ;;  %v3381_v14 = vmax.f32 %v3180_v50, 0.0 }
 0x3dc   :  { %v3517_v34 = vadd.f32 %v3516_v55, %v3482_v20  ;;  %v3490_v30 = vmul.f32 %v6996_v40, %v3378_v42  ;;  %v3543_v36 = vadd.f32 %v3542_v39, %v3484_v11  ;;  %v3492_v41 = vmul.f32 %v6996_v40, %v3380_v25 }
 0x3dd   :  { %v3530_v6 = vadd.f32 %v3529_v57, %v3483_v33  ;;  %v3491_v59 = vmul.f32 %v6996_v40, %v3379_v5  ;;  %v3110_v47 = vpop.f32.mrb[204].mxu0  ;;  %v3556_v19 = vadd.f32 %v3555_v24, %v3485_v23  ;;  %v3493_v4 = vmul.f32 %v6996_v40, %v3381_v14  ;;  %v3183_v28 = vpop.f32.mrb[204].mxu1 }
 0x3de   :  { %v3518_v51 = vadd.f32 %v3517_v34, %v3490_v30  ;;  %v3111_v53 = vadd.f32 %v3110_v47, %v6976_v16  ;;  %v3112_v1 = vpop.f32.mrb[205].mxu0  ;;  %v3544_v31 = vadd.f32 %v3543_v36, %v3492_v41  ;;  %v3184_v26 = vadd.f32 %v3183_v28, %v6976_v16  ;;  %v3185_v52 = vpop.f32.mrb[205].mxu1 }
 0x3df   :  { %v3531_v46 = vadd.f32 %v3530_v6, %v3491_v59  ;;  %v3113_v38 = vadd.f32 %v3112_v1, %v6976_v16  ;;  %v3114_v55 = vpop.f32.mrb[206].mxu0  ;;  %v3557_v12 = vadd.f32 %v3556_v19, %v3493_v4  ;;  %v3186_v39 = vadd.f32 %v3185_v52, %v6976_v16  ;;  %v3187_v21 = vpop.f32.mrb[206].mxu1 }
 0x3e0   :  { %v3386_v60 = vmax.f32 %v3111_v53, 0.0  ;;  %v3115_v17 = vadd.f32 %v3114_v55, %v6992_v58  ;;  %v3116_v57 = vpop.f32.mrb[207].mxu0  ;;  %v3388_v29 = vmax.f32 %v3184_v26, 0.0  ;;  %v3188_v20 = vadd.f32 %v3187_v21, %v6992_v58  ;;  %v3189_v42 = vpop.f32.mrb[207].mxu1 }
 0x3e1   :  { %v3387_v44 = vmax.f32 %v3113_v38, 0.0  ;;  %v3117_v54 = vadd.f32 %v3116_v57, %v6992_v58  ;;  %v3389_v27 = vmax.f32 %v3186_v39, 0.0  ;;  %v3190_v13 = vadd.f32 %v3189_v42, %v6992_v58 }
 0x3e2   :  { %v3498_v62 = vmul.f32 %v7010_v18, %v3386_v60  ;;  %v3394_v15 = vmax.f32 %v3115_v17, 0.0  ;;  %v3500_v5 = vmul.f32 %v7010_v18, %v3388_v29  ;;  %v3396_v34 = vmax.f32 %v3188_v20, 0.0 }
 0x3e3   :  { %v3499_v24 = vmul.f32 %v7010_v18, %v3387_v44  ;;  %v3395_v43 = vmax.f32 %v3117_v54, 0.0  ;;  %v3501_v30 = vmul.f32 %v7010_v18, %v3389_v27  ;;  %v3397_v11 = vmax.f32 %v3190_v13, 0.0 }
 0x3e4   :  { %v3519_v37 = vadd.f32 %v3518_v51, %v3498_v62  ;;  %v3506_v33 = vmul.f32 %v7016_v8, %v3394_v15  ;;  %v3545_v6 = vadd.f32 %v3544_v31, %v3500_v5  ;;  %v3508_v25 = vmul.f32 %v7016_v8, %v3396_v34  ;;  %v3622_v31 = vpop.permute.xlu0 %3621 }
 0x3e5   :  { %v3532_v0 = vadd.f32 %v3531_v46, %v3499_v24  ;;  %v3507_v22 = vmul.f32 %v7016_v8, %v3395_v43  ;;  %v3558_v47 = vadd.f32 %v3557_v12, %v3501_v30  ;;  %v3509_v51 = vmul.f32 %v7016_v8, %v3397_v11 }
 0x3e6   :  { %v3520_v50 = vadd.f32 %v3519_v37, %v3506_v33  ;;  %v3546_v14 = vadd.f32 %v3545_v6, %v3508_v25  ;;  %v4084_v17 = vmov 1966171168   ;;  %v7028_v39 = vrot.slane %v3622_v31, %v4165_v10 }
 0x3e7   :  { %v3533_v59 = vadd.f32 %v3532_v0, %v3507_v22  ;;  %v3559_v36 = vadd.f32 %v3558_v47, %v3509_v51  ;;  %v3649_v57 = vunpack.c.l.s4 %v4084_v17 }
 0x3e8   :  { %v3521_v23 = vrot.slane %v3520_v50, 4  ;;  %v3547_v41 = vrot.slane %v3546_v14, 4 }
 0x3e9   :  { %v3534_v53 = vrot.slane %v3533_v59, 4  ;;  %v3560_v55 = vrot.slane %v3559_v36, 4  ;;  %v3650_v29 = vunpack.c.0.s8 %v3649_v57 }
 0x3ea   :  { %v3522_v1 = vadd.f32 %v3521_v23, %v3520_v50  ;;  %v3548_v19 = vadd.f32 %v3547_v41, %v3546_v14 }
 0x3eb   :  { %v3535_v46 = vadd.f32 %v3534_v53, %v3533_v59  ;;  %v3561_v28 = vadd.f32 %v3560_v55, %v3559_v36  ;;  %v7033_v13 = vsub.s32 %v3650_v29, %v4147_v3 }
 0x3ec   :  { %v3523_v38 = vrot.slane %v3522_v1, 2  ;;  %v3549_v26 = vrot.slane %v3548_v19, 2 }
 0x3ed   :  { %v3536_v4 = vrot.slane %v3535_v46, 2  ;;  %v3562_v54 = vrot.slane %v3561_v28, 2 }
 0x3ee   :  { %v3524_v60 = vadd.f32 %v3523_v38, %v3522_v1  ;;  %v3550_v12 = vadd.f32 %v3549_v26, %v3548_v19 }
 0x3ef   :  { %v3537_v44 = vadd.f32 %v3536_v4, %v3535_v46  ;;  %v3563_v21 = vadd.f32 %v3562_v54, %v3561_v28 }
 0x3f0   :  { %v3525_v52 = vrot.slane %v3524_v60, 1  ;;  %v3551_v24 = vrot.slane %v3550_v12, 1 }
 0x3f1   :  { %v3538_v62 = vrot.slane %v3537_v44, 1  ;;  %v3564_v43 = vrot.slane %v3563_v21, 1 }
 0x3f2   :  { %v3526_v15 = vadd.f32 %v3525_v52, %v3524_v60  ;;  %v3552_v37 = vadd.f32 %v3551_v24, %v3550_v12 }
 0x3f3   :  { %v3539_v20 = vadd.f32 %v3538_v62, %v3537_v44  ;;  %v3565_v33 = vadd.f32 %v3564_v43, %v3563_v21 }
 0x3f4   :  { %v3628_v42 = vadd.f32 %v7028_v39, %v3526_v15  ;;  %v3630_v5 = vadd.f32 %v7028_v39, %v3552_v37 }
 0x3f5   :  { %v3629_v27 = vadd.f32 %v7028_v39, %v3539_v20  ;;  %v3631_v10 = vadd.f32 %v7028_v39, %v3565_v33 }
 0x3f7   :  { %v3644_v0 = vcombine.low %v3628_v42, %v3629_v27  ;;  %v3645_v34 = vcombine.low %v3630_v5, %v3631_v10 }
 0x3f9   :  { %v7038_v22 = vrot.slane %v3644_v0, %v7033_v13  ;;  %v7041_v30 = vrot.slane %v3645_v34, %v7033_v13 }
 0x3fb   :  { %v3676_v50 = vcombine.low %v7038_v22, %v7041_v30 }
 0x445   :  { %v3226_v11 = vpop.f32.mrb[208].mxu0  ;;  %v3299_v23 = vpop.f32.mrb[208].mxu1 }
 0x446   :  { %v3227_v6 = vadd.f32 %v3226_v11, %v6931_v7  ;;  %v3228_v3 = vpop.f32.mrb[209].mxu0  ;;  %v3300_v53 = vadd.f32 %v3299_v23, %v6931_v7  ;;  %v3301_v36 = vpop.f32.mrb[209].mxu1 }
 0x447   :  { %v3229_v25 = vadd.f32 %v3228_v3, %v6931_v7  ;;  %v3230_v59 = vpop.f32.mrb[210].mxu0  ;;  %v3302_v46 = vadd.f32 %v3301_v36, %v6931_v7  ;;  %v3303_v55 = vpop.f32.mrb[210].mxu1 }
 0x448   :  { %v3342_v47 = vmax.f32 %v3227_v6, 0.0  ;;  %v3231_v51 = vadd.f32 %v3230_v59, %v6933_v2  ;;  %v3232_v14 = vpop.f32.mrb[211].mxu0  ;;  %v3344_v19 = vmax.f32 %v3300_v53, 0.0  ;;  %v3304_v4 = vadd.f32 %v3303_v55, %v6933_v2  ;;  %v3305_v28 = vpop.f32.mrb[211].mxu1 }
 0x449   :  { %v3343_v1 = vmax.f32 %v3229_v25, 0.0  ;;  %v3233_v41 = vadd.f32 %v3232_v14, %v6933_v2  ;;  %v3345_v57 = vmax.f32 %v3302_v46, 0.0  ;;  %v3306_v26 = vadd.f32 %v3305_v28, %v6933_v2 }
 0x44a   :  { %v3350_v38 = vmax.f32 %v3231_v51, 0.0  ;;  %v3454_v17 = vmul.f32 %v6939_v32, %v3342_v47  ;;  %v3352_v52 = vmax.f32 %v3304_v4, 0.0  ;;  %v3456_v29 = vmul.f32 %v6939_v32, %v3344_v19 }
 0x44b   :  { %v3351_v60 = vmax.f32 %v3233_v41, 0.0  ;;  %v3455_v44 = vmul.f32 %v6939_v32, %v3343_v1  ;;  %v3353_v62 = vmax.f32 %v3306_v26, 0.0  ;;  %v3457_v2 = vmul.f32 %v6939_v32, %v3345_v57 }
 0x44c   :  { %v3462_v31 = vmul.f32 %v6941_v45, %v3350_v38  ;;  %v3464_v24 = vmul.f32 %v6941_v45, %v3352_v52 }
 0x44d   :  { %v3463_v54 = vmul.f32 %v6941_v45, %v3351_v60  ;;  %v3236_v7 = vpop.f32.mrb[212].mxu0  ;;  %v3465_v37 = vmul.f32 %v6941_v45, %v3353_v62  ;;  %v3309_v33 = vpop.f32.mrb[212].mxu1 }
 0x44e   :  { %v3566_v12 = vadd.f32 %v3462_v31, %v3454_v17  ;;  %v3237_v15 = vadd.f32 %v3236_v7, %v6935_v35  ;;  %v3238_v21 = vpop.f32.mrb[213].mxu0  ;;  %v3592_v10 = vadd.f32 %v3464_v24, %v3456_v29  ;;  %v3310_v34 = vadd.f32 %v3309_v33, %v6935_v35  ;;  %v3311_v6 = vpop.f32.mrb[213].mxu1 }
 0x44f   :  { %v3579_v20 = vadd.f32 %v3463_v54, %v3455_v44  ;;  %v3239_v43 = vadd.f32 %v3238_v21, %v6935_v35  ;;  %v3240_v42 = vpop.f32.mrb[214].mxu0  ;;  %v3605_v25 = vadd.f32 %v3465_v37, %v3457_v2  ;;  %v3312_v47 = vadd.f32 %v3311_v6, %v6935_v35  ;;  %v3313_v23 = vpop.f32.mrb[214].mxu1 }
 0x450   :  { %v3358_v27 = vmax.f32 %v3237_v15, 0.0  ;;  %v3241_v5 = vadd.f32 %v3240_v42, %v6937_v48  ;;  %v3242_v0 = vpop.f32.mrb[215].mxu0  ;;  %v3360_v45 = vmax.f32 %v3310_v34, 0.0  ;;  %v3314_v14 = vadd.f32 %v3313_v23, %v6937_v48  ;;  %v3315_v1 = vpop.f32.mrb[215].mxu1 }
 0x451   :  { %v3359_v11 = vmax.f32 %v3239_v43, 0.0  ;;  %v3243_v3 = vadd.f32 %v3242_v0, %v6937_v48  ;;  %v3361_v41 = vmax.f32 %v3312_v47, 0.0  ;;  %v3316_v38 = vadd.f32 %v3315_v1, %v6937_v48 }
 0x452   :  { %v3470_v59 = vmul.f32 %v6948_v49, %v3358_v27  ;;  %v3366_v32 = vmax.f32 %v3241_v5, 0.0  ;;  %v3472_v55 = vmul.f32 %v6948_v49, %v3360_v45  ;;  %v3368_v4 = vmax.f32 %v3314_v14, 0.0 }
 0x453   :  { %v3471_v51 = vmul.f32 %v6948_v49, %v3359_v11  ;;  %v3367_v53 = vmax.f32 %v3243_v3, 0.0  ;;  %v3473_v28 = vmul.f32 %v6948_v49, %v3361_v41  ;;  %v3369_v57 = vmax.f32 %v3316_v38, 0.0 }
 0x454   :  { %v3567_v36 = vadd.f32 %v3566_v12, %v3470_v59  ;;  %v3478_v46 = vmul.f32 %v6962_v56, %v3366_v32  ;;  %v3593_v44 = vadd.f32 %v3592_v10, %v3472_v55  ;;  %v3480_v52 = vmul.f32 %v6962_v56, %v3368_v4 }
 0x455   :  { %v3580_v19 = vadd.f32 %v3579_v20, %v3471_v51  ;;  %v3479_v35 = vmul.f32 %v6962_v56, %v3367_v53  ;;  %v3246_v60 = vpop.f32.mrb[216].mxu0  ;;  %v3606_v12 = vadd.f32 %v3605_v25, %v3473_v28  ;;  %v3481_v62 = vmul.f32 %v6962_v56, %v3369_v57  ;;  %v3319_v21 = vpop.f32.mrb[216].mxu1 }
 0x456   :  { %v3568_v17 = vadd.f32 %v3567_v36, %v3478_v46  ;;  %v3247_v31 = vadd.f32 %v3246_v60, %v6944_v61  ;;  %v3248_v26 = vpop.f32.mrb[217].mxu0  ;;  %v3594_v24 = vadd.f32 %v3593_v44, %v3480_v52  ;;  %v3320_v20 = vadd.f32 %v3319_v21, %v6944_v61  ;;  %v3321_v42 = vpop.f32.mrb[217].mxu1 }
 0x457   :  { %v3581_v54 = vadd.f32 %v3580_v19, %v3479_v35  ;;  %v3249_v48 = vadd.f32 %v3248_v26, %v6944_v61  ;;  %v3250_v7 = vpop.f32.mrb[218].mxu0  ;;  %v3607_v37 = vadd.f32 %v3606_v12, %v3481_v62  ;;  %v3322_v33 = vadd.f32 %v3321_v42, %v6944_v61  ;;  %v3323_v0 = vpop.f32.mrb[218].mxu1 }
 0x458   :  { %v3374_v15 = vmax.f32 %v3247_v31, 0.0  ;;  %v3251_v29 = vadd.f32 %v3250_v7, %v6959_v9  ;;  %v3252_v49 = vpop.f32.mrb[219].mxu0  ;;  %v3376_v56 = vmax.f32 %v3320_v20, 0.0  ;;  %v3324_v34 = vadd.f32 %v3323_v0, %v6959_v9  ;;  %v3325_v6 = vpop.f32.mrb[219].mxu1 }
 0x459   :  { %v3375_v43 = vmax.f32 %v3249_v48, 0.0  ;;  %v3253_v2 = vadd.f32 %v3252_v49, %v6959_v9  ;;  %v3377_v25 = vmax.f32 %v3322_v33, 0.0  ;;  %v3326_v47 = vadd.f32 %v3325_v6, %v6959_v9 }
 0x45a   :  { %v3486_v27 = vmul.f32 %v6980_v63, %v3374_v15  ;;  %v3382_v5 = vmax.f32 %v3251_v29, 0.0  ;;  %v3488_v32 = vmul.f32 %v6980_v63, %v3376_v56  ;;  %v3384_v45 = vmax.f32 %v3324_v34, 0.0 }
 0x45b   :  { %v3487_v10 = vmul.f32 %v6980_v63, %v3375_v43  ;;  %v3383_v11 = vmax.f32 %v3253_v2, 0.0  ;;  %v3489_v14 = vmul.f32 %v6980_v63, %v3377_v25  ;;  %v3385_v1 = vmax.f32 %v3326_v47, 0.0 }
 0x45c   :  { %v3569_v3 = vadd.f32 %v3568_v17, %v3486_v27  ;;  %v3494_v59 = vmul.f32 %v6996_v40, %v3382_v5  ;;  %v3595_v46 = vadd.f32 %v3594_v24, %v3488_v32  ;;  %v3496_v38 = vmul.f32 %v6996_v40, %v3384_v45 }
 0x45d   :  { %v3582_v23 = vadd.f32 %v3581_v54, %v3487_v10  ;;  %v3495_v61 = vmul.f32 %v6996_v40, %v3383_v11  ;;  %v3256_v51 = vpop.f32.mrb[220].mxu0  ;;  %v3608_v4 = vadd.f32 %v3607_v37, %v3489_v14  ;;  %v3497_v35 = vmul.f32 %v6996_v40, %v3385_v1  ;;  %v3329_v28 = vpop.f32.mrb[220].mxu1 }
 0x45e   :  { %v3570_v53 = vadd.f32 %v3569_v3, %v3494_v59  ;;  %v3257_v36 = vadd.f32 %v3256_v51, %v6976_v16  ;;  %v3258_v41 = vpop.f32.mrb[221].mxu0  ;;  %v3596_v57 = vadd.f32 %v3595_v46, %v3496_v38  ;;  %v3330_v31 = vadd.f32 %v3329_v28, %v6976_v16  ;;  %v3331_v44 = vpop.f32.mrb[221].mxu1 }
 0x45f   :  { %v3583_v55 = vadd.f32 %v3582_v23, %v3495_v61  ;;  %v3259_v9 = vadd.f32 %v3258_v41, %v6976_v16  ;;  %v3260_v19 = vpop.f32.mrb[222].mxu0  ;;  %v3609_v54 = vadd.f32 %v3608_v4, %v3497_v35  ;;  %v3332_v7 = vadd.f32 %v3331_v44, %v6976_v16  ;;  %v3333_v62 = vpop.f32.mrb[222].mxu1 }
 0x460   :  { %v3390_v60 = vmax.f32 %v3257_v36, 0.0  ;;  %v3261_v17 = vadd.f32 %v3260_v19, %v6992_v58  ;;  %v3262_v63 = vpop.f32.mrb[223].mxu0  ;;  %v3392_v40 = vmax.f32 %v3330_v31, 0.0  ;;  %v3334_v21 = vadd.f32 %v3333_v62, %v6992_v58  ;;  %v3335_v49 = vpop.f32.mrb[223].mxu1 }
 0x461   :  { %v3391_v26 = vmax.f32 %v3259_v9, 0.0  ;;  %v3263_v52 = vadd.f32 %v3262_v63, %v6992_v58  ;;  %v3393_v20 = vmax.f32 %v3332_v7, 0.0  ;;  %v3336_v42 = vadd.f32 %v3335_v49, %v6992_v58 }
 0x462   :  { %v3502_v48 = vmul.f32 %v7010_v18, %v3390_v60  ;;  %v3398_v12 = vmax.f32 %v3261_v17, 0.0  ;;  %v3504_v2 = vmul.f32 %v7010_v18, %v3392_v40  ;;  %v3400_v27 = vmax.f32 %v3334_v21, 0.0 }
 0x463   :  { %v3503_v15 = vmul.f32 %v7010_v18, %v3391_v26  ;;  %v3399_v29 = vmax.f32 %v3263_v52, 0.0  ;;  %v3505_v33 = vmul.f32 %v7010_v18, %v3393_v20  ;;  %v3401_v0 = vmax.f32 %v3336_v42, 0.0 }
 0x464   :  { %v3571_v24 = vadd.f32 %v3570_v53, %v3502_v48  ;;  %v3510_v43 = vmul.f32 %v7016_v8, %v3398_v12  ;;  %v3597_v56 = vadd.f32 %v3596_v57, %v3504_v2  ;;  %v3512_v10 = vmul.f32 %v7016_v8, %v3400_v27 }
 0x465   :  { %v3584_v37 = vadd.f32 %v3583_v55, %v3503_v15  ;;  %v3511_v16 = vmul.f32 %v7016_v8, %v3399_v29  ;;  %v3610_v11 = vadd.f32 %v3609_v54, %v3505_v33  ;;  %v3513_v3 = vmul.f32 %v7016_v8, %v3401_v0 }
 0x466   :  { %v3572_v5 = vadd.f32 %v3571_v24, %v3510_v43  ;;  %v3598_v25 = vadd.f32 %v3597_v56, %v3512_v10  ;;  %v3684_v7 = vrot.slane %v3676_v50, %v7033_v13 }
 0x467   :  { %v3585_v34 = vadd.f32 %v3584_v37, %v3511_v16  ;;  %v3611_v47 = vadd.f32 %v3610_v11, %v3513_v3 }
 0x468   :  { %v3573_v6 = vrot.slane %v3572_v5, 4  ;;  %v3599_v32 = vrot.slane %v3598_v25, 4 }
 0x469   :  { %v3586_v58 = vrot.slane %v3585_v34, 4  ;;  %v3612_v61 = vrot.slane %v3611_v47, 4 }
 0x46a   :  { %v3574_v59 = vadd.f32 %v3573_v6, %v3572_v5  ;;  %v3600_v51 = vadd.f32 %v3599_v32, %v3598_v25 }
 0x46b   :  { %v3587_v23 = vadd.f32 %v3586_v58, %v3585_v34  ;;  %v3613_v53 = vadd.f32 %v3612_v61, %v3611_v47 }
 0x46c   :  { %v3575_v45 = vrot.slane %v3574_v59, 2  ;;  %v3601_v1 = vrot.slane %v3600_v51, 2 }
 0x46d   :  { %v3588_v18 = vrot.slane %v3587_v23, 2  ;;  %v3614_v46 = vrot.slane %v3613_v53, 2 }
 0x46e   :  { %v3576_v14 = vadd.f32 %v3575_v45, %v3574_v59  ;;  %v3602_v38 = vadd.f32 %v3601_v1, %v3600_v51 }
 0x46f   :  { %v3589_v36 = vadd.f32 %v3588_v18, %v3587_v23  ;;  %v3615_v8 = vadd.f32 %v3614_v46, %v3613_v53 }
 0x470   :  { %v3577_v41 = vrot.slane %v3576_v14, 1  ;;  %v3603_v19 = vrot.slane %v3602_v38, 1 }
 0x471   :  { %v3590_v55 = vrot.slane %v3589_v36, 1  ;;  %v3616_v35 = vrot.slane %v3615_v8, 1 }
 0x472   :  { %v3578_v9 = vadd.f32 %v3577_v41, %v3576_v14  ;;  %v3604_v28 = vadd.f32 %v3603_v19, %v3602_v38 }
 0x473   :  { %v3591_v4 = vadd.f32 %v3590_v55, %v3589_v36  ;;  %v3617_v63 = vadd.f32 %v3616_v35, %v3615_v8 }
 0x474   :  { %v3632_v60 = vadd.f32 %v7028_v39, %v3578_v9  ;;  %v3634_v57 = vadd.f32 %v7028_v39, %v3604_v28 }
 0x475   :  { %v3633_v17 = vadd.f32 %v7028_v39, %v3591_v4  ;;  %v3635_v26 = vadd.f32 %v7028_v39, %v3617_v63 }
 0x477   :  { %v3646_v31 = vcombine.low %v3632_v60, %v3633_v17  ;;  %v3647_v44 = vcombine.low %v3634_v57, %v3635_v26 }
 0x479   :  { %v3668_v52 = vrot.slane %v3646_v31, %v7033_v13  ;;  %v3675_v54 = vrot.slane %v3647_v44, %v7033_v13 }
 0x47b   :  { %v3677_v48 = vcombine.low %v3668_v52, %v3675_v54 }
 0x47d   :  { %v3691_v12 = vrot.slane %v3677_v48, %v7033_v13 }
 0x47f   :  { %v3692_v62 = vcombine.low %v3684_v7, %v3691_v12 }
 0x481   :  { %3694 = vst [vmem:[#allocation3] sm:$0xff] %v3692_v62 }
 0x482   :  { %4069 = shalt.err (!%p4066_p4)
}
 0x483   :  { %s4070_s7 = scalar_lea.hbm %s7142_s10, 128 }
 0x484   :  { %p4071_p5 = scmp.ne.s32.totalorder %s7142_s10, %s4070_s7  ;;  %p4074_p6 = scmp.lt.u32.totalorder %s4070_s7, %s7142_s10 }
 0x486   :  { %p4076_p7 = pnand %p4074_p6, %p4071_p5 }
 0x488   :  { %4079 = shalt.err (!%p4076_p7)
}
 0x489   :  { %3704 = dma.vmem_to_hbm [thread:$0]  %s3702_s5, 128, %s7142_s10, [#allocation4]  }
 0x48a   :  { %4080 = dma.done.wait [#allocation4], 128  }
 0x48b   :  { %4081 = vsyncadd [#allocation4], 4294967168 }
 0x48c   :  { %3708 = vsyncpa [#allocation4], 1 }

</bundles_post_ra>
